<compile_context>
chip_gen: v7x
topology: tpu7x:2x2x1
jax: 0.10.0
libtpu: 0.0.40
codegen_flags: <defaults>
</compile_context>

<pallas_src>
import functools

import jax
import jax.numpy as jnp
from jax.experimental import pallas as pl
from jax.experimental.pallas import tpu as pltpu

CHANNEL_DIM = 4
NDF = 8
EPS = 1e-5
NEG_SLOPE = 0.2

# Row tile (lane axis of the [Cout, R] output). 512 keeps every
# double-buffered bf16 input block <= ~1 MB (Kp <= 1024), comfortably inside
# scoped VMEM on v5e/v6e/v7x.  v6e (128 MiB VMEM) can use 1024-2048.
TILE_R = 512
VMEM_LIMIT = 32 * 1024 * 1024

# Layer configs used by forward(): (k, stride, pad, cin, cout, use_bn)
CONFIGS = (
    (7, 2, 3, CHANNEL_DIM, NDF, False),
    (5, 2, 2, NDF, NDF * 2, True),
    (4, 2, 1, NDF * 2, NDF * 4, True),
    (4, 2, 1, NDF * 4, NDF * 8, True),
    (4, 2, 1, NDF * 8, NDF * 8, True),
    (3, 2, 1, NDF * 8, NDF * 8, True),
)
SCALES = (1.0, 2.0, 2.0, 2.0, 2.0, 4.0)


def _round_up(x, m):
    return (x + m - 1) // m * m


# ----------------------------------------------------------------------------
# Kernels
# ----------------------------------------------------------------------------
def _leaky(y):
    return jnp.where(y >= 0.0, y, NEG_SLOPE * y)


def _conv_lrelu_kernel(pT_ref, w_ref, o_ref):
    # [Cout, Kp](bf16) @ [Kp, TILE_R](bf16) -> [Cout, TILE_R](f32)
    y = jnp.dot(w_ref[...], pT_ref[...], preferred_element_type=jnp.float32)
    o_ref[...] = _leaky(y)


def _conv_stats_kernel(pT_ref, w_ref, y_ref, ssum_ref, ssq_ref):
    # Pass 1 of the tiled BN path: conv GEMM + per-channel sum / sum-of-squares
    # accumulated across the (arbitrary) row axis.
    y = jnp.dot(w_ref[...], pT_ref[...], preferred_element_type=jnp.float32)
    y_ref[...] = y

    @pl.when(pl.program_id(0) == 0)
    def _():
        ssum_ref[...] = jnp.zeros_like(ssum_ref)
        ssq_ref[...] = jnp.zeros_like(ssq_ref)

    ssum_ref[...] += jnp.sum(y, axis=1, keepdims=True)
    ssq_ref[...] += jnp.sum(y * y, axis=1, keepdims=True)


def _affine_lrelu_kernel(y_ref, scale_ref, shift_ref, o_ref):
    # Pass 2 of the tiled BN path: folded BN (2 VPU ops/elem) + LeakyReLU.
    o_ref[...] = _leaky(y_ref[...] * scale_ref[...] + shift_ref[...])


def _conv_fused_kernel(pT_ref, w_ref, g_ref, b_ref, o_ref, *, use_bn, inv_r):
    # Single-shot fused conv (+BN) + LeakyReLU for layers whose row count fits
    # one tile.  Padded (zero) columns contribute 0 to the sums; dividing by
    # the true row count keeps batch statistics exact.
    y = jnp.dot(w_ref[...], pT_ref[...], preferred_element_type=jnp.float32)
    if use_bn:
        mean = jnp.sum(y, axis=1, keepdims=True) * inv_r
        var = jnp.maximum(
            jnp.sum(y * y, axis=1, keepdims=True) * inv_r - mean * mean, 0.0)
        scale = g_ref[...] * jax.lax.rsqrt(var + EPS)
        shift = b_ref[...] - mean * scale
        y = y * scale + shift
    o_ref[...] = _leaky(y)


# ----------------------------------------------------------------------------
# pallas_call wrappers
# ----------------------------------------------------------------------------
def conv_lrelu_tiled(pT, w_mat, tile_r):
    kp, rp = pT.shape
    cout = w_mat.shape[0]
    return pl.pallas_call(
        _conv_lrelu_kernel,
        out_shape=jax.ShapeDtypeStruct((cout, rp), jnp.float32),
        grid_spec=pltpu.PrefetchScalarGridSpec(
            num_scalar_prefetch=0,
            grid=(rp // tile_r,),
            in_specs=[pl.BlockSpec((kp, tile_r), lambda r: (0, r)),
                      pl.BlockSpec((cout, kp), lambda r: (0, 0))],
            out_specs=pl.BlockSpec((cout, tile_r), lambda r: (0, r)),
        ),
        compiler_params=pltpu.CompilerParams(
            dimension_semantics=("parallel",),
            vmem_limit_bytes=VMEM_LIMIT),
    )(pT, w_mat)


def conv_stats_tiled(pT, w_mat, tile_r):
    kp, rp = pT.shape
    cout = w_mat.shape[0]
    return pl.pallas_call(
        _conv_stats_kernel,
        out_shape=(jax.ShapeDtypeStruct((cout, rp), jnp.float32),
                   jax.ShapeDtypeStruct((cout, 1), jnp.float32),
                   jax.ShapeDtypeStruct((cout, 1), jnp.float32)),
        grid_spec=pltpu.PrefetchScalarGridSpec(
            num_scalar_prefetch=0,
            grid=(rp // tile_r,),
            in_specs=[pl.BlockSpec((kp, tile_r), lambda r: (0, r)),
                      pl.BlockSpec((cout, kp), lambda r: (0, 0))],
            out_specs=[pl.BlockSpec((cout, tile_r), lambda r: (0, r)),
                       pl.BlockSpec((cout, 1), lambda r: (0, 0)),
                       pl.BlockSpec((cout, 1), lambda r: (0, 0))],
        ),
        compiler_params=pltpu.CompilerParams(
            # Stats outputs accumulate across row tiles -> reduction axis.
            dimension_semantics=("arbitrary",),
            vmem_limit_bytes=VMEM_LIMIT),
    )(pT, w_mat)


def affine_lrelu_tiled(y, scale, shift, tile_r):
    cout, rp = y.shape
    return pl.pallas_call(
        _affine_lrelu_kernel,
        out_shape=jax.ShapeDtypeStruct((cout, rp), jnp.float32),
        grid_spec=pltpu.PrefetchScalarGridSpec(
            num_scalar_prefetch=0,
            grid=(rp // tile_r,),
            in_specs=[pl.BlockSpec((cout, tile_r), lambda r: (0, r)),
                      pl.BlockSpec((cout, 1), lambda r: (0, 0)),
                      pl.BlockSpec((cout, 1), lambda r: (0, 0))],
            out_specs=pl.BlockSpec((cout, tile_r), lambda r: (0, r)),
        ),
        compiler_params=pltpu.CompilerParams(
            dimension_semantics=("parallel",),
            vmem_limit_bytes=VMEM_LIMIT),
    )(y, scale, shift)


def conv_fused_single(pT, w_mat, gamma, beta, use_bn, r_true):
    _, rp = pT.shape
    cout = w_mat.shape[0]
    kern = functools.partial(_conv_fused_kernel, use_bn=use_bn, inv_r=1.0 / r_true)
    vmem = pl.BlockSpec(memory_space=pltpu.MemorySpace.VMEM)
    return pl.pallas_call(
        kern,
        out_shape=jax.ShapeDtypeStruct((cout, rp), jnp.float32),
        in_specs=[vmem, vmem, vmem, vmem],
        out_specs=vmem,
        compiler_params=pltpu.CompilerParams(vmem_limit_bytes=VMEM_LIMIT),
    )(pT, w_mat, gamma, beta)


# ----------------------------------------------------------------------------
# Glue: transposed im2col (NCHW in, [K, R] out) and layer application
# ----------------------------------------------------------------------------
def im2col_T(x_nchw, k, stride, pad):
    """Returns patchesT [K, R] with K ordered (kh, kw, cin), R ordered (n, oh, ow)."""
    x = jnp.pad(x_nchw, ((0, 0), (0, 0), (pad, pad), (pad, pad)))
    n, c, hp, wp = x.shape
    oh = (hp - k) // stride + 1
    ow = (wp - k) // stride + 1
    parts = []
    for i in range(k):
        for j in range(k):
            parts.append(x[:, :, i::stride, j::stride][:, :, :oh, :ow])
    p = jnp.stack(parts, axis=0)                 # [K*K, N, C, OH, OW]
    p = jnp.transpose(p, (0, 2, 1, 3, 4))        # [K*K, C, N, OH, OW]
    return p.reshape(k * k * c, n * oh * ow), oh, ow


def apply_layer(x_nchw, w, gamma, beta, k, stride, pad, use_bn, tile_r=TILE_R):
    n = x_nchw.shape[0]
    cout = w.shape[0]
    pT, oh, ow = im2col_T(x_nchw, k, stride, pad)     # [K, R] f32
    kdim, rdim = pT.shape

    # Pad K to a multiple of 128 (clean MXU feed), pad R to lane-dense tiles.
    kp = _round_up(kdim, 128)
    if rdim <= tile_r:
        rp = max(128, _round_up(rdim, 128))
    else:
        rp = _round_up(rdim, tile_r)

    pT = jnp.pad(pT, ((0, kp - kdim), (0, rp - rdim))).astype(jnp.bfloat16)
    # PyTorch weight [Cout, Cin, KH, KW] -> [Cout, (kh,kw,cin)] matching patch order.
    w_mat = jnp.transpose(w, (0, 2, 3, 1)).reshape(cout, kdim)
    w_mat = jnp.pad(w_mat, ((0, 0), (0, kp - kdim))).astype(jnp.bfloat16)
    g = gamma.reshape(cout, 1).astype(jnp.float32)
    b = beta.reshape(cout, 1).astype(jnp.float32)

    if rp <= tile_r:
        # Tiny layer: everything fits one tile -> single fused launch.
        yT = conv_fused_single(pT, w_mat, g, b, use_bn=use_bn, r_true=rdim)
    elif not use_bn:
        yT = conv_lrelu_tiled(pT, w_mat, tile_r)
    else:
        # Two-pass tiled BN: exact batch statistics across all row tiles.
        y, ssum, ssq = conv_stats_tiled(pT, w_mat, tile_r)
        mean = ssum / rdim
        var = jnp.maximum(ssq / rdim - mean * mean, 0.0)
        scale = g * jax.lax.rsqrt(var + EPS)
        shift = b - mean * scale
        yT = affine_lrelu_tiled(y, scale, shift, tile_r)

    yT = yT[:, :rdim]                                         # [Cout, N*OH*OW]
    return yT.reshape(cout, n, oh, ow).transpose(1, 0, 2, 3)  # NCHW


# ----------------------------------------------------------------------------
# Parameter init (matches CriticNet.__init__ initialization scheme)
# ----------------------------------------------------------------------------
def init_params(key):
    params = []
    for i, (k, _, _, cin, cout, use_bn) in enumerate(CONFIGS):
        w_key, bn_key = jax.random.split(jax.random.fold_in(key, i))
        n_fan = k * k * cout
        w = jax.random.normal(w_key, (cout, cin, k, k), jnp.float32) * jnp.sqrt(2.0 / n_fan)
        if use_bn:
            gamma = 1.0 + 0.02 * jax.random.normal(bn_key, (cout,), jnp.float32)
        else:
            gamma = jnp.ones((cout,), jnp.float32)
        beta = jnp.zeros((cout,), jnp.float32)
        params.append(dict(w=w, gamma=gamma, beta=beta))
    return params


# ----------------------------------------------------------------------------
# Forward
# ----------------------------------------------------------------------------
def critic_forward(x_nchw, params):
    n = x_nchw.shape[0]
    pieces = [x_nchw.reshape(n, -1)]
    cur = x_nchw
    for prm, cfg, sc in zip(params, CONFIGS, SCALES):
        k, s, p, _, _, use_bn = cfg
        cur = apply_layer(cur, prm["w"], prm["gamma"], prm["beta"], k, s, p, use_bn)
        # Per-feature scale: fused by XLA into the concat copy (LeakyReLU is
        # positively homogeneous, so placement before/after is equivalent).
        pieces.append(sc * cur.reshape(n, -1))
    return jnp.concatenate(pieces, axis=1)


if __name__ == "__main__":
    key = jax.random.PRNGKey(0)
    pkey, xkey = jax.random.split(key)
    params = init_params(pkey)
    # Small NCHW input: batch=2, CHANNEL_DIM=4, 128x128 spatial — exercises the
    # tiled no-BN path (layer 1), the two-pass tiled BN path (layer 2) and the
    # single-shot fused path (layers 3-6).
    x = jax.random.normal(xkey, (2, CHANNEL_DIM, 128, 128), jnp.float32)
    fwd = jax.jit(critic_forward)
    out = fwd(x, params)
    jax.block_until_ready(out)
    expected_cols = (4 * 128 * 128 + 8 * 64 * 64 + 16 * 32 * 32 + 32 * 16 * 16
                     + 64 * 8 * 8 + 64 * 4 * 4 + 64 * 2 * 2)
    assert out.shape == (2, expected_cols), out.shape
    assert bool(jnp.isfinite(out).all())
    print("KERNEL_OK")
</pallas_src>

<mosaic_0001>
module attributes {stable_mosaic.version = 11 : i64} {
  func.func @_conv_lrelu_kernel(%arg0: i32, %arg1: memref<256x512xbf16, #tpu.memory_space<vmem>>, %arg2: memref<8x256xbf16, #tpu.memory_space<vmem>>, %arg3: memref<8x512xf32, #tpu.memory_space<vmem>>) attributes {dimension_semantics = [#tpu.dimension_semantics<parallel>], iteration_bounds = array<i64: 16>, scalar_prefetch = 0 : i64, scratch_operands = 0 : i64, tpu.core_type = #tpu.core_type<tc>, window_params = [{transform_indices = @transform_0, window_bounds = array<i64: 256, 512>}, {pipeline_mode = #tpu.pipeline_mode<synchronous>, transform_indices = @transform_1, window_bounds = array<i64: 8, 256>}, {transform_indices = @transform_2, window_bounds = array<i64: 8, 512>}]} {
    %c0 = arith.constant 0 : index
    %c0_0 = arith.constant 0 : index
    %0 = vector.load %arg2[%c0, %c0_0] : memref<8x256xbf16, #tpu.memory_space<vmem>>, vector<8x256xbf16>
    %c0_1 = arith.constant 0 : index
    %c0_2 = arith.constant 0 : index
    %1 = vector.load %arg1[%c0_1, %c0_2] : memref<256x512xbf16, #tpu.memory_space<vmem>>, vector<256x512xbf16>
    %cst = arith.constant dense<0.000000e+00> : vector<8x512xf32>
    %2 = tpu.matmul %0, %1, %cst {dimension_numbers = #tpu.dot_dimension_numbers<[1], [0], [0], [1], [0, 0, 1, 1], [], []>} : vector<8x256xbf16>, vector<256x512xbf16>, vector<8x512xf32> -> vector<8x512xf32>
    %cst_3 = arith.constant 0.000000e+00 : f32
    %3 = vector.broadcast %cst_3 : f32 to vector<8x512xf32>
    %4 = arith.cmpf oge, %2, %3 : vector<8x512xf32>
    %cst_4 = arith.constant 2.000000e-01 : f32
    %5 = vector.broadcast %cst_4 : f32 to vector<8x512xf32>
    %6 = arith.mulf %5, %2 : vector<8x512xf32>
    %7 = arith.select %4, %2, %6 : vector<8x512xi1>, vector<8x512xf32>
    %c0_5 = arith.constant 0 : index
    %c0_6 = arith.constant 0 : index
    %8 = vector.load %arg3[%c0_5, %c0_6] : memref<8x512xf32, #tpu.memory_space<vmem>>, vector<8x512xf32>
    tpu.vector_store %arg3[%c0_5, %c0_6], %7 {strides = array<i32>} : memref<8x512xf32, #tpu.memory_space<vmem>>, vector<8x512xf32>,
    return
  }
  func.func @transform_0(%arg0: i32) -> (i32, i32) {
    %c0_i32 = arith.constant 0 : i32
    %c0_i32_0 = arith.constant 0 : i32
    return %c0_i32, %arg0 : i32, i32
  }
  func.func @transform_1(%arg0: i32) -> (i32, i32) {
    %c0_i32 = arith.constant 0 : i32
    %c0_i32_0 = arith.constant 0 : i32
    %c0_i32_1 = arith.constant 0 : i32
    return %c0_i32, %c0_i32_0 : i32, i32
  }
  func.func @transform_2(%arg0: i32) -> (i32, i32) {
    %c0_i32 = arith.constant 0 : i32
    %c0_i32_0 = arith.constant 0 : i32
    return %c0_i32, %arg0 : i32, i32
  }
}

module attributes {stable_mosaic.version = 11 : i64} {
  func.func @_conv_stats_kernel(%arg0: i32, %arg1: memref<256x512xbf16, #tpu.memory_space<vmem>>, %arg2: memref<16x256xbf16, #tpu.memory_space<vmem>>, %arg3: memref<16x512xf32, #tpu.memory_space<vmem>>, %arg4: memref<16x1xf32, #tpu.memory_space<vmem>>, %arg5: memref<16x1xf32, #tpu.memory_space<vmem>>) attributes {dimension_semantics = [#tpu.dimension_semantics<arbitrary>], iteration_bounds = array<i64: 4>, scalar_prefetch = 0 : i64, scratch_operands = 0 : i64, tpu.core_type = #tpu.core_type<tc>, window_params = [{transform_indices = @transform_0, window_bounds = array<i64: 256, 512>}, {pipeline_mode = #tpu.pipeline_mode<synchronous>, transform_indices = @transform_1, window_bounds = array<i64: 16, 256>}, {transform_indices = @transform_2, window_bounds = array<i64: 16, 512>}, {pipeline_mode = #tpu.pipeline_mode<synchronous>, transform_indices = @transform_3, window_bounds = array<i64: 16, 1>}, {pipeline_mode = #tpu.pipeline_mode<synchronous>, transform_indices = @transform_4, window_bounds = array<i64: 16, 1>}]} {
    %c0 = arith.constant 0 : index
    %c0_0 = arith.constant 0 : index
    %0 = vector.load %arg2[%c0, %c0_0] : memref<16x256xbf16, #tpu.memory_space<vmem>>, vector<16x256xbf16>
    %c0_1 = arith.constant 0 : index
    %c0_2 = arith.constant 0 : index
    %1 = vector.load %arg1[%c0_1, %c0_2] : memref<256x512xbf16, #tpu.memory_space<vmem>>, vector<256x512xbf16>
    %cst = arith.constant dense<0.000000e+00> : vector<16x512xf32>
    %2 = tpu.matmul %0, %1, %cst {dimension_numbers = #tpu.dot_dimension_numbers<[1], [0], [0], [1], [0, 0, 1, 1], [], []>} : vector<16x256xbf16>, vector<256x512xbf16>, vector<16x512xf32> -> vector<16x512xf32>
    %c0_3 = arith.constant 0 : index
    %c0_4 = arith.constant 0 : index
    %3 = vector.load %arg3[%c0_3, %c0_4] : memref<16x512xf32, #tpu.memory_space<vmem>>, vector<16x512xf32>
    tpu.vector_store %arg3[%c0_3, %c0_4], %2 {strides = array<i32>} : memref<16x512xf32, #tpu.memory_space<vmem>>, vector<16x512xf32>,
    %c0_i32 = arith.constant 0 : i32
    %4 = arith.cmpi eq, %arg0, %c0_i32 : i32
    %5 = arith.extui %4 : i1 to i32
    %c0_i32_5 = arith.constant 0 : i32
    %6 = arith.cmpi ne, %5, %c0_i32_5 : i32
    scf.if %6 {
      %cst_16 = arith.constant 0.000000e+00 : f32
      %18 = vector.broadcast %cst_16 : f32 to vector<16x1xf32>
      %c0_17 = arith.constant 0 : index
      %c0_18 = arith.constant 0 : index
      %19 = vector.load %arg4[%c0_17, %c0_18] : memref<16x1xf32, #tpu.memory_space<vmem>>, vector<16x1xf32>
      tpu.vector_store %arg4[%c0_17, %c0_18], %18 {strides = array<i32>} : memref<16x1xf32, #tpu.memory_space<vmem>>, vector<16x1xf32>,
      %cst_19 = arith.constant 0.000000e+00 : f32
      %20 = vector.broadcast %cst_19 : f32 to vector<16x1xf32>
      %c0_20 = arith.constant 0 : index
      %c0_21 = arith.constant 0 : index
      %21 = vector.load %arg5[%c0_20, %c0_21] : memref<16x1xf32, #tpu.memory_space<vmem>>, vector<16x1xf32>
      tpu.vector_store %arg5[%c0_20, %c0_21], %20 {strides = array<i32>} : memref<16x1xf32, #tpu.memory_space<vmem>>, vector<16x1xf32>,
    } else {
    }
    %c0_6 = arith.constant 0 : index
    %c0_7 = arith.constant 0 : index
    %7 = vector.load %arg4[%c0_6, %c0_7] : memref<16x1xf32, #tpu.memory_space<vmem>>, vector<16x1xf32>
    %cst_8 = arith.constant dense<0.000000e+00> : vector<16xf32>
    %8 = vector.multi_reduction <add>, %2, %cst_8 [1] : vector<16x512xf32> to vector<16xf32>
    %9 = vector.shape_cast %8 : vector<16xf32> to vector<16x1xf32>
    %10 = arith.addf %7, %9 : vector<16x1xf32>
    %c0_9 = arith.constant 0 : index
    %c0_10 = arith.constant 0 : index
    %11 = vector.load %arg4[%c0_9, %c0_10] : memref<16x1xf32, #tpu.memory_space<vmem>>, vector<16x1xf32>
    tpu.vector_store %arg4[%c0_9, %c0_10], %10 {strides = array<i32>} : memref<16x1xf32, #tpu.memory_space<vmem>>, vector<16x1xf32>,
    %c0_11 = arith.constant 0 : index
    %c0_12 = arith.constant 0 : index
    %12 = vector.load %arg5[%c0_11, %c0_12] : memref<16x1xf32, #tpu.memory_space<vmem>>, vector<16x1xf32>
    %13 = arith.mulf %2, %2 : vector<16x512xf32>
    %cst_13 = arith.constant dense<0.000000e+00> : vector<16xf32>
    %14 = vector.multi_reduction <add>, %13, %cst_13 [1] : vector<16x512xf32> to vector<16xf32>
    %15 = vector.shape_cast %14 : vector<16xf32> to vector<16x1xf32>
    %16 = arith.addf %12, %15 : vector<16x1xf32>
    %c0_14 = arith.constant 0 : index
    %c0_15 = arith.constant 0 : index
    %17 = vector.load %arg5[%c0_14, %c0_15] : memref<16x1xf32, #tpu.memory_space<vmem>>, vector<16x1xf32>
    tpu.vector_store %arg5[%c0_14, %c0_15], %16 {strides = array<i32>} : memref<16x1xf32, #tpu.memory_space<vmem>>, vector<16x1xf32>,
    return
  }
  func.func @transform_0(%arg0: i32) -> (i32, i32) {
    %c0_i32 = arith.constant 0 : i32
    %c0_i32_0 = arith.constant 0 : i32
    return %c0_i32, %arg0 : i32, i32
  }
  func.func @transform_1(%arg0: i32) -> (i32, i32) {
    %c0_i32 = arith.constant 0 : i32
    %c0_i32_0 = arith.constant 0 : i32
    %c0_i32_1 = arith.constant 0 : i32
    return %c0_i32, %c0_i32_0 : i32, i32
  }
  func.func @transform_2(%arg0: i32) -> (i32, i32) {
    %c0_i32 = arith.constant 0 : i32
    %c0_i32_0 = arith.constant 0 : i32
    return %c0_i32, %arg0 : i32, i32
  }
  func.func @transform_3(%arg0: i32) -> (i32, i32) {
    %c0_i32 = arith.constant 0 : i32
    %c0_i32_0 = arith.constant 0 : i32
    %c0_i32_1 = arith.constant 0 : i32
    return %c0_i32, %c0_i32_0 : i32, i32
  }
  func.func @transform_4(%arg0: i32) -> (i32, i32) {
    %c0_i32 = arith.constant 0 : i32
    %c0_i32_0 = arith.constant 0 : i32
    %c0_i32_1 = arith.constant 0 : i32
    return %c0_i32, %c0_i32_0 : i32, i32
  }
}

module attributes {stable_mosaic.version = 11 : i64} {
  func.func @_affine_lrelu_kernel(%arg0: i32, %arg1: memref<16x512xf32, #tpu.memory_space<vmem>>, %arg2: memref<16x1xf32, #tpu.memory_space<vmem>>, %arg3: memref<16x1xf32, #tpu.memory_space<vmem>>, %arg4: memref<16x512xf32, #tpu.memory_space<vmem>>) attributes {dimension_semantics = [#tpu.dimension_semantics<parallel>], iteration_bounds = array<i64: 4>, scalar_prefetch = 0 : i64, scratch_operands = 0 : i64, tpu.core_type = #tpu.core_type<tc>, window_params = [{transform_indices = @transform_0, window_bounds = array<i64: 16, 512>}, {pipeline_mode = #tpu.pipeline_mode<synchronous>, transform_indices = @transform_1, window_bounds = array<i64: 16, 1>}, {pipeline_mode = #tpu.pipeline_mode<synchronous>, transform_indices = @transform_2, window_bounds = array<i64: 16, 1>}, {transform_indices = @transform_3, window_bounds = array<i64: 16, 512>}]} {
    %c0 = arith.constant 0 : index
    %c0_0 = arith.constant 0 : index
    %0 = vector.load %arg1[%c0, %c0_0] : memref<16x512xf32, #tpu.memory_space<vmem>>, vector<16x512xf32>
    %c0_1 = arith.constant 0 : index
    %c0_2 = arith.constant 0 : index
    %1 = vector.load %arg2[%c0_1, %c0_2] : memref<16x1xf32, #tpu.memory_space<vmem>>, vector<16x1xf32>
    %2 = vector.broadcast %1 : vector<16x1xf32> to vector<16x512xf32>
    %3 = arith.mulf %0, %2 : vector<16x512xf32>
    %c0_3 = arith.constant 0 : index
    %c0_4 = arith.constant 0 : index
    %4 = vector.load %arg3[%c0_3, %c0_4] : memref<16x1xf32, #tpu.memory_space<vmem>>, vector<16x1xf32>
    %5 = vector.broadcast %4 : vector<16x1xf32> to vector<16x512xf32>
    %6 = arith.addf %3, %5 : vector<16x512xf32>
    %cst = arith.constant 0.000000e+00 : f32
    %7 = vector.broadcast %cst : f32 to vector<16x512xf32>
    %8 = arith.cmpf oge, %6, %7 : vector<16x512xf32>
    %cst_5 = arith.constant 2.000000e-01 : f32
    %9 = vector.broadcast %cst_5 : f32 to vector<16x512xf32>
    %10 = arith.mulf %9, %6 : vector<16x512xf32>
    %11 = arith.select %8, %6, %10 : vector<16x512xi1>, vector<16x512xf32>
    %c0_6 = arith.constant 0 : index
    %c0_7 = arith.constant 0 : index
    %12 = vector.load %arg4[%c0_6, %c0_7] : memref<16x512xf32, #tpu.memory_space<vmem>>, vector<16x512xf32>
    tpu.vector_store %arg4[%c0_6, %c0_7], %11 {strides = array<i32>} : memref<16x512xf32, #tpu.memory_space<vmem>>, vector<16x512xf32>,
    return
  }
  func.func @transform_0(%arg0: i32) -> (i32, i32) {
    %c0_i32 = arith.constant 0 : i32
    %c0_i32_0 = arith.constant 0 : i32
    return %c0_i32, %arg0 : i32, i32
  }
  func.func @transform_1(%arg0: i32) -> (i32, i32) {
    %c0_i32 = arith.constant 0 : i32
    %c0_i32_0 = arith.constant 0 : i32
    %c0_i32_1 = arith.constant 0 : i32
    return %c0_i32, %c0_i32_0 : i32, i32
  }
  func.func @transform_2(%arg0: i32) -> (i32, i32) {
    %c0_i32 = arith.constant 0 : i32
    %c0_i32_0 = arith.constant 0 : i32
    %c0_i32_1 = arith.constant 0 : i32
    return %c0_i32, %c0_i32_0 : i32, i32
  }
  func.func @transform_3(%arg0: i32) -> (i32, i32) {
    %c0_i32 = arith.constant 0 : i32
    %c0_i32_0 = arith.constant 0 : i32
    return %c0_i32, %arg0 : i32, i32
  }
}

module attributes {stable_mosaic.version = 11 : i64} {
  func.func @_conv_fused_kernel(%arg0: memref<256x512xbf16, #tpu.memory_space<vmem>>, %arg1: memref<32x256xbf16, #tpu.memory_space<vmem>>, %arg2: memref<32x1xf32, #tpu.memory_space<vmem>>, %arg3: memref<32x1xf32, #tpu.memory_space<vmem>>, %arg4: memref<32x512xf32, #tpu.memory_space<vmem>>) attributes {dimension_semantics = [], scalar_prefetch = 0 : i64, scratch_operands = 0 : i64, tpu.core_type = #tpu.core_type<tc>} {
    %c0 = arith.constant 0 : index
    %c0_0 = arith.constant 0 : index
    %0 = vector.load %arg1[%c0, %c0_0] : memref<32x256xbf16, #tpu.memory_space<vmem>>, vector<32x256xbf16>
    %c0_1 = arith.constant 0 : index
    %c0_2 = arith.constant 0 : index
    %1 = vector.load %arg0[%c0_1, %c0_2] : memref<256x512xbf16, #tpu.memory_space<vmem>>, vector<256x512xbf16>
    %cst = arith.constant dense<0.000000e+00> : vector<32x512xf32>
    %2 = tpu.matmul %0, %1, %cst {dimension_numbers = #tpu.dot_dimension_numbers<[1], [0], [0], [1], [0, 0, 1, 1], [], []>} : vector<32x256xbf16>, vector<256x512xbf16>, vector<32x512xf32> -> vector<32x512xf32>
    %cst_3 = arith.constant dense<0.000000e+00> : vector<32xf32>
    %3 = vector.multi_reduction <add>, %2, %cst_3 [1] : vector<32x512xf32> to vector<32xf32>
    %4 = vector.shape_cast %3 : vector<32xf32> to vector<32x1xf32>
    %cst_4 = arith.constant 0.001953125 : f32
    %5 = vector.broadcast %cst_4 : f32 to vector<32x1xf32>
    %6 = arith.mulf %4, %5 : vector<32x1xf32>
    %7 = arith.mulf %2, %2 : vector<32x512xf32>
    %cst_5 = arith.constant dense<0.000000e+00> : vector<32xf32>
    %8 = vector.multi_reduction <add>, %7, %cst_5 [1] : vector<32x512xf32> to vector<32xf32>
    %9 = vector.shape_cast %8 : vector<32xf32> to vector<32x1xf32>
    %cst_6 = arith.constant 0.001953125 : f32
    %10 = vector.broadcast %cst_6 : f32 to vector<32x1xf32>
    %11 = arith.mulf %9, %10 : vector<32x1xf32>
    %12 = arith.mulf %6, %6 : vector<32x1xf32>
    %13 = arith.subf %11, %12 : vector<32x1xf32>
    %cst_7 = arith.constant 0.000000e+00 : f32
    %14 = vector.broadcast %cst_7 : f32 to vector<32x1xf32>
    %15 = arith.maximumf %13, %14 : vector<32x1xf32>
    %c0_8 = arith.constant 0 : index
    %c0_9 = arith.constant 0 : index
    %16 = vector.load %arg2[%c0_8, %c0_9] : memref<32x1xf32, #tpu.memory_space<vmem>>, vector<32x1xf32>
    %cst_10 = arith.constant 9.99999974E-6 : f32
    %17 = vector.broadcast %cst_10 : f32 to vector<32x1xf32>
    %18 = arith.addf %15, %17 : vector<32x1xf32>
    %19 = math.rsqrt %18 : vector<32x1xf32>
    %20 = arith.mulf %16, %19 : vector<32x1xf32>
    %c0_11 = arith.constant 0 : index
    %c0_12 = arith.constant 0 : index
    %21 = vector.load %arg3[%c0_11, %c0_12] : memref<32x1xf32, #tpu.memory_space<vmem>>, vector<32x1xf32>
    %22 = arith.mulf %6, %20 : vector<32x1xf32>
    %23 = arith.subf %21, %22 : vector<32x1xf32>
    %24 = vector.broadcast %20 : vector<32x1xf32> to vector<32x512xf32>
    %25 = arith.mulf %2, %24 : vector<32x512xf32>
    %26 = vector.broadcast %23 : vector<32x1xf32> to vector<32x512xf32>
    %27 = arith.addf %25, %26 : vector<32x512xf32>
    %cst_13 = arith.constant 0.000000e+00 : f32
    %28 = vector.broadcast %cst_13 : f32 to vector<32x512xf32>
    %29 = arith.cmpf oge, %27, %28 : vector<32x512xf32>
    %cst_14 = arith.constant 2.000000e-01 : f32
    %30 = vector.broadcast %cst_14 : f32 to vector<32x512xf32>
    %31 = arith.mulf %30, %27 : vector<32x512xf32>
    %32 = arith.select %29, %27, %31 : vector<32x512xi1>, vector<32x512xf32>
    %c0_15 = arith.constant 0 : index
    %c0_16 = arith.constant 0 : index
    %33 = vector.load %arg4[%c0_15, %c0_16] : memref<32x512xf32, #tpu.memory_space<vmem>>, vector<32x512xf32>
    tpu.vector_store %arg4[%c0_15, %c0_16], %32 {strides = array<i32>} : memref<32x512xf32, #tpu.memory_space<vmem>>, vector<32x512xf32>,
    return
  }
}

module attributes {stable_mosaic.version = 11 : i64} {
  func.func @_conv_fused_kernel(%arg0: memref<512x128xbf16, #tpu.memory_space<vmem>>, %arg1: memref<64x512xbf16, #tpu.memory_space<vmem>>, %arg2: memref<64x1xf32, #tpu.memory_space<vmem>>, %arg3: memref<64x1xf32, #tpu.memory_space<vmem>>, %arg4: memref<64x128xf32, #tpu.memory_space<vmem>>) attributes {dimension_semantics = [], scalar_prefetch = 0 : i64, scratch_operands = 0 : i64, tpu.core_type = #tpu.core_type<tc>} {
    %c0 = arith.constant 0 : index
    %c0_0 = arith.constant 0 : index
    %0 = vector.load %arg1[%c0, %c0_0] : memref<64x512xbf16, #tpu.memory_space<vmem>>, vector<64x512xbf16>
    %c0_1 = arith.constant 0 : index
    %c0_2 = arith.constant 0 : index
    %1 = vector.load %arg0[%c0_1, %c0_2] : memref<512x128xbf16, #tpu.memory_space<vmem>>, vector<512x128xbf16>
    %cst = arith.constant dense<0.000000e+00> : vector<64x128xf32>
    %2 = tpu.matmul %0, %1, %cst {dimension_numbers = #tpu.dot_dimension_numbers<[1], [0], [0], [1], [0, 0, 1, 1], [], []>} : vector<64x512xbf16>, vector<512x128xbf16>, vector<64x128xf32> -> vector<64x128xf32>
    %cst_3 = arith.constant dense<0.000000e+00> : vector<64xf32>
    %3 = vector.multi_reduction <add>, %2, %cst_3 [1] : vector<64x128xf32> to vector<64xf32>
    %4 = vector.shape_cast %3 : vector<64xf32> to vector<64x1xf32>
    %cst_4 = arith.constant 7.812500e-03 : f32
    %5 = vector.broadcast %cst_4 : f32 to vector<64x1xf32>
    %6 = arith.mulf %4, %5 : vector<64x1xf32>
    %7 = arith.mulf %2, %2 : vector<64x128xf32>
    %cst_5 = arith.constant dense<0.000000e+00> : vector<64xf32>
    %8 = vector.multi_reduction <add>, %7, %cst_5 [1] : vector<64x128xf32> to vector<64xf32>
    %9 = vector.shape_cast %8 : vector<64xf32> to vector<64x1xf32>
    %cst_6 = arith.constant 7.812500e-03 : f32
    %10 = vector.broadcast %cst_6 : f32 to vector<64x1xf32>
    %11 = arith.mulf %9, %10 : vector<64x1xf32>
    %12 = arith.mulf %6, %6 : vector<64x1xf32>
    %13 = arith.subf %11, %12 : vector<64x1xf32>
    %cst_7 = arith.constant 0.000000e+00 : f32
    %14 = vector.broadcast %cst_7 : f32 to vector<64x1xf32>
    %15 = arith.maximumf %13, %14 : vector<64x1xf32>
    %c0_8 = arith.constant 0 : index
    %c0_9 = arith.constant 0 : index
    %16 = vector.load %arg2[%c0_8, %c0_9] : memref<64x1xf32, #tpu.memory_space<vmem>>, vector<64x1xf32>
    %cst_10 = arith.constant 9.99999974E-6 : f32
    %17 = vector.broadcast %cst_10 : f32 to vector<64x1xf32>
    %18 = arith.addf %15, %17 : vector<64x1xf32>
    %19 = math.rsqrt %18 : vector<64x1xf32>
    %20 = arith.mulf %16, %19 : vector<64x1xf32>
    %c0_11 = arith.constant 0 : index
    %c0_12 = arith.constant 0 : index
    %21 = vector.load %arg3[%c0_11, %c0_12] : memref<64x1xf32, #tpu.memory_space<vmem>>, vector<64x1xf32>
    %22 = arith.mulf %6, %20 : vector<64x1xf32>
    %23 = arith.subf %21, %22 : vector<64x1xf32>
    %24 = vector.broadcast %20 : vector<64x1xf32> to vector<64x128xf32>
    %25 = arith.mulf %2, %24 : vector<64x128xf32>
    %26 = vector.broadcast %23 : vector<64x1xf32> to vector<64x128xf32>
    %27 = arith.addf %25, %26 : vector<64x128xf32>
    %cst_13 = arith.constant 0.000000e+00 : f32
    %28 = vector.broadcast %cst_13 : f32 to vector<64x128xf32>
    %29 = arith.cmpf oge, %27, %28 : vector<64x128xf32>
    %cst_14 = arith.constant 2.000000e-01 : f32
    %30 = vector.broadcast %cst_14 : f32 to vector<64x128xf32>
    %31 = arith.mulf %30, %27 : vector<64x128xf32>
    %32 = arith.select %29, %27, %31 : vector<64x128xi1>, vector<64x128xf32>
    %c0_15 = arith.constant 0 : index
    %c0_16 = arith.constant 0 : index
    %33 = vector.load %arg4[%c0_15, %c0_16] : memref<64x128xf32, #tpu.memory_space<vmem>>, vector<64x128xf32>
    tpu.vector_store %arg4[%c0_15, %c0_16], %32 {strides = array<i32>} : memref<64x128xf32, #tpu.memory_space<vmem>>, vector<64x128xf32>,
    return
  }
}

module attributes {stable_mosaic.version = 11 : i64} {
  func.func @_conv_fused_kernel(%arg0: memref<1024x128xbf16, #tpu.memory_space<vmem>>, %arg1: memref<64x1024xbf16, #tpu.memory_space<vmem>>, %arg2: memref<64x1xf32, #tpu.memory_space<vmem>>, %arg3: memref<64x1xf32, #tpu.memory_space<vmem>>, %arg4: memref<64x128xf32, #tpu.memory_space<vmem>>) attributes {dimension_semantics = [], scalar_prefetch = 0 : i64, scratch_operands = 0 : i64, tpu.core_type = #tpu.core_type<tc>} {
    %c0 = arith.constant 0 : index
    %c0_0 = arith.constant 0 : index
    %0 = vector.load %arg1[%c0, %c0_0] : memref<64x1024xbf16, #tpu.memory_space<vmem>>, vector<64x1024xbf16>
    %c0_1 = arith.constant 0 : index
    %c0_2 = arith.constant 0 : index
    %1 = vector.load %arg0[%c0_1, %c0_2] : memref<1024x128xbf16, #tpu.memory_space<vmem>>, vector<1024x128xbf16>
    %cst = arith.constant dense<0.000000e+00> : vector<64x128xf32>
    %2 = tpu.matmul %0, %1, %cst {dimension_numbers = #tpu.dot_dimension_numbers<[1], [0], [0], [1], [0, 0, 1, 1], [], []>} : vector<64x1024xbf16>, vector<1024x128xbf16>, vector<64x128xf32> -> vector<64x128xf32>
    %cst_3 = arith.constant dense<0.000000e+00> : vector<64xf32>
    %3 = vector.multi_reduction <add>, %2, %cst_3 [1] : vector<64x128xf32> to vector<64xf32>
    %4 = vector.shape_cast %3 : vector<64xf32> to vector<64x1xf32>
    %cst_4 = arith.constant 3.125000e-02 : f32
    %5 = vector.broadcast %cst_4 : f32 to vector<64x1xf32>
    %6 = arith.mulf %4, %5 : vector<64x1xf32>
    %7 = arith.mulf %2, %2 : vector<64x128xf32>
    %cst_5 = arith.constant dense<0.000000e+00> : vector<64xf32>
    %8 = vector.multi_reduction <add>, %7, %cst_5 [1] : vector<64x128xf32> to vector<64xf32>
    %9 = vector.shape_cast %8 : vector<64xf32> to vector<64x1xf32>
    %cst_6 = arith.constant 3.125000e-02 : f32
    %10 = vector.broadcast %cst_6 : f32 to vector<64x1xf32>
    %11 = arith.mulf %9, %10 : vector<64x1xf32>
    %12 = arith.mulf %6, %6 : vector<64x1xf32>
    %13 = arith.subf %11, %12 : vector<64x1xf32>
    %cst_7 = arith.constant 0.000000e+00 : f32
    %14 = vector.broadcast %cst_7 : f32 to vector<64x1xf32>
    %15 = arith.maximumf %13, %14 : vector<64x1xf32>
    %c0_8 = arith.constant 0 : index
    %c0_9 = arith.constant 0 : index
    %16 = vector.load %arg2[%c0_8, %c0_9] : memref<64x1xf32, #tpu.memory_space<vmem>>, vector<64x1xf32>
    %cst_10 = arith.constant 9.99999974E-6 : f32
    %17 = vector.broadcast %cst_10 : f32 to vector<64x1xf32>
    %18 = arith.addf %15, %17 : vector<64x1xf32>
    %19 = math.rsqrt %18 : vector<64x1xf32>
    %20 = arith.mulf %16, %19 : vector<64x1xf32>
    %c0_11 = arith.constant 0 : index
    %c0_12 = arith.constant 0 : index
    %21 = vector.load %arg3[%c0_11, %c0_12] : memref<64x1xf32, #tpu.memory_space<vmem>>, vector<64x1xf32>
    %22 = arith.mulf %6, %20 : vector<64x1xf32>
    %23 = arith.subf %21, %22 : vector<64x1xf32>
    %24 = vector.broadcast %20 : vector<64x1xf32> to vector<64x128xf32>
    %25 = arith.mulf %2, %24 : vector<64x128xf32>
    %26 = vector.broadcast %23 : vector<64x1xf32> to vector<64x128xf32>
    %27 = arith.addf %25, %26 : vector<64x128xf32>
    %cst_13 = arith.constant 0.000000e+00 : f32
    %28 = vector.broadcast %cst_13 : f32 to vector<64x128xf32>
    %29 = arith.cmpf oge, %27, %28 : vector<64x128xf32>
    %cst_14 = arith.constant 2.000000e-01 : f32
    %30 = vector.broadcast %cst_14 : f32 to vector<64x128xf32>
    %31 = arith.mulf %30, %27 : vector<64x128xf32>
    %32 = arith.select %29, %27, %31 : vector<64x128xi1>, vector<64x128xf32>
    %c0_15 = arith.constant 0 : index
    %c0_16 = arith.constant 0 : index
    %33 = vector.load %arg4[%c0_15, %c0_16] : memref<64x128xf32, #tpu.memory_space<vmem>>, vector<64x128xf32>
    tpu.vector_store %arg4[%c0_15, %c0_16], %32 {strides = array<i32>} : memref<64x128xf32, #tpu.memory_space<vmem>>, vector<64x128xf32>,
    return
  }
}

module attributes {stable_mosaic.version = 11 : i64} {
  func.func @_conv_fused_kernel(%arg0: memref<640x128xbf16, #tpu.memory_space<vmem>>, %arg1: memref<64x640xbf16, #tpu.memory_space<vmem>>, %arg2: memref<64x1xf32, #tpu.memory_space<vmem>>, %arg3: memref<64x1xf32, #tpu.memory_space<vmem>>, %arg4: memref<64x128xf32, #tpu.memory_space<vmem>>) attributes {dimension_semantics = [], scalar_prefetch = 0 : i64, scratch_operands = 0 : i64, tpu.core_type = #tpu.core_type<tc>} {
    %c0 = arith.constant 0 : index
    %c0_0 = arith.constant 0 : index
    %0 = vector.load %arg1[%c0, %c0_0] : memref<64x640xbf16, #tpu.memory_space<vmem>>, vector<64x640xbf16>
    %c0_1 = arith.constant 0 : index
    %c0_2 = arith.constant 0 : index
    %1 = vector.load %arg0[%c0_1, %c0_2] : memref<640x128xbf16, #tpu.memory_space<vmem>>, vector<640x128xbf16>
    %cst = arith.constant dense<0.000000e+00> : vector<64x128xf32>
    %2 = tpu.matmul %0, %1, %cst {dimension_numbers = #tpu.dot_dimension_numbers<[1], [0], [0], [1], [0, 0, 1, 1], [], []>} : vector<64x640xbf16>, vector<640x128xbf16>, vector<64x128xf32> -> vector<64x128xf32>
    %cst_3 = arith.constant dense<0.000000e+00> : vector<64xf32>
    %3 = vector.multi_reduction <add>, %2, %cst_3 [1] : vector<64x128xf32> to vector<64xf32>
    %4 = vector.shape_cast %3 : vector<64xf32> to vector<64x1xf32>
    %cst_4 = arith.constant 1.250000e-01 : f32
    %5 = vector.broadcast %cst_4 : f32 to vector<64x1xf32>
    %6 = arith.mulf %4, %5 : vector<64x1xf32>
    %7 = arith.mulf %2, %2 : vector<64x128xf32>
    %cst_5 = arith.constant dense<0.000000e+00> : vector<64xf32>
    %8 = vector.multi_reduction <add>, %7, %cst_5 [1] : vector<64x128xf32> to vector<64xf32>
    %9 = vector.shape_cast %8 : vector<64xf32> to vector<64x1xf32>
    %cst_6 = arith.constant 1.250000e-01 : f32
    %10 = vector.broadcast %cst_6 : f32 to vector<64x1xf32>
    %11 = arith.mulf %9, %10 : vector<64x1xf32>
    %12 = arith.mulf %6, %6 : vector<64x1xf32>
    %13 = arith.subf %11, %12 : vector<64x1xf32>
    %cst_7 = arith.constant 0.000000e+00 : f32
    %14 = vector.broadcast %cst_7 : f32 to vector<64x1xf32>
    %15 = arith.maximumf %13, %14 : vector<64x1xf32>
    %c0_8 = arith.constant 0 : index
    %c0_9 = arith.constant 0 : index
    %16 = vector.load %arg2[%c0_8, %c0_9] : memref<64x1xf32, #tpu.memory_space<vmem>>, vector<64x1xf32>
    %cst_10 = arith.constant 9.99999974E-6 : f32
    %17 = vector.broadcast %cst_10 : f32 to vector<64x1xf32>
    %18 = arith.addf %15, %17 : vector<64x1xf32>
    %19 = math.rsqrt %18 : vector<64x1xf32>
    %20 = arith.mulf %16, %19 : vector<64x1xf32>
    %c0_11 = arith.constant 0 : index
    %c0_12 = arith.constant 0 : index
    %21 = vector.load %arg3[%c0_11, %c0_12] : memref<64x1xf32, #tpu.memory_space<vmem>>, vector<64x1xf32>
    %22 = arith.mulf %6, %20 : vector<64x1xf32>
    %23 = arith.subf %21, %22 : vector<64x1xf32>
    %24 = vector.broadcast %20 : vector<64x1xf32> to vector<64x128xf32>
    %25 = arith.mulf %2, %24 : vector<64x128xf32>
    %26 = vector.broadcast %23 : vector<64x1xf32> to vector<64x128xf32>
    %27 = arith.addf %25, %26 : vector<64x128xf32>
    %cst_13 = arith.constant 0.000000e+00 : f32
    %28 = vector.broadcast %cst_13 : f32 to vector<64x128xf32>
    %29 = arith.cmpf oge, %27, %28 : vector<64x128xf32>
    %cst_14 = arith.constant 2.000000e-01 : f32
    %30 = vector.broadcast %cst_14 : f32 to vector<64x128xf32>
    %31 = arith.mulf %30, %27 : vector<64x128xf32>
    %32 = arith.select %29, %27, %31 : vector<64x128xi1>, vector<64x128xf32>
    %c0_15 = arith.constant 0 : index
    %c0_16 = arith.constant 0 : index
    %33 = vector.load %arg4[%c0_15, %c0_16] : memref<64x128xf32, #tpu.memory_space<vmem>>, vector<64x128xf32>
    tpu.vector_store %arg4[%c0_15, %c0_16], %32 {strides = array<i32>} : memref<64x128xf32, #tpu.memory_space<vmem>>, vector<64x128xf32>,
    return
  }
}

</mosaic_0001>

<bundles_post_ra>
// kernel: critic_forward.7
= control target key start
LH: loop header
LB: loop body
LE: loop exit
PB: predicated region body
PF: predicated region fallthrough
CT: control target
= control target key end

     0   :  { %s1085_s9 = smov 0   ;;  %s1087_s10 = smov 0   ;;  %s1344_s0 = inlined_call_operand.vmem [shape: bf16[256,8192], index: 0, kind: input, shape index: {}]   ;;  %s1345_s1 = inlined_call_operand.vmem [shape: bf16[8,256], index: 1, kind: input, shape index: {}]   ;;  %s1346_s2 = inlined_call_operand.vmem [shape: f32[8,8192], index: 2, kind: output, shape index: {}]  }
   0x1   :  { %s1089_s11 = smov 0  }
   0x2 LB: > { %s844_s12 = sadd.s32 4294967295, %s1068_s11   ;;  %s1102_s13 = sadd.s32 1, %s1068_s11   ;;  %s1068_s11 = sphi %s1089_s11, %s1349_s11   ;;  %s1064_s10 = sphi %s1087_s10, %s1348_s10   ;;  %s1060_s9 = sphi %s1085_s9, %s1347_s9  }
   0x3   : > { %s16_s14 = ssub.s32 %s1068_s11, %s1102_s13  ;;  %s19_s15 = sadd.s32 1, %s1064_s10 }
   0x4   : > { %p17_p0 = scmp.eq.s32.totalorder %s16_s14, 0  ;;  %p26_p1 = scmp.ne.s32.totalorder %s1064_s10, %s1060_s9 }
   0x5   : > { %p27_p2 = scmp.eq.s32.totalorder %s1068_s11, 0  ;;  %p847_p4 = scmp.ge.s32.totalorder %s1068_s11, 16 }
   0x6   : > { %s1111_s16 = scalar_select %p17_p0, %s1064_s10, %s19_s15  }
   0x7   : > { %p28_p3 = por %p27_p2, %p26_p1  ;;  %102 = sbr.rel (%p847_p4) target bundleno = 50 (0x32), region = 20 }
   0xe   : > { %105 = sbr.rel (!%p28_p3) target bundleno = 50 (0x32), region = 24  ;;  %s107_s17 = sand.u32 (%p28_p3), 1, %s1064_s10  }
   0xf   : > { %s923_s18 = sshll.u32 (%p28_p3), %s1068_s11, 4  ;;  %s848_s19 = sshll.u32 (%p28_p3), %s107_s17, 9 }
  0x10   : > { %s1119_s22 = scalar_lea.vmem (%p28_p3), %s1344_s0, %s923_s18  ;;  %s1124_s23 = scalar_lea.vmem (%p28_p3), [#allocation2], %s848_s19 }
  0x11   : > { %v125_v0 = vld [vmem:[%s1119_s22] sm:$0xff] (%p28_p3)  ;;  %v127_v1 = vld [vmem:[%s1119_s22 + $0x8] sm:$0xff] (%p28_p3) }
  0x12   : > { %v129_v2 = vld [vmem:[%s1119_s22 + $0x100] sm:$0xff] (%p28_p3)  ;;  %126 = vst [vmem:[%s1124_s23] sm:$0xff] (%p28_p3), %v125_v0  ;;  %128 = vst [vmem:[%s1124_s23 + $0x8] sm:$0xff] (%p28_p3), %v127_v1  ;;  %v131_v3 = vld [vmem:[%s1119_s22 + $0x108] sm:$0xff] (%p28_p3) }
  0x13   : > { %130 = vst [vmem:[%s1124_s23 + $0x10] sm:$0xff] (%p28_p3), %v129_v2  ;;  %v133_v4 = vld [vmem:[%s1119_s22 + $0x200] sm:$0xff] (%p28_p3)  ;;  %v135_v5 = vld [vmem:[%s1119_s22 + $0x208] sm:$0xff] (%p28_p3)  ;;  %132 = vst [vmem:[%s1124_s23 + $0x18] sm:$0xff] (%p28_p3), %v131_v3 }
  0x14   : > { %134 = vst [vmem:[%s1124_s23 + $0x20] sm:$0xff] (%p28_p3), %v133_v4  ;;  %136 = vst [vmem:[%s1124_s23 + $0x28] sm:$0xff] (%p28_p3), %v135_v5  ;;  %v137_v6 = vld [vmem:[%s1119_s22 + $0x300] sm:$0xff] (%p28_p3)  ;;  %v139_v7 = vld [vmem:[%s1119_s22 + $0x308] sm:$0xff] (%p28_p3) }
  0x15   : > { %v141_v8 = vld [vmem:[%s1119_s22 + $0x400] sm:$0xff]  ;;  %138 = vst [vmem:[%s1124_s23 + $0x30] sm:$0xff] %v137_v6  ;;  %140 = vst [vmem:[%s1124_s23 + $0x38] sm:$0xff] %v139_v7  ;;  %v143_v9 = vld [vmem:[%s1119_s22 + $0x408] sm:$0xff] }
  0x16   : > { %142 = vst [vmem:[%s1124_s23 + $0x40] sm:$0xff] %v141_v8  ;;  %v145_v10 = vld [vmem:[%s1119_s22 + $0x500] sm:$0xff]  ;;  %v147_v11 = vld [vmem:[%s1119_s22 + $0x508] sm:$0xff]  ;;  %144 = vst [vmem:[%s1124_s23 + $0x48] sm:$0xff] %v143_v9 }
  0x17   : > { %146 = vst [vmem:[%s1124_s23 + $0x50] sm:$0xff] %v145_v10  ;;  %148 = vst [vmem:[%s1124_s23 + $0x58] sm:$0xff] %v147_v11  ;;  %v149_v12 = vld [vmem:[%s1119_s22 + $0x600] sm:$0xff]  ;;  %v151_v13 = vld [vmem:[%s1119_s22 + $0x608] sm:$0xff] }
  0x18   : > { %v153_v14 = vld [vmem:[%s1119_s22 + $0x700] sm:$0xff]  ;;  %150 = vst [vmem:[%s1124_s23 + $0x60] sm:$0xff] %v149_v12  ;;  %152 = vst [vmem:[%s1124_s23 + $0x68] sm:$0xff] %v151_v13  ;;  %v155_v15 = vld [vmem:[%s1119_s22 + $0x708] sm:$0xff] }
  0x19   : > { %154 = vst [vmem:[%s1124_s23 + $0x70] sm:$0xff] %v153_v14  ;;  %v157_v16 = vld [vmem:[%s1119_s22 + $0x800] sm:$0xff]  ;;  %v159_v17 = vld [vmem:[%s1119_s22 + $0x808] sm:$0xff]  ;;  %156 = vst [vmem:[%s1124_s23 + $0x78] sm:$0xff] %v155_v15 }
  0x1a   : > { %158 = vst [vmem:[%s1124_s23 + $0x80] sm:$0xff] %v157_v16  ;;  %160 = vst [vmem:[%s1124_s23 + $0x88] sm:$0xff] %v159_v17  ;;  %v161_v18 = vld [vmem:[%s1119_s22 + $0x900] sm:$0xff]  ;;  %v163_v19 = vld [vmem:[%s1119_s22 + $0x908] sm:$0xff] }
  0x1b   : > { %v165_v20 = vld [vmem:[%s1119_s22 + $0xa00] sm:$0xff]  ;;  %162 = vst [vmem:[%s1124_s23 + $0x90] sm:$0xff] %v161_v18  ;;  %164 = vst [vmem:[%s1124_s23 + $0x98] sm:$0xff] %v163_v19  ;;  %v167_v21 = vld [vmem:[%s1119_s22 + $0xa08] sm:$0xff] }
  0x1c   : > { %166 = vst [vmem:[%s1124_s23 + $0xa0] sm:$0xff] %v165_v20  ;;  %v169_v22 = vld [vmem:[%s1119_s22 + $0xb00] sm:$0xff]  ;;  %v171_v23 = vld [vmem:[%s1119_s22 + $0xb08] sm:$0xff]  ;;  %168 = vst [vmem:[%s1124_s23 + $0xa8] sm:$0xff] %v167_v21 }
  0x1d   : > { %170 = vst [vmem:[%s1124_s23 + $0xb0] sm:$0xff] %v169_v22  ;;  %172 = vst [vmem:[%s1124_s23 + $0xb8] sm:$0xff] %v171_v23  ;;  %v173_v24 = vld [vmem:[%s1119_s22 + $0xc00] sm:$0xff]  ;;  %v175_v25 = vld [vmem:[%s1119_s22 + $0xc08] sm:$0xff] }
  0x1e   : > { %v177_v26 = vld [vmem:[%s1119_s22 + $0xd00] sm:$0xff]  ;;  %174 = vst [vmem:[%s1124_s23 + $0xc0] sm:$0xff] %v173_v24  ;;  %176 = vst [vmem:[%s1124_s23 + $0xc8] sm:$0xff] %v175_v25  ;;  %v179_v27 = vld [vmem:[%s1119_s22 + $0xd08] sm:$0xff] }
  0x1f   : > { %178 = vst [vmem:[%s1124_s23 + $0xd0] sm:$0xff] %v177_v26  ;;  %v181_v28 = vld [vmem:[%s1119_s22 + $0xe00] sm:$0xff]  ;;  %v183_v29 = vld [vmem:[%s1119_s22 + $0xe08] sm:$0xff]  ;;  %180 = vst [vmem:[%s1124_s23 + $0xd8] sm:$0xff] %v179_v27 }
  0x20   : > { %182 = vst [vmem:[%s1124_s23 + $0xe0] sm:$0xff] %v181_v28  ;;  %184 = vst [vmem:[%s1124_s23 + $0xe8] sm:$0xff] %v183_v29  ;;  %v185_v30 = vld [vmem:[%s1119_s22 + $0xf00] sm:$0xff]  ;;  %v187_v31 = vld [vmem:[%s1119_s22 + $0xf08] sm:$0xff] }
  0x21   : > { %v189_v32 = vld [vmem:[%s1119_s22 + $0x1000] sm:$0xff]  ;;  %186 = vst [vmem:[%s1124_s23 + $0xf0] sm:$0xff] %v185_v30  ;;  %188 = vst [vmem:[%s1124_s23 + $0xf8] sm:$0xff] %v187_v31  ;;  %v191_v33 = vld [vmem:[%s1119_s22 + $0x1008] sm:$0xff] }
  0x22   : > { %190 = vst [vmem:[%s1124_s23 + $0x100] sm:$0xff] %v189_v32  ;;  %v193_v34 = vld [vmem:[%s1119_s22 + $0x1100] sm:$0xff]  ;;  %v195_v35 = vld [vmem:[%s1119_s22 + $0x1108] sm:$0xff]  ;;  %192 = vst [vmem:[%s1124_s23 + $0x108] sm:$0xff] %v191_v33 }
  0x23   : > { %194 = vst [vmem:[%s1124_s23 + $0x110] sm:$0xff] %v193_v34  ;;  %196 = vst [vmem:[%s1124_s23 + $0x118] sm:$0xff] %v195_v35  ;;  %v197_v36 = vld [vmem:[%s1119_s22 + $0x1200] sm:$0xff]  ;;  %v199_v37 = vld [vmem:[%s1119_s22 + $0x1208] sm:$0xff] }
  0x24   : > { %v201_v38 = vld [vmem:[%s1119_s22 + $0x1300] sm:$0xff]  ;;  %198 = vst [vmem:[%s1124_s23 + $0x120] sm:$0xff] %v197_v36  ;;  %200 = vst [vmem:[%s1124_s23 + $0x128] sm:$0xff] %v199_v37  ;;  %v203_v39 = vld [vmem:[%s1119_s22 + $0x1308] sm:$0xff] }
  0x25   : > { %202 = vst [vmem:[%s1124_s23 + $0x130] sm:$0xff] %v201_v38  ;;  %v205_v40 = vld [vmem:[%s1119_s22 + $0x1400] sm:$0xff]  ;;  %v207_v41 = vld [vmem:[%s1119_s22 + $0x1408] sm:$0xff]  ;;  %204 = vst [vmem:[%s1124_s23 + $0x138] sm:$0xff] %v203_v39 }
  0x26   : > { %206 = vst [vmem:[%s1124_s23 + $0x140] sm:$0xff] %v205_v40  ;;  %208 = vst [vmem:[%s1124_s23 + $0x148] sm:$0xff] %v207_v41  ;;  %v209_v42 = vld [vmem:[%s1119_s22 + $0x1500] sm:$0xff]  ;;  %v211_v43 = vld [vmem:[%s1119_s22 + $0x1508] sm:$0xff] }
  0x27   : > { %v213_v44 = vld [vmem:[%s1119_s22 + $0x1600] sm:$0xff]  ;;  %210 = vst [vmem:[%s1124_s23 + $0x150] sm:$0xff] %v209_v42  ;;  %212 = vst [vmem:[%s1124_s23 + $0x158] sm:$0xff] %v211_v43  ;;  %v215_v45 = vld [vmem:[%s1119_s22 + $0x1608] sm:$0xff] }
  0x28   : > { %214 = vst [vmem:[%s1124_s23 + $0x160] sm:$0xff] %v213_v44  ;;  %v217_v46 = vld [vmem:[%s1119_s22 + $0x1700] sm:$0xff]  ;;  %v219_v47 = vld [vmem:[%s1119_s22 + $0x1708] sm:$0xff]  ;;  %216 = vst [vmem:[%s1124_s23 + $0x168] sm:$0xff] %v215_v45 }
  0x29   : > { %218 = vst [vmem:[%s1124_s23 + $0x170] sm:$0xff] %v217_v46  ;;  %220 = vst [vmem:[%s1124_s23 + $0x178] sm:$0xff] %v219_v47  ;;  %v221_v48 = vld [vmem:[%s1119_s22 + $0x1800] sm:$0xff]  ;;  %v223_v49 = vld [vmem:[%s1119_s22 + $0x1808] sm:$0xff] }
  0x2a   : > { %v225_v50 = vld [vmem:[%s1119_s22 + $0x1900] sm:$0xff]  ;;  %222 = vst [vmem:[%s1124_s23 + $0x180] sm:$0xff] %v221_v48  ;;  %224 = vst [vmem:[%s1124_s23 + $0x188] sm:$0xff] %v223_v49  ;;  %v227_v51 = vld [vmem:[%s1119_s22 + $0x1908] sm:$0xff] }
  0x2b   : > { %226 = vst [vmem:[%s1124_s23 + $0x190] sm:$0xff] %v225_v50  ;;  %v229_v52 = vld [vmem:[%s1119_s22 + $0x1a00] sm:$0xff]  ;;  %v231_v53 = vld [vmem:[%s1119_s22 + $0x1a08] sm:$0xff]  ;;  %228 = vst [vmem:[%s1124_s23 + $0x198] sm:$0xff] %v227_v51 }
  0x2c   : > { %230 = vst [vmem:[%s1124_s23 + $0x1a0] sm:$0xff] %v229_v52  ;;  %232 = vst [vmem:[%s1124_s23 + $0x1a8] sm:$0xff] %v231_v53  ;;  %v233_v54 = vld [vmem:[%s1119_s22 + $0x1b00] sm:$0xff]  ;;  %v235_v55 = vld [vmem:[%s1119_s22 + $0x1b08] sm:$0xff] }
  0x2d   : > { %v237_v56 = vld [vmem:[%s1119_s22 + $0x1c00] sm:$0xff]  ;;  %234 = vst [vmem:[%s1124_s23 + $0x1b0] sm:$0xff] %v233_v54  ;;  %236 = vst [vmem:[%s1124_s23 + $0x1b8] sm:$0xff] %v235_v55  ;;  %v239_v57 = vld [vmem:[%s1119_s22 + $0x1c08] sm:$0xff] }
  0x2e   : > { %238 = vst [vmem:[%s1124_s23 + $0x1c0] sm:$0xff] %v237_v56  ;;  %v241_v58 = vld [vmem:[%s1119_s22 + $0x1d00] sm:$0xff]  ;;  %v243_v59 = vld [vmem:[%s1119_s22 + $0x1d08] sm:$0xff]  ;;  %240 = vst [vmem:[%s1124_s23 + $0x1c8] sm:$0xff] %v239_v57 }
  0x2f   : > { %242 = vst [vmem:[%s1124_s23 + $0x1d0] sm:$0xff] %v241_v58  ;;  %244 = vst [vmem:[%s1124_s23 + $0x1d8] sm:$0xff] %v243_v59  ;;  %v245_v60 = vld [vmem:[%s1119_s22 + $0x1e00] sm:$0xff]  ;;  %v247_v61 = vld [vmem:[%s1119_s22 + $0x1e08] sm:$0xff] }
  0x30   : > { %v249_v62 = vld [vmem:[%s1119_s22 + $0x1f00] sm:$0xff]  ;;  %246 = vst [vmem:[%s1124_s23 + $0x1e0] sm:$0xff] %v245_v60  ;;  %248 = vst [vmem:[%s1124_s23 + $0x1e8] sm:$0xff] %v247_v61  ;;  %v251_v63 = vld [vmem:[%s1119_s22 + $0x1f08] sm:$0xff] }
  0x31   : > { %250 = vst [vmem:[%s1124_s23 + $0x1f0] sm:$0xff] %v249_v62  ;;  %252 = vst [vmem:[%s1124_s23 + $0x1f8] sm:$0xff] %v251_v63 }
  0x32 PF: > { %p851_p5 = scmp.ge.s32.totalorder %s1068_s11, 1  ;;  %p257_p6 = scmp.lt.s32.totalorder %s1068_s11, 17 }
  0x34   : > { %p258_p7 = pnand %p851_p5, %p257_p6 }
  0x35   : > { %s264_s24 = sand.u32 (!%p258_p7), 1, %s1060_s9   ;;  %v1257_v0 = vld [vmem:[%s1345_s1] sm:$0xff] (!%p258_p7)  ;;  %s853_s29 = sshll.u32 (!%p258_p7), %s844_s12, 2 }
  0x36   : > { %261 = sbr.rel (%p258_p7) target bundleno = 340 (0x154), region = 47  ;;  %s852_s27 = sshll.u32 (!%p258_p7), %s264_s24, 9  ;;  %v856_v1 = vcombine.high (!%p258_p7), %v1257_v0, %v1257_v0 }
  0x37   : > { %s1261_s28 = scalar_lea.vmem (!%p258_p7), [#allocation2], %s852_s27  ;;  %p287_p8 = scmp.lt.s32.totalorder (!%p258_p7), %s853_s29, 63 }
  0x38   : > { %v948_v2 = vld [vmem:[%s1261_s28 + $0x4] ss:$16 sps:$4 sm:$0xff] (!%p258_p7)   ;;  %716 = vmatprep.mubr.bf16.mxu0 (!%p258_p7), %v856_v1  ;;  %757 = vmatprep.mubr.bf16.mxu1 (!%p258_p7), %v856_v1  ;;  %v950_v3 = vld [vmem:[%s1261_s28 + $0xc] ss:$16 sps:$4 sm:$0xff] (!%p258_p7)   ;;  %v952_v4 = vld [vmem:[%s1261_s28] ss:$16 sps:$4 sm:$0xff] (!%p258_p7)  }
  0x39   : > { %684 = vmatprep.subr.bf16.mxu0 (!%p258_p7), %v948_v2  ;;  %v953_v5 = vld [vmem:[%s1261_s28 + $0x8] ss:$16 sps:$4 sm:$0xff] (!%p258_p7)   ;;  %725 = vmatprep.subr.bf16.mxu1 (!%p258_p7), %v950_v3  ;;  %v954_v6 = vld [vmem:[%s1261_s28 + $0x24] ss:$16 sps:$4 sm:$0xff] (!%p258_p7)   ;;  %v956_v7 = vld [vmem:[%s1261_s28 + $0x2c] ss:$16 sps:$4 sm:$0xff] (!%p258_p7)   ;;  %v855_v3 = vcombine.low (!%p258_p7), %v1257_v0, %v1257_v0 }
  0x3a   : > { %685 = vmatpush1.bf16.msra.mxu0 (!%p258_p7), %v952_v4  ;;  %726 = vmatpush1.bf16.msra.mxu1 (!%p258_p7), %v953_v5  ;;  %v958_v8 = vld [vmem:[%s1261_s28 + $0x20] ss:$16 sps:$4 sm:$0xff] (!%p258_p7)   ;;  %v959_v9 = vld [vmem:[%s1261_s28 + $0x28] ss:$16 sps:$4 sm:$0xff] (!%p258_p7)   ;;  %v960_v10 = vld [vmem:[%s1261_s28 + $0x44] ss:$16 sps:$4 sm:$0xff] (!%p258_p7)  }
  0x3b   : > { %686 = vmatprep.subr.bf16.mxu0 (!%p258_p7), %v954_v6  ;;  %727 = vmatprep.subr.bf16.mxu1 (!%p258_p7), %v956_v7  ;;  %v962_v11 = vld [vmem:[%s1261_s28 + $0x4c] ss:$16 sps:$4 sm:$0xff] (!%p258_p7)   ;;  %v964_v12 = vld [vmem:[%s1261_s28 + $0x40] ss:$16 sps:$4 sm:$0xff] (!%p258_p7)   ;;  %v965_v13 = vld [vmem:[%s1261_s28 + $0x48] ss:$16 sps:$4 sm:$0xff] (!%p258_p7)  }
  0x3c   : > { %v966_v14 = vld [vmem:[%s1261_s28 + $0x64] ss:$16 sps:$4 sm:$0xff] (!%p258_p7)   ;;  %v968_v15 = vld [vmem:[%s1261_s28 + $0x6c] ss:$16 sps:$4 sm:$0xff] (!%p258_p7)   ;;  %v970_v16 = vld [vmem:[%s1261_s28 + $0x60] ss:$16 sps:$4 sm:$0xff] (!%p258_p7)  }
  0x3d   : > { %v971_v17 = vld [vmem:[%s1261_s28 + $0x68] ss:$16 sps:$4 sm:$0xff]   ;;  %v972_v18 = vld [vmem:[%s1261_s28 + $0x84] ss:$16 sps:$4 sm:$0xff]   ;;  %v974_v19 = vld [vmem:[%s1261_s28 + $0x8c] ss:$16 sps:$4 sm:$0xff]  }
  0x3e   : > { %687 = vmatpush1.bf16.msra.mxu0 %v958_v8  ;;  %728 = vmatpush1.bf16.msra.mxu1 %v959_v9  ;;  %v976_v20 = vld [vmem:[%s1261_s28 + $0x80] ss:$16 sps:$4 sm:$0xff]   ;;  %v977_v21 = vld [vmem:[%s1261_s28 + $0x88] ss:$16 sps:$4 sm:$0xff]   ;;  %v978_v22 = vld [vmem:[%s1261_s28 + $0xa4] ss:$16 sps:$4 sm:$0xff]  }
  0x3f   : > { %688 = vmatprep.subr.bf16.mxu0 %v960_v10  ;;  %729 = vmatprep.subr.bf16.mxu1 %v962_v11  ;;  %v980_v23 = vld [vmem:[%s1261_s28 + $0xac] ss:$16 sps:$4 sm:$0xff]   ;;  %v982_v24 = vld [vmem:[%s1261_s28 + $0xa0] ss:$16 sps:$4 sm:$0xff]   ;;  %v983_v25 = vld [vmem:[%s1261_s28 + $0xa8] ss:$16 sps:$4 sm:$0xff]  }
  0x40   : > { %v984_v26 = vld [vmem:[%s1261_s28 + $0xc4] ss:$16 sps:$4 sm:$0xff]   ;;  %v986_v27 = vld [vmem:[%s1261_s28 + $0xcc] ss:$16 sps:$4 sm:$0xff]   ;;  %v988_v28 = vld [vmem:[%s1261_s28 + $0xc0] ss:$16 sps:$4 sm:$0xff]  }
  0x41   : > { %v989_v29 = vld [vmem:[%s1261_s28 + $0xc8] ss:$16 sps:$4 sm:$0xff]   ;;  %v990_v30 = vld [vmem:[%s1261_s28 + $0xe4] ss:$16 sps:$4 sm:$0xff]   ;;  %v992_v31 = vld [vmem:[%s1261_s28 + $0xec] ss:$16 sps:$4 sm:$0xff]  }
  0x42   : > { %689 = vmatpush1.bf16.msra.mxu0 %v964_v12  ;;  %730 = vmatpush1.bf16.msra.mxu1 %v965_v13  ;;  %v994_v32 = vld [vmem:[%s1261_s28 + $0xe0] ss:$16 sps:$4 sm:$0xff]   ;;  %v995_v33 = vld [vmem:[%s1261_s28 + $0xe8] ss:$16 sps:$4 sm:$0xff]   ;;  %v996_v34 = vld [vmem:[%s1261_s28 + $0x104] ss:$16 sps:$4 sm:$0xff]  }
  0x43   : > { %690 = vmatprep.subr.bf16.mxu0 %v966_v14  ;;  %731 = vmatprep.subr.bf16.mxu1 %v968_v15  ;;  %v998_v35 = vld [vmem:[%s1261_s28 + $0x10c] ss:$16 sps:$4 sm:$0xff]   ;;  %v1000_v36 = vld [vmem:[%s1261_s28 + $0x100] ss:$16 sps:$4 sm:$0xff]   ;;  %v1001_v37 = vld [vmem:[%s1261_s28 + $0x108] ss:$16 sps:$4 sm:$0xff]  }
  0x44   : > { %v1002_v38 = vld [vmem:[%s1261_s28 + $0x124] ss:$16 sps:$4 sm:$0xff]   ;;  %v1004_v39 = vld [vmem:[%s1261_s28 + $0x12c] ss:$16 sps:$4 sm:$0xff]   ;;  %v1006_v40 = vld [vmem:[%s1261_s28 + $0x120] ss:$16 sps:$4 sm:$0xff]  }
  0x45   : > { %v1007_v41 = vld [vmem:[%s1261_s28 + $0x128] ss:$16 sps:$4 sm:$0xff]   ;;  %v1008_v42 = vld [vmem:[%s1261_s28 + $0x144] ss:$16 sps:$4 sm:$0xff]   ;;  %v1010_v43 = vld [vmem:[%s1261_s28 + $0x14c] ss:$16 sps:$4 sm:$0xff]  }
  0x46   : > { %691 = vmatpush1.bf16.msra.mxu0 %v970_v16  ;;  %732 = vmatpush1.bf16.msra.mxu1 %v971_v17  ;;  %v1012_v44 = vld [vmem:[%s1261_s28 + $0x140] ss:$16 sps:$4 sm:$0xff]   ;;  %v1013_v45 = vld [vmem:[%s1261_s28 + $0x148] ss:$16 sps:$4 sm:$0xff]   ;;  %v1014_v46 = vld [vmem:[%s1261_s28 + $0x164] ss:$16 sps:$4 sm:$0xff]  }
  0x47   : > { %692 = vmatprep.subr.bf16.mxu0 %v972_v18  ;;  %733 = vmatprep.subr.bf16.mxu1 %v974_v19  ;;  %v1016_v47 = vld [vmem:[%s1261_s28 + $0x16c] ss:$16 sps:$4 sm:$0xff]   ;;  %v1018_v48 = vld [vmem:[%s1261_s28 + $0x160] ss:$16 sps:$4 sm:$0xff]   ;;  %v1019_v49 = vld [vmem:[%s1261_s28 + $0x168] ss:$16 sps:$4 sm:$0xff]  }
  0x48   : > { %v1020_v50 = vld [vmem:[%s1261_s28 + $0x184] ss:$16 sps:$4 sm:$0xff]   ;;  %v1022_v51 = vld [vmem:[%s1261_s28 + $0x18c] ss:$16 sps:$4 sm:$0xff]   ;;  %v1024_v52 = vld [vmem:[%s1261_s28 + $0x180] ss:$16 sps:$4 sm:$0xff]  }
  0x49   : > { %v1025_v53 = vld [vmem:[%s1261_s28 + $0x188] ss:$16 sps:$4 sm:$0xff]   ;;  %v1026_v54 = vld [vmem:[%s1261_s28 + $0x1a4] ss:$16 sps:$4 sm:$0xff]   ;;  %v1028_v55 = vld [vmem:[%s1261_s28 + $0x1ac] ss:$16 sps:$4 sm:$0xff]  }
  0x4a   : > { %693 = vmatpush1.bf16.msra.mxu0 %v976_v20  ;;  %734 = vmatpush1.bf16.msra.mxu1 %v977_v21  ;;  %v1030_v56 = vld [vmem:[%s1261_s28 + $0x1a0] ss:$16 sps:$4 sm:$0xff]   ;;  %v1031_v57 = vld [vmem:[%s1261_s28 + $0x1a8] ss:$16 sps:$4 sm:$0xff]   ;;  %v1032_v58 = vld [vmem:[%s1261_s28 + $0x1c4] ss:$16 sps:$4 sm:$0xff]  }
  0x4b   : > { %694 = vmatprep.subr.bf16.mxu0 %v978_v22  ;;  %735 = vmatprep.subr.bf16.mxu1 %v980_v23  ;;  %v1034_v59 = vld [vmem:[%s1261_s28 + $0x1cc] ss:$16 sps:$4 sm:$0xff]   ;;  %v1036_v60 = vld [vmem:[%s1261_s28 + $0x1c0] ss:$16 sps:$4 sm:$0xff]   ;;  %v1037_v61 = vld [vmem:[%s1261_s28 + $0x1c8] ss:$16 sps:$4 sm:$0xff]  }
  0x4c   : > { %v1038_v62 = vld [vmem:[%s1261_s28 + $0x1e4] ss:$16 sps:$4 sm:$0xff]   ;;  %v1040_v63 = vld [vmem:[%s1261_s28 + $0x1ec] ss:$16 sps:$4 sm:$0xff]   ;;  %v1042_v1 = vld [vmem:[%s1261_s28 + $0x1e0] ss:$16 sps:$4 sm:$0xff]  }
  0x4d   : > { %v1043_v2 = vld [vmem:[%s1261_s28 + $0x1e8] ss:$16 sps:$4 sm:$0xff]   ;;  %s1351_s29 = smov (!%p287_p8, %s853_s29), 63 }
  0x4e   : > { %695 = vmatpush1.bf16.msra.mxu0 %v982_v24  ;;  %736 = vmatpush1.bf16.msra.mxu1 %v983_v25  ;;  %s854_s30 = sshll.u32 %s1351_s29, 3 }
  0x4f   : > { %696 = vmatprep.subr.bf16.mxu0 %v984_v26  ;;  %737 = vmatprep.subr.bf16.mxu1 %v986_v27  ;;  %s290_s5 = scalar_lea.vmem %s1346_s2, %s854_s30 }
  0x52   : > { %697 = vmatpush1.bf16.msra.mxu0 %v988_v28  ;;  %738 = vmatpush1.bf16.msra.mxu1 %v989_v29 }
  0x53   : > { %698 = vmatprep.subr.bf16.mxu0 %v990_v30  ;;  %739 = vmatprep.subr.bf16.mxu1 %v992_v31 }
  0x56   : > { %699 = vmatpush1.bf16.msra.mxu0 %v994_v32  ;;  %740 = vmatpush1.bf16.msra.mxu1 %v995_v33 }
  0x57   : > { %700 = vmatprep.subr.bf16.mxu0 %v996_v34  ;;  %741 = vmatprep.subr.bf16.mxu1 %v998_v35 }
  0x5a   : > { %701 = vmatpush1.bf16.msra.mxu0 %v1000_v36  ;;  %742 = vmatpush1.bf16.msra.mxu1 %v1001_v37 }
  0x5b   : > { %702 = vmatprep.subr.bf16.mxu0 %v1002_v38  ;;  %743 = vmatprep.subr.bf16.mxu1 %v1004_v39 }
  0x5e   : > { %703 = vmatpush1.bf16.msra.mxu0 %v1006_v40  ;;  %744 = vmatpush1.bf16.msra.mxu1 %v1007_v41 }
  0x5f   : > { %704 = vmatprep.subr.bf16.mxu0 %v1008_v42  ;;  %745 = vmatprep.subr.bf16.mxu1 %v1010_v43 }
  0x62   : > { %705 = vmatpush1.bf16.msra.mxu0 %v1012_v44  ;;  %746 = vmatpush1.bf16.msra.mxu1 %v1013_v45 }
  0x63   : > { %706 = vmatprep.subr.bf16.mxu0 %v1014_v46  ;;  %747 = vmatprep.subr.bf16.mxu1 %v1016_v47 }
  0x66   : > { %707 = vmatpush1.bf16.msra.mxu0 %v1018_v48  ;;  %748 = vmatpush1.bf16.msra.mxu1 %v1019_v49 }
  0x67   : > { %708 = vmatprep.subr.bf16.mxu0 %v1020_v50  ;;  %749 = vmatprep.subr.bf16.mxu1 %v1022_v51 }
  0x6a   : > { %709 = vmatpush1.bf16.msra.mxu0 %v1024_v52  ;;  %750 = vmatpush1.bf16.msra.mxu1 %v1025_v53 }
  0x6b   : > { %710 = vmatprep.subr.bf16.mxu0 %v1026_v54  ;;  %751 = vmatprep.subr.bf16.mxu1 %v1028_v55 }
  0x6e   : > { %711 = vmatpush1.bf16.msra.mxu0 %v1030_v56  ;;  %752 = vmatpush1.bf16.msra.mxu1 %v1031_v57 }
  0x6f   : > { %712 = vmatprep.subr.bf16.mxu0 %v1032_v58  ;;  %753 = vmatprep.subr.bf16.mxu1 %v1034_v59 }
  0x72   : > { %713 = vmatpush1.bf16.msra.mxu0 %v1036_v60  ;;  %754 = vmatpush1.bf16.msra.mxu1 %v1037_v61 }
  0x73   : > { %714 = vmatprep.subr.bf16.mxu0 %v1038_v62  ;;  %755 = vmatprep.subr.bf16.mxu1 %v1040_v63 }
  0x76   : > { %715 = vmatpush1.bf16.msra.mxu0 %v1042_v1  ;;  %756 = vmatpush1.bf16.msra.mxu1 %v1043_v2 }
  0x79   : > { %717 = vmatmul.mubr.bf16.vlgmr.msra.gmra.mrb[0].mxu0 %v855_v3  ;;  %758 = vmatmul.mubr.bf16.vlgmr.msra.gmra.mrb[0].mxu1 %v855_v3 }
 0x14c   : > { %v718_v4 = vpop.f32.mrb[0].mxu0  ;;  %v759_v5 = vpop.f32.mrb[0].mxu1 }
 0x14d   : > { %vm766_vm0 = vcmp.ge.f32.partialorder %v718_v4, 0.0  ;;  %v770_v6 = vmul.f32 0.2, %v718_v4  ;;  %vm768_vm1 = vcmp.ge.f32.partialorder %v759_v5, 0.0  ;;  %v772_v7 = vmul.f32 0.2, %v759_v5 }
 0x14e   : > { %v720_v0 = vpop.f32.mrb[1].mxu0  ;;  %v761_v8 = vpop.f32.mrb[1].mxu1 }
 0x14f   : > { %v774_v9 = vsel %vm766_vm0, %v718_v4, %v770_v6  ;;  %v776_v10 = vsel %vm768_vm1, %v759_v5, %v772_v7  ;;  %vm767_vm2 = vcmp.ge.f32.partialorder %v720_v0, 0.0  ;;  %v771_v11 = vmul.f32 0.2, %v720_v0  ;;  %v722_v12 = vpop.f32.mrb[2].mxu0  ;;  %v763_v13 = vpop.f32.mrb[2].mxu1 }
 0x150   : > { %778 = vst [vmem:[%s290_s5] sm:$0xff] %v774_v9  ;;  %780 = vst [vmem:[%s290_s5 + $0x10] sm:$0xff] %v776_v10  ;;  %vm769_vm3 = vcmp.ge.f32.partialorder %v761_v8, 0.0  ;;  %v773_v14 = vmul.f32 0.2, %v761_v8  ;;  %v723_v15 = vpop.f32.mrb[3].mxu0  ;;  %v764_v16 = vpop.f32.mrb[3].mxu1 }
 0x151   : > { %v775_v17 = vsel %vm767_vm2, %v720_v0, %v771_v11 }
 0x152   : > { %779 = vst [vmem:[%s290_s5 + $0x8] sm:$0xff] %v775_v17  ;;  %v777_v18 = vsel %vm769_vm3, %v761_v8, %v773_v14 }
 0x153   : > { %781 = vst [vmem:[%s290_s5 + $0x18] sm:$0xff] %v777_v18 }
 0x154 PF: > { %p9_p9 = scmp.ge.s32.totalorder %s1102_s13, 18   ;;  %s1347_s9 = smov %s1064_s10 }
 0x155   : > { %s1348_s10 = smov %s1111_s16  ;;  %s1349_s11 = smov %s1102_s13 }
 0x156   :  { %11 = sbr.rel (!%p9_p9) target bundleno = 2 (0x2), region = 86 }

// kernel: critic_forward.9
= control target key start
LH: loop header
LB: loop body
LE: loop exit
PB: predicated region body
PF: predicated region fallthrough
CT: control target
= control target key end

     0   :  { %s467_s12 = smov 0   ;;  %s469_s13 = smov 0   ;;  %s561_s0 = inlined_call_operand.vmem [shape: f32[16,2048], index: 0, kind: input, shape index: {}]   ;;  %s562_s1 = inlined_call_operand.vmem [shape: f32[16,1], index: 1, kind: input, shape index: {}]   ;;  %s563_s2 = inlined_call_operand.vmem [shape: f32[16,1], index: 2, kind: input, shape index: {}]   ;;  %s564_s3 = inlined_call_operand.vmem [shape: f32[16,2048], index: 3, kind: output, shape index: {}]  }
   0x1   :  { %s471_s14 = smov 0  }
   0x2 LB: > { %s378_s15 = sadd.s32 4294967295, %s444_s14   ;;  %s484_s16 = sadd.s32 1, %s444_s14   ;;  %s444_s14 = sphi %s471_s14, %s568_s14   ;;  %s440_s13 = sphi %s469_s13, %s567_s13   ;;  %s436_s12 = sphi %s467_s12, %s566_s12  }
   0x3   : > { %s17_s17 = ssub.s32 %s444_s14, %s484_s16  ;;  %s20_s18 = sadd.s32 1, %s440_s13 }
   0x4   : > { %p18_p0 = scmp.eq.s32.totalorder %s17_s17, 0  ;;  %p27_p1 = scmp.ne.s32.totalorder %s440_s13, %s436_s12 }
   0x5   : > { %p28_p2 = scmp.eq.s32.totalorder %s444_s14, 0  ;;  %p99_p3 = scmp.eq.s32.totalorder %s378_s15, 3 }
   0x6   : > { %s495_s19 = scalar_select %p18_p0, %s440_s13, %s20_s18  }
   0x7   : > { %p29_p4 = por %p28_p2, %p27_p1  ;;  %p497_p5 = por %p99_p3, %p27_p1 }
   0x8   : > { %p381_p6 = scmp.ge.s32.totalorder %s444_s14, 4 }
   0xa   : > { %127 = sbr.rel (%p381_p6) target bundleno = 25 (0x19), region = 24 }
  0x11   : > { %130 = sbr.rel (!%p29_p4) target bundleno = 25 (0x19), region = 28  ;;  %s132_s21 = sand.u32 (%p29_p4), 1, %s440_s13  }
  0x12   : > { %s393_s22 = sshll.u32 (%p29_p4), %s444_s14, 5  ;;  %s382_s23 = sshll.u32 (%p29_p4), %s132_s21, 6 }
  0x13   : > { %s137_s26 = scalar_lea.vmem (%p29_p4), %s561_s0, %s393_s22  ;;  %s134_s27 = scalar_lea.vmem (%p29_p4), [#allocation2], %s382_s23 }
  0x14   : > { %v150_v0 = vld [vmem:[%s137_s26] sm:$0xff] (%p29_p4)  ;;  %v152_v1 = vld [vmem:[%s137_s26 + $0x8] sm:$0xff] (%p29_p4)  ;;  %v154_v2 = vld [vmem:[%s137_s26 + $0x10] sm:$0xff] (%p29_p4) }
  0x15   : > { %151 = vst [vmem:[%s134_s27] sm:$0xff] (%p29_p4), %v150_v0  ;;  %153 = vst [vmem:[%s134_s27 + $0x8] sm:$0xff] (%p29_p4), %v152_v1  ;;  %v156_v3 = vld [vmem:[%s137_s26 + $0x18] sm:$0xff] (%p29_p4)  ;;  %v158_v4 = vld [vmem:[%s137_s26 + $0x80] sm:$0xff] (%p29_p4) }
  0x16   : > { %155 = vst [vmem:[%s134_s27 + $0x10] sm:$0xff] (%p29_p4), %v154_v2  ;;  %v160_v5 = vld [vmem:[%s137_s26 + $0x88] sm:$0xff] (%p29_p4)  ;;  %157 = vst [vmem:[%s134_s27 + $0x18] sm:$0xff] (%p29_p4), %v156_v3  ;;  %v162_v6 = vld [vmem:[%s137_s26 + $0x90] sm:$0xff] (%p29_p4) }
  0x17   : > { %159 = vst [vmem:[%s134_s27 + $0x20] sm:$0xff] (%p29_p4), %v158_v4  ;;  %161 = vst [vmem:[%s134_s27 + $0x28] sm:$0xff] (%p29_p4), %v160_v5  ;;  %v164_v7 = vld [vmem:[%s137_s26 + $0x98] sm:$0xff] (%p29_p4) }
  0x18   : > { %163 = vst [vmem:[%s134_s27 + $0x30] sm:$0xff] %v162_v6  ;;  %165 = vst [vmem:[%s134_s27 + $0x38] sm:$0xff] %v164_v7 }
  0x19 PF: > { %p385_p7 = scmp.ge.s32.totalorder %s444_s14, 1  ;;  %p170_p8 = scmp.lt.s32.totalorder %s444_s14, 5 }
  0x1b   : > { %p171_p9 = pnand %p385_p7, %p170_p8 }
  0x1c   : > { %v229_v8 = vld [vmem:[%s563_s2] sm:$0xff] (!%p171_p9)  ;;  %v446_v10 = vmov (!%p171_p9), 0   ;;  %v230_v11 = vld [vmem:[%s563_s2 + $0x8] sm:$0xff] (!%p171_p9)  ;;  %s177_s9 = sand.u32 (!%p171_p9), 1, %s436_s12  }
  0x1d   : > { %174 = sbr.rel (%p171_p9) target bundleno = 181 (0xb5), region = 51  ;;  %v209_v9 = vld [vmem:[%s562_s1] sm:$0xff] (!%p171_p9)  ;;  %421 = vset.pattern.permute.xlu1 (!%p171_p9), %v446_v10  ;;  %420 = vset.pattern.permute.xlu0 (!%p171_p9), %v446_v10  ;;  %v210_v12 = vld [vmem:[%s562_s1 + $0x8] sm:$0xff] (!%p171_p9)  ;;  %s522_s10 = sshll.u32 (!%p171_p9), %s177_s9, 6 }
  0x1e   : > { %233 = vperm.xlu1 (!%p171_p9), %421, %v229_v8   ;;  %213 = vperm.xlu0 (!%p171_p9), %420, %v209_v9   ;;  %s179_s11 = scalar_lea.vmem (!%p171_p9), [#allocation2], %s522_s10  ;;  %s526_s12 = scalar_lea.vmem (!%p171_p9), [#allocation3], %s522_s10 }
  0x1f   : > { %v201_v13 = vld [vmem:[%s179_s11] sm:$0xff] (!%p171_p9)  ;;  %v202_v14 = vld [vmem:[%s179_s11 + $0x8] sm:$0xff] (!%p171_p9)  ;;  %v203_v15 = vld [vmem:[%s179_s11 + $0x10] sm:$0xff] (!%p171_p9) }
  0x20   : > { %v204_v16 = vld [vmem:[%s179_s11 + $0x18] sm:$0xff] (!%p171_p9)  ;;  %v205_v27 = vld [vmem:[%s179_s11 + $0x20] sm:$0xff] (!%p171_p9)  ;;  %v206_v29 = vld [vmem:[%s179_s11 + $0x28] sm:$0xff] (!%p171_p9) }
  0x21   : > { %v207_v30 = vld [vmem:[%s179_s11 + $0x30] sm:$0xff] (!%p171_p9)  ;;  %v208_v31 = vld [vmem:[%s179_s11 + $0x38] sm:$0xff] (!%p171_p9) }
  0x22   : > { %238 = vperm.xlu1 (!%p171_p9), %421, %v230_v11   ;;  %218 = vperm.xlu0 (!%p171_p9), %420, %v210_v12  }
  0x24   : > { %s394_s17 = sshll.u32 (%p497_p5), %s378_s15, 5 }
  0x25   : > { %s290_s22 = scalar_lea.vmem (%p497_p5), %s564_s3, %s394_s17 }
  0x9d   : > { %v214_v17 = vpop.permute.xlu0 %213  ;;  %v234_v18 = vpop.permute.xlu1 %233 }
  0x9e   : > { %v221_v19 = vmul.f32 %v214_v17, %v201_v13  ;;  %v222_v20 = vmul.f32 %v214_v17, %v202_v14  ;;  %v223_v21 = vmul.f32 %v214_v17, %v203_v15  ;;  %v224_v22 = vmul.f32 %v214_v17, %v204_v16 }
  0xa0   : > { %v241_v23 = vadd.f32 %v234_v18, %v221_v19  ;;  %v242_v24 = vadd.f32 %v234_v18, %v222_v20  ;;  %v243_v25 = vadd.f32 %v234_v18, %v223_v21  ;;  %v244_v26 = vadd.f32 %v234_v18, %v224_v22 }
  0xa1   : > { %v219_v28 = vpop.permute.xlu0 %218  ;;  %v239_v37 = vpop.permute.xlu1 %238 }
  0xa2   : > { %vm249_vm0 = vcmp.ge.f32.partialorder %v241_v23, 0.0  ;;  %vm250_vm1 = vcmp.ge.f32.partialorder %v242_v24, 0.0  ;;  %vm251_vm2 = vcmp.ge.f32.partialorder %v243_v25, 0.0  ;;  %vm252_vm3 = vcmp.ge.f32.partialorder %v244_v26, 0.0 }
  0xa3   : > { %v257_v32 = vmul.f32 0.2, %v241_v23  ;;  %v258_v33 = vmul.f32 0.2, %v242_v24  ;;  %v259_v34 = vmul.f32 0.2, %v243_v25  ;;  %v225_v35 = vmul.f32 %v219_v28, %v205_v27 }
  0xa4   : > { %v260_v36 = vmul.f32 0.2, %v244_v26  ;;  %v226_v38 = vmul.f32 %v219_v28, %v206_v29  ;;  %v227_v39 = vmul.f32 %v219_v28, %v207_v30  ;;  %v228_v40 = vmul.f32 %v219_v28, %v208_v31 }
  0xa5   : > { %v265_v41 = vsel %vm249_vm0, %v241_v23, %v257_v32  ;;  %v266_v42 = vsel %vm250_vm1, %v242_v24, %v258_v33  ;;  %v267_v43 = vsel %vm251_vm2, %v243_v25, %v259_v34  ;;  %v245_v44 = vadd.f32 %v239_v37, %v225_v35 }
  0xa6   : > { %v268_v45 = vsel %vm252_vm3, %v244_v26, %v260_v36  ;;  %273 = vst [vmem:[%s526_s12] sm:$0xff] %v265_v41  ;;  %274 = vst [vmem:[%s526_s12 + $0x8] sm:$0xff] %v266_v42  ;;  %v246_v46 = vadd.f32 %v239_v37, %v226_v38  ;;  %v247_v47 = vadd.f32 %v239_v37, %v227_v39  ;;  %287 = sbr.rel (!%p497_p5) target bundleno = 181 (0xb5), region = 59 }
  0xa7   : > { %275 = vst [vmem:[%s526_s12 + $0x10] sm:$0xff] %v267_v43  ;;  %v248_v48 = vadd.f32 %v239_v37, %v228_v40  ;;  %276 = vst [vmem:[%s526_s12 + $0x18] sm:$0xff] %v268_v45  ;;  %vm253_vm4 = vcmp.ge.f32.partialorder %v245_v44, 0.0  ;;  %v261_v49 = vmul.f32 0.2, %v245_v44 }
  0xa8   : > { %vm254_vm5 = vcmp.ge.f32.partialorder %v246_v46, 0.0  ;;  %vm255_vm6 = vcmp.ge.f32.partialorder %v247_v47, 0.0  ;;  %v262_v50 = vmul.f32 0.2, %v246_v46  ;;  %v263_v51 = vmul.f32 0.2, %v247_v47 }
  0xa9   : > { %vm256_vm7 = vcmp.ge.f32.partialorder %v248_v48, 0.0  ;;  %v264_v52 = vmul.f32 0.2, %v248_v48  ;;  %v269_v53 = vsel %vm253_vm4, %v245_v44, %v261_v49 }
  0xaa   : > { %v270_v54 = vsel %vm254_vm5, %v246_v46, %v262_v50  ;;  %277 = vst [vmem:[%s526_s12 + $0x20] sm:$0xff] %v269_v53  ;;  %v271_v55 = vsel %vm255_vm6, %v247_v47, %v263_v51 }
  0xab   : > { %v272_v56 = vsel %vm256_vm7, %v248_v48, %v264_v52  ;;  %278 = vst [vmem:[%s526_s12 + $0x28] sm:$0xff] %v270_v54  ;;  %279 = vst [vmem:[%s526_s12 + $0x30] sm:$0xff] %v271_v55 }
  0xac   : > { %280 = vst [vmem:[%s526_s12 + $0x38] sm:$0xff] %v272_v56 }
  0xad   : > { %v303_v57 = vld [vmem:[%s526_s12] sm:$0xff]  ;;  %v305_v58 = vld [vmem:[%s526_s12 + $0x8] sm:$0xff] }
  0xae   : > { %v307_v59 = vld [vmem:[%s526_s12 + $0x10] sm:$0xff]  ;;  %v309_v60 = vld [vmem:[%s526_s12 + $0x18] sm:$0xff]  ;;  %304 = vst [vmem:[%s290_s22] sm:$0xff] %v303_v57  ;;  %306 = vst [vmem:[%s290_s22 + $0x8] sm:$0xff] %v305_v58 }
  0xaf   : > { %308 = vst [vmem:[%s290_s22 + $0x10] sm:$0xff] %v307_v59  ;;  %310 = vst [vmem:[%s290_s22 + $0x18] sm:$0xff] %v309_v60 }
  0xb1   : > { %v311_v61 = vld [vmem:[%s526_s12 + $0x20] sm:$0xff] }
  0xb2   : > { %v313_v62 = vld [vmem:[%s526_s12 + $0x28] sm:$0xff]  ;;  %312 = vst [vmem:[%s290_s22 + $0x80] sm:$0xff] %v311_v61  ;;  %v315_v63 = vld [vmem:[%s526_s12 + $0x30] sm:$0xff] }
  0xb3   : > { %314 = vst [vmem:[%s290_s22 + $0x88] sm:$0xff] %v313_v62  ;;  %v317_v0 = vld [vmem:[%s526_s12 + $0x38] sm:$0xff]  ;;  %316 = vst [vmem:[%s290_s22 + $0x90] sm:$0xff] %v315_v63 }
  0xb4   : > { %318 = vst [vmem:[%s290_s22 + $0x98] sm:$0xff] %v317_v0 }
  0xb5 PF: > { %p10_p10 = scmp.ge.s32.totalorder %s484_s16, 6   ;;  %s566_s12 = smov %s440_s13 }
  0xb6   : > { %s567_s13 = smov %s495_s19  ;;  %s568_s14 = smov %s484_s16 }
  0xb7   :  { %12 = sbr.rel (!%p10_p10) target bundleno = 2 (0x2), region = 113 }

// kernel: critic_forward.8
= control target key start
LH: loop header
LB: loop body
LE: loop exit
PB: predicated region body
PF: predicated region fallthrough
CT: control target
= control target key end

     0   :  { %s1242_s15 = smov 0   ;;  %s1244_s16 = smov 0   ;;  %s1565_s0 = inlined_call_operand.vmem [shape: bf16[256,2048], index: 0, kind: input, shape index: {}]   ;;  %s1566_s1 = inlined_call_operand.vmem [shape: bf16[16,256], index: 1, kind: input, shape index: {}]   ;;  %s1567_s2 = inlined_call_operand.vmem [shape: f32[16,2048], index: 2, kind: output, shape index: {0}]   ;;  %s1568_s3 = inlined_call_operand.vmem [shape: f32[16,1], index: 3, kind: output, shape index: {1}]   ;;  %s1569_s4 = inlined_call_operand.vmem [shape: f32[16,1], index: 4, kind: output, shape index: {2}]  }
   0x1   :  { %s1246_s17 = smov 0  }
   0x2 LB: > { %s1258_s18 = sadd.s32 4294967295, %s1214_s17   ;;  %s1261_s19 = sadd.s32 1, %s1214_s17   ;;  %s1214_s17 = sphi %s1246_s17, %s1573_s17   ;;  %s1210_s16 = sphi %s1244_s16, %s1572_s16   ;;  %s1206_s15 = sphi %s1242_s15, %s1571_s15  }
   0x3   : > { %s19_s20 = ssub.s32 %s1214_s17, %s1261_s19  ;;  %s22_s21 = sadd.s32 1, %s1210_s16 }
   0x4   : > { %p20_p0 = scmp.eq.s32.totalorder %s19_s20, 0  ;;  %p29_p1 = scmp.ne.s32.totalorder %s1210_s16, %s1206_s15 }
   0x5   : > { %p30_p2 = scmp.eq.s32.totalorder %s1214_s17, 0  ;;  %p80_p3 = scmp.eq.s32.totalorder %s1258_s18, 3 }
   0x6   : > { %s1271_s22 = scalar_select %p20_p0, %s1210_s16, %s22_s21  }
   0x7   : > { %p31_p4 = por %p30_p2, %p29_p1  ;;  %p1273_p5 = por %p80_p3, %p29_p1 }
   0x8   : > { %p987_p6 = scmp.ge.s32.totalorder %s1214_s17, 4 }
   0xa   : > { %147 = sbr.rel (%p987_p6) target bundleno = 53 (0x35), region = 20 }
  0x11   : > { %150 = sbr.rel (!%p31_p4) target bundleno = 53 (0x35), region = 24  ;;  %s152_s24 = sand.u32 (%p31_p4), 1, %s1210_s16  }
  0x12   : > { %s1066_s25 = sshll.u32 (%p31_p4), %s1214_s17, 4  ;;  %s988_s26 = sshll.u32 (%p31_p4), %s152_s24, 9 }
  0x13   : > { %s1283_s29 = scalar_lea.vmem (%p31_p4), %s1565_s0, %s1066_s25  ;;  %s1288_s30 = scalar_lea.vmem (%p31_p4), [#allocation2], %s988_s26 }
  0x14   : > { %v170_v0 = vld [vmem:[%s1283_s29] sm:$0xff] (%p31_p4)  ;;  %v172_v1 = vld [vmem:[%s1283_s29 + $0x8] sm:$0xff] (%p31_p4) }
  0x15   : > { %v174_v2 = vld [vmem:[%s1283_s29 + $0x40] sm:$0xff] (%p31_p4)  ;;  %171 = vst [vmem:[%s1288_s30] sm:$0xff] (%p31_p4), %v170_v0  ;;  %173 = vst [vmem:[%s1288_s30 + $0x8] sm:$0xff] (%p31_p4), %v172_v1  ;;  %v176_v3 = vld [vmem:[%s1283_s29 + $0x48] sm:$0xff] (%p31_p4) }
  0x16   : > { %175 = vst [vmem:[%s1288_s30 + $0x10] sm:$0xff] (%p31_p4), %v174_v2  ;;  %v178_v4 = vld [vmem:[%s1283_s29 + $0x80] sm:$0xff] (%p31_p4)  ;;  %v180_v5 = vld [vmem:[%s1283_s29 + $0x88] sm:$0xff] (%p31_p4)  ;;  %177 = vst [vmem:[%s1288_s30 + $0x18] sm:$0xff] (%p31_p4), %v176_v3 }
  0x17   : > { %179 = vst [vmem:[%s1288_s30 + $0x20] sm:$0xff] (%p31_p4), %v178_v4  ;;  %181 = vst [vmem:[%s1288_s30 + $0x28] sm:$0xff] (%p31_p4), %v180_v5  ;;  %v182_v6 = vld [vmem:[%s1283_s29 + $0xc0] sm:$0xff] (%p31_p4)  ;;  %v184_v7 = vld [vmem:[%s1283_s29 + $0xc8] sm:$0xff] (%p31_p4) }
  0x18   : > { %v186_v8 = vld [vmem:[%s1283_s29 + $0x100] sm:$0xff]  ;;  %183 = vst [vmem:[%s1288_s30 + $0x30] sm:$0xff] %v182_v6  ;;  %185 = vst [vmem:[%s1288_s30 + $0x38] sm:$0xff] %v184_v7  ;;  %v188_v9 = vld [vmem:[%s1283_s29 + $0x108] sm:$0xff] }
  0x19   : > { %187 = vst [vmem:[%s1288_s30 + $0x40] sm:$0xff] %v186_v8  ;;  %v190_v10 = vld [vmem:[%s1283_s29 + $0x140] sm:$0xff]  ;;  %v192_v11 = vld [vmem:[%s1283_s29 + $0x148] sm:$0xff]  ;;  %189 = vst [vmem:[%s1288_s30 + $0x48] sm:$0xff] %v188_v9 }
  0x1a   : > { %191 = vst [vmem:[%s1288_s30 + $0x50] sm:$0xff] %v190_v10  ;;  %193 = vst [vmem:[%s1288_s30 + $0x58] sm:$0xff] %v192_v11  ;;  %v194_v12 = vld [vmem:[%s1283_s29 + $0x180] sm:$0xff]  ;;  %v196_v13 = vld [vmem:[%s1283_s29 + $0x188] sm:$0xff] }
  0x1b   : > { %v198_v14 = vld [vmem:[%s1283_s29 + $0x1c0] sm:$0xff]  ;;  %195 = vst [vmem:[%s1288_s30 + $0x60] sm:$0xff] %v194_v12  ;;  %197 = vst [vmem:[%s1288_s30 + $0x68] sm:$0xff] %v196_v13  ;;  %v200_v15 = vld [vmem:[%s1283_s29 + $0x1c8] sm:$0xff] }
  0x1c   : > { %199 = vst [vmem:[%s1288_s30 + $0x70] sm:$0xff] %v198_v14  ;;  %v202_v16 = vld [vmem:[%s1283_s29 + $0x200] sm:$0xff]  ;;  %v204_v17 = vld [vmem:[%s1283_s29 + $0x208] sm:$0xff]  ;;  %201 = vst [vmem:[%s1288_s30 + $0x78] sm:$0xff] %v200_v15 }
  0x1d   : > { %203 = vst [vmem:[%s1288_s30 + $0x80] sm:$0xff] %v202_v16  ;;  %205 = vst [vmem:[%s1288_s30 + $0x88] sm:$0xff] %v204_v17  ;;  %v206_v18 = vld [vmem:[%s1283_s29 + $0x240] sm:$0xff]  ;;  %v208_v19 = vld [vmem:[%s1283_s29 + $0x248] sm:$0xff] }
  0x1e   : > { %v210_v20 = vld [vmem:[%s1283_s29 + $0x280] sm:$0xff]  ;;  %207 = vst [vmem:[%s1288_s30 + $0x90] sm:$0xff] %v206_v18  ;;  %209 = vst [vmem:[%s1288_s30 + $0x98] sm:$0xff] %v208_v19  ;;  %v212_v21 = vld [vmem:[%s1283_s29 + $0x288] sm:$0xff] }
  0x1f   : > { %211 = vst [vmem:[%s1288_s30 + $0xa0] sm:$0xff] %v210_v20  ;;  %v214_v22 = vld [vmem:[%s1283_s29 + $0x2c0] sm:$0xff]  ;;  %v216_v23 = vld [vmem:[%s1283_s29 + $0x2c8] sm:$0xff]  ;;  %213 = vst [vmem:[%s1288_s30 + $0xa8] sm:$0xff] %v212_v21 }
  0x20   : > { %215 = vst [vmem:[%s1288_s30 + $0xb0] sm:$0xff] %v214_v22  ;;  %217 = vst [vmem:[%s1288_s30 + $0xb8] sm:$0xff] %v216_v23  ;;  %v218_v24 = vld [vmem:[%s1283_s29 + $0x300] sm:$0xff]  ;;  %v220_v25 = vld [vmem:[%s1283_s29 + $0x308] sm:$0xff] }
  0x21   : > { %v222_v26 = vld [vmem:[%s1283_s29 + $0x340] sm:$0xff]  ;;  %219 = vst [vmem:[%s1288_s30 + $0xc0] sm:$0xff] %v218_v24  ;;  %221 = vst [vmem:[%s1288_s30 + $0xc8] sm:$0xff] %v220_v25  ;;  %v224_v27 = vld [vmem:[%s1283_s29 + $0x348] sm:$0xff] }
  0x22   : > { %223 = vst [vmem:[%s1288_s30 + $0xd0] sm:$0xff] %v222_v26  ;;  %v226_v28 = vld [vmem:[%s1283_s29 + $0x380] sm:$0xff]  ;;  %v228_v29 = vld [vmem:[%s1283_s29 + $0x388] sm:$0xff]  ;;  %225 = vst [vmem:[%s1288_s30 + $0xd8] sm:$0xff] %v224_v27 }
  0x23   : > { %227 = vst [vmem:[%s1288_s30 + $0xe0] sm:$0xff] %v226_v28  ;;  %229 = vst [vmem:[%s1288_s30 + $0xe8] sm:$0xff] %v228_v29  ;;  %v230_v30 = vld [vmem:[%s1283_s29 + $0x3c0] sm:$0xff]  ;;  %v232_v31 = vld [vmem:[%s1283_s29 + $0x3c8] sm:$0xff] }
  0x24   : > { %v234_v32 = vld [vmem:[%s1283_s29 + $0x400] sm:$0xff]  ;;  %231 = vst [vmem:[%s1288_s30 + $0xf0] sm:$0xff] %v230_v30  ;;  %233 = vst [vmem:[%s1288_s30 + $0xf8] sm:$0xff] %v232_v31  ;;  %v236_v33 = vld [vmem:[%s1283_s29 + $0x408] sm:$0xff] }
  0x25   : > { %235 = vst [vmem:[%s1288_s30 + $0x100] sm:$0xff] %v234_v32  ;;  %v238_v34 = vld [vmem:[%s1283_s29 + $0x440] sm:$0xff]  ;;  %v240_v35 = vld [vmem:[%s1283_s29 + $0x448] sm:$0xff]  ;;  %237 = vst [vmem:[%s1288_s30 + $0x108] sm:$0xff] %v236_v33 }
  0x26   : > { %239 = vst [vmem:[%s1288_s30 + $0x110] sm:$0xff] %v238_v34  ;;  %241 = vst [vmem:[%s1288_s30 + $0x118] sm:$0xff] %v240_v35  ;;  %v242_v36 = vld [vmem:[%s1283_s29 + $0x480] sm:$0xff]  ;;  %v244_v37 = vld [vmem:[%s1283_s29 + $0x488] sm:$0xff] }
  0x27   : > { %v246_v38 = vld [vmem:[%s1283_s29 + $0x4c0] sm:$0xff]  ;;  %243 = vst [vmem:[%s1288_s30 + $0x120] sm:$0xff] %v242_v36  ;;  %245 = vst [vmem:[%s1288_s30 + $0x128] sm:$0xff] %v244_v37  ;;  %v248_v39 = vld [vmem:[%s1283_s29 + $0x4c8] sm:$0xff] }
  0x28   : > { %247 = vst [vmem:[%s1288_s30 + $0x130] sm:$0xff] %v246_v38  ;;  %v250_v40 = vld [vmem:[%s1283_s29 + $0x500] sm:$0xff]  ;;  %v252_v41 = vld [vmem:[%s1283_s29 + $0x508] sm:$0xff]  ;;  %249 = vst [vmem:[%s1288_s30 + $0x138] sm:$0xff] %v248_v39 }
  0x29   : > { %251 = vst [vmem:[%s1288_s30 + $0x140] sm:$0xff] %v250_v40  ;;  %253 = vst [vmem:[%s1288_s30 + $0x148] sm:$0xff] %v252_v41  ;;  %v254_v42 = vld [vmem:[%s1283_s29 + $0x540] sm:$0xff]  ;;  %v256_v43 = vld [vmem:[%s1283_s29 + $0x548] sm:$0xff] }
  0x2a   : > { %v258_v44 = vld [vmem:[%s1283_s29 + $0x580] sm:$0xff]  ;;  %255 = vst [vmem:[%s1288_s30 + $0x150] sm:$0xff] %v254_v42  ;;  %257 = vst [vmem:[%s1288_s30 + $0x158] sm:$0xff] %v256_v43  ;;  %v260_v45 = vld [vmem:[%s1283_s29 + $0x588] sm:$0xff] }
  0x2b   : > { %259 = vst [vmem:[%s1288_s30 + $0x160] sm:$0xff] %v258_v44  ;;  %v262_v46 = vld [vmem:[%s1283_s29 + $0x5c0] sm:$0xff]  ;;  %v264_v47 = vld [vmem:[%s1283_s29 + $0x5c8] sm:$0xff]  ;;  %261 = vst [vmem:[%s1288_s30 + $0x168] sm:$0xff] %v260_v45 }
  0x2c   : > { %263 = vst [vmem:[%s1288_s30 + $0x170] sm:$0xff] %v262_v46  ;;  %265 = vst [vmem:[%s1288_s30 + $0x178] sm:$0xff] %v264_v47  ;;  %v266_v48 = vld [vmem:[%s1283_s29 + $0x600] sm:$0xff]  ;;  %v268_v49 = vld [vmem:[%s1283_s29 + $0x608] sm:$0xff] }
  0x2d   : > { %v270_v50 = vld [vmem:[%s1283_s29 + $0x640] sm:$0xff]  ;;  %267 = vst [vmem:[%s1288_s30 + $0x180] sm:$0xff] %v266_v48  ;;  %269 = vst [vmem:[%s1288_s30 + $0x188] sm:$0xff] %v268_v49  ;;  %v272_v51 = vld [vmem:[%s1283_s29 + $0x648] sm:$0xff] }
  0x2e   : > { %271 = vst [vmem:[%s1288_s30 + $0x190] sm:$0xff] %v270_v50  ;;  %v274_v52 = vld [vmem:[%s1283_s29 + $0x680] sm:$0xff]  ;;  %v276_v53 = vld [vmem:[%s1283_s29 + $0x688] sm:$0xff]  ;;  %273 = vst [vmem:[%s1288_s30 + $0x198] sm:$0xff] %v272_v51 }
  0x2f   : > { %275 = vst [vmem:[%s1288_s30 + $0x1a0] sm:$0xff] %v274_v52  ;;  %277 = vst [vmem:[%s1288_s30 + $0x1a8] sm:$0xff] %v276_v53  ;;  %v278_v54 = vld [vmem:[%s1283_s29 + $0x6c0] sm:$0xff]  ;;  %v280_v55 = vld [vmem:[%s1283_s29 + $0x6c8] sm:$0xff] }
  0x30   : > { %v282_v56 = vld [vmem:[%s1283_s29 + $0x700] sm:$0xff]  ;;  %279 = vst [vmem:[%s1288_s30 + $0x1b0] sm:$0xff] %v278_v54  ;;  %281 = vst [vmem:[%s1288_s30 + $0x1b8] sm:$0xff] %v280_v55  ;;  %v284_v57 = vld [vmem:[%s1283_s29 + $0x708] sm:$0xff] }
  0x31   : > { %283 = vst [vmem:[%s1288_s30 + $0x1c0] sm:$0xff] %v282_v56  ;;  %v286_v58 = vld [vmem:[%s1283_s29 + $0x740] sm:$0xff]  ;;  %v288_v59 = vld [vmem:[%s1283_s29 + $0x748] sm:$0xff]  ;;  %285 = vst [vmem:[%s1288_s30 + $0x1c8] sm:$0xff] %v284_v57 }
  0x32   : > { %287 = vst [vmem:[%s1288_s30 + $0x1d0] sm:$0xff] %v286_v58  ;;  %289 = vst [vmem:[%s1288_s30 + $0x1d8] sm:$0xff] %v288_v59  ;;  %v290_v60 = vld [vmem:[%s1283_s29 + $0x780] sm:$0xff]  ;;  %v292_v61 = vld [vmem:[%s1283_s29 + $0x788] sm:$0xff] }
  0x33   : > { %v294_v62 = vld [vmem:[%s1283_s29 + $0x7c0] sm:$0xff]  ;;  %291 = vst [vmem:[%s1288_s30 + $0x1e0] sm:$0xff] %v290_v60  ;;  %293 = vst [vmem:[%s1288_s30 + $0x1e8] sm:$0xff] %v292_v61  ;;  %v296_v63 = vld [vmem:[%s1283_s29 + $0x7c8] sm:$0xff] }
  0x34   : > { %295 = vst [vmem:[%s1288_s30 + $0x1f0] sm:$0xff] %v294_v62  ;;  %297 = vst [vmem:[%s1288_s30 + $0x1f8] sm:$0xff] %v296_v63 }
  0x35 PF: > { %p991_p7 = scmp.ge.s32.totalorder %s1214_s17, 1  ;;  %p302_p8 = scmp.lt.s32.totalorder %s1214_s17, 5 }
  0x37   : > { %p303_p9 = pnand %p991_p7, %p302_p8 }
  0x38   : > { %s309_s5 = sand.u32 (!%p303_p9), 1, %s1206_s15   ;;  %v1191_v0 = vld [vmem:[%s1566_s1 + $0x4] ss:$8 sps:$4 sm:$0xff] (!%p303_p9)   ;;  %p1060_p10 = scmp.ne.s32.totalorder (!%p303_p9), %s1258_s18, 0 }
  0x39   : > { %306 = sbr.rel (%p303_p9) target bundleno = 497 (0x1f1), region = 47  ;;  %s992_s6 = sshll.u32 (!%p303_p9), %s309_s5, 9  ;;  %763 = vmatprep.mubr.bf16.mxu0 (!%p303_p9), %v1191_v0  ;;  %806 = vmatprep.mubr.bf16.mxu1 (!%p303_p9), %v1191_v0 }
  0x3a   : > { %s1423_s9 = scalar_lea.vmem (!%p303_p9), [#allocation2], %s992_s6  ;;  %s993_s12 = sshll.u32 (!%p303_p9), %s309_s5, 6 }
  0x3b   : > { %v1093_v1 = vld [vmem:[%s1423_s9 + $0x4] ss:$16 sps:$4 sm:$0xff] (!%p303_p9)   ;;  %v1095_v2 = vld [vmem:[%s1423_s9 + $0xc] ss:$16 sps:$4 sm:$0xff] (!%p303_p9)   ;;  %v1097_v3 = vld [vmem:[%s1423_s9] ss:$16 sps:$4 sm:$0xff] (!%p303_p9)  }
  0x3c   : > { %731 = vmatprep.subr.bf16.mxu0 (!%p303_p9), %v1093_v1  ;;  %v1098_v4 = vld [vmem:[%s1423_s9 + $0x8] ss:$16 sps:$4 sm:$0xff] (!%p303_p9)   ;;  %774 = vmatprep.subr.bf16.mxu1 (!%p303_p9), %v1095_v2  ;;  %v1099_v5 = vld [vmem:[%s1423_s9 + $0x24] ss:$16 sps:$4 sm:$0xff] (!%p303_p9)   ;;  %v1101_v6 = vld [vmem:[%s1423_s9 + $0x2c] ss:$16 sps:$4 sm:$0xff] (!%p303_p9)  }
  0x3d   : > { %732 = vmatpush1.bf16.msra.mxu0 (!%p303_p9), %v1097_v3  ;;  %775 = vmatpush1.bf16.msra.mxu1 (!%p303_p9), %v1098_v4  ;;  %v1103_v7 = vld [vmem:[%s1423_s9 + $0x20] ss:$16 sps:$4 sm:$0xff] (!%p303_p9)   ;;  %v1104_v8 = vld [vmem:[%s1423_s9 + $0x28] ss:$16 sps:$4 sm:$0xff] (!%p303_p9)   ;;  %v1105_v9 = vld [vmem:[%s1423_s9 + $0x44] ss:$16 sps:$4 sm:$0xff] (!%p303_p9)  }
  0x3e   : > { %733 = vmatprep.subr.bf16.mxu0 (!%p303_p9), %v1099_v5  ;;  %776 = vmatprep.subr.bf16.mxu1 (!%p303_p9), %v1101_v6  ;;  %v1107_v10 = vld [vmem:[%s1423_s9 + $0x4c] ss:$16 sps:$4 sm:$0xff] (!%p303_p9)   ;;  %v1109_v11 = vld [vmem:[%s1423_s9 + $0x40] ss:$16 sps:$4 sm:$0xff] (!%p303_p9)   ;;  %v1110_v12 = vld [vmem:[%s1423_s9 + $0x48] ss:$16 sps:$4 sm:$0xff] (!%p303_p9)  }
  0x3f   : > { %v1111_v13 = vld [vmem:[%s1423_s9 + $0x64] ss:$16 sps:$4 sm:$0xff] (!%p303_p9)   ;;  %v1113_v14 = vld [vmem:[%s1423_s9 + $0x6c] ss:$16 sps:$4 sm:$0xff] (!%p303_p9)   ;;  %v1115_v15 = vld [vmem:[%s1423_s9 + $0x60] ss:$16 sps:$4 sm:$0xff] (!%p303_p9)  }
  0x40   : > { %v1116_v16 = vld [vmem:[%s1423_s9 + $0x68] ss:$16 sps:$4 sm:$0xff]   ;;  %v1117_v17 = vld [vmem:[%s1423_s9 + $0x84] ss:$16 sps:$4 sm:$0xff]   ;;  %v1119_v18 = vld [vmem:[%s1423_s9 + $0x8c] ss:$16 sps:$4 sm:$0xff]  }
  0x41   : > { %734 = vmatpush1.bf16.msra.mxu0 %v1103_v7  ;;  %777 = vmatpush1.bf16.msra.mxu1 %v1104_v8  ;;  %v1121_v19 = vld [vmem:[%s1423_s9 + $0x80] ss:$16 sps:$4 sm:$0xff]   ;;  %v1122_v20 = vld [vmem:[%s1423_s9 + $0x88] ss:$16 sps:$4 sm:$0xff]   ;;  %v1123_v21 = vld [vmem:[%s1423_s9 + $0xa4] ss:$16 sps:$4 sm:$0xff]  }
  0x42   : > { %735 = vmatprep.subr.bf16.mxu0 %v1105_v9  ;;  %778 = vmatprep.subr.bf16.mxu1 %v1107_v10  ;;  %v1125_v22 = vld [vmem:[%s1423_s9 + $0xac] ss:$16 sps:$4 sm:$0xff]   ;;  %v1127_v23 = vld [vmem:[%s1423_s9 + $0xa0] ss:$16 sps:$4 sm:$0xff]   ;;  %v1128_v24 = vld [vmem:[%s1423_s9 + $0xa8] ss:$16 sps:$4 sm:$0xff]  }
  0x43   : > { %v1129_v25 = vld [vmem:[%s1423_s9 + $0xc4] ss:$16 sps:$4 sm:$0xff]   ;;  %v1131_v26 = vld [vmem:[%s1423_s9 + $0xcc] ss:$16 sps:$4 sm:$0xff]   ;;  %v1133_v27 = vld [vmem:[%s1423_s9 + $0xc0] ss:$16 sps:$4 sm:$0xff]  }
  0x44   : > { %v1134_v28 = vld [vmem:[%s1423_s9 + $0xc8] ss:$16 sps:$4 sm:$0xff]   ;;  %v1135_v29 = vld [vmem:[%s1423_s9 + $0xe4] ss:$16 sps:$4 sm:$0xff]   ;;  %v1137_v30 = vld [vmem:[%s1423_s9 + $0xec] ss:$16 sps:$4 sm:$0xff]  }
  0x45   : > { %736 = vmatpush1.bf16.msra.mxu0 %v1109_v11  ;;  %779 = vmatpush1.bf16.msra.mxu1 %v1110_v12  ;;  %v1139_v31 = vld [vmem:[%s1423_s9 + $0xe0] ss:$16 sps:$4 sm:$0xff]   ;;  %v1140_v32 = vld [vmem:[%s1423_s9 + $0xe8] ss:$16 sps:$4 sm:$0xff]   ;;  %v1141_v33 = vld [vmem:[%s1423_s9 + $0x104] ss:$16 sps:$4 sm:$0xff]  }
  0x46   : > { %737 = vmatprep.subr.bf16.mxu0 %v1111_v13  ;;  %780 = vmatprep.subr.bf16.mxu1 %v1113_v14  ;;  %v1143_v34 = vld [vmem:[%s1423_s9 + $0x10c] ss:$16 sps:$4 sm:$0xff]   ;;  %v1145_v35 = vld [vmem:[%s1423_s9 + $0x100] ss:$16 sps:$4 sm:$0xff]   ;;  %v1146_v36 = vld [vmem:[%s1423_s9 + $0x108] ss:$16 sps:$4 sm:$0xff]  }
  0x47   : > { %v1147_v37 = vld [vmem:[%s1423_s9 + $0x124] ss:$16 sps:$4 sm:$0xff]   ;;  %v1149_v38 = vld [vmem:[%s1423_s9 + $0x12c] ss:$16 sps:$4 sm:$0xff]   ;;  %v1151_v39 = vld [vmem:[%s1423_s9 + $0x120] ss:$16 sps:$4 sm:$0xff]  }
  0x48   : > { %v1152_v40 = vld [vmem:[%s1423_s9 + $0x128] ss:$16 sps:$4 sm:$0xff]   ;;  %v1153_v41 = vld [vmem:[%s1423_s9 + $0x144] ss:$16 sps:$4 sm:$0xff]   ;;  %v1155_v42 = vld [vmem:[%s1423_s9 + $0x14c] ss:$16 sps:$4 sm:$0xff]  }
  0x49   : > { %738 = vmatpush1.bf16.msra.mxu0 %v1115_v15  ;;  %781 = vmatpush1.bf16.msra.mxu1 %v1116_v16  ;;  %v1157_v43 = vld [vmem:[%s1423_s9 + $0x140] ss:$16 sps:$4 sm:$0xff]   ;;  %v1158_v44 = vld [vmem:[%s1423_s9 + $0x148] ss:$16 sps:$4 sm:$0xff]   ;;  %v1159_v45 = vld [vmem:[%s1423_s9 + $0x164] ss:$16 sps:$4 sm:$0xff]  }
  0x4a   : > { %739 = vmatprep.subr.bf16.mxu0 %v1117_v17  ;;  %782 = vmatprep.subr.bf16.mxu1 %v1119_v18  ;;  %v1161_v46 = vld [vmem:[%s1423_s9 + $0x16c] ss:$16 sps:$4 sm:$0xff]   ;;  %v1163_v47 = vld [vmem:[%s1423_s9 + $0x160] ss:$16 sps:$4 sm:$0xff]   ;;  %v1164_v48 = vld [vmem:[%s1423_s9 + $0x168] ss:$16 sps:$4 sm:$0xff]  }
  0x4b   : > { %v1165_v49 = vld [vmem:[%s1423_s9 + $0x184] ss:$16 sps:$4 sm:$0xff]   ;;  %v1167_v50 = vld [vmem:[%s1423_s9 + $0x18c] ss:$16 sps:$4 sm:$0xff]   ;;  %v1169_v51 = vld [vmem:[%s1423_s9 + $0x180] ss:$16 sps:$4 sm:$0xff]  }
  0x4c   : > { %v1170_v52 = vld [vmem:[%s1423_s9 + $0x188] ss:$16 sps:$4 sm:$0xff]   ;;  %v1171_v53 = vld [vmem:[%s1423_s9 + $0x1a4] ss:$16 sps:$4 sm:$0xff]   ;;  %v1173_v54 = vld [vmem:[%s1423_s9 + $0x1ac] ss:$16 sps:$4 sm:$0xff]  }
  0x4d   : > { %740 = vmatpush1.bf16.msra.mxu0 %v1121_v19  ;;  %783 = vmatpush1.bf16.msra.mxu1 %v1122_v20  ;;  %v1175_v55 = vld [vmem:[%s1423_s9 + $0x1a0] ss:$16 sps:$4 sm:$0xff]   ;;  %v1176_v56 = vld [vmem:[%s1423_s9 + $0x1a8] ss:$16 sps:$4 sm:$0xff]   ;;  %v1177_v57 = vld [vmem:[%s1423_s9 + $0x1c4] ss:$16 sps:$4 sm:$0xff]  }
  0x4e   : > { %741 = vmatprep.subr.bf16.mxu0 %v1123_v21  ;;  %784 = vmatprep.subr.bf16.mxu1 %v1125_v22  ;;  %v1179_v58 = vld [vmem:[%s1423_s9 + $0x1cc] ss:$16 sps:$4 sm:$0xff]   ;;  %v1181_v59 = vld [vmem:[%s1423_s9 + $0x1c0] ss:$16 sps:$4 sm:$0xff]   ;;  %v1182_v60 = vld [vmem:[%s1423_s9 + $0x1c8] ss:$16 sps:$4 sm:$0xff]  }
  0x4f   : > { %v1183_v61 = vld [vmem:[%s1423_s9 + $0x1e4] ss:$16 sps:$4 sm:$0xff]   ;;  %v1185_v62 = vld [vmem:[%s1423_s9 + $0x1ec] ss:$16 sps:$4 sm:$0xff]   ;;  %v1187_v63 = vld [vmem:[%s1423_s9 + $0x1e0] ss:$16 sps:$4 sm:$0xff]  }
  0x50   : > { %v1188_v0 = vld [vmem:[%s1423_s9 + $0x1e8] ss:$16 sps:$4 sm:$0xff]   ;;  %s1494_s13 = scalar_lea.vmem [#allocation3], %s993_s12  ;;  %vm829_vm0 = vcmask (!%p1060_p10), 7168   ;;  %v1216_v10 = vmov (!%p1060_p10), 0.0  }
  0x51   : > { %742 = vmatpush1.bf16.msra.mxu0 %v1127_v23  ;;  %785 = vmatpush1.bf16.msra.mxu1 %v1128_v24  ;;  %v1189_v1 = vld [vmem:[%s1566_s1] ss:$8 sps:$4 sm:$0xff]   ;;  %830 = vst.msk [vmem:[%s1568_s3] sm:$0xff] (!%p1060_p10), %vm829_vm0, %v1216_v10  ;;  %831 = vst.msk [vmem:[%s1568_s3 + $0x8] sm:$0xff] (!%p1060_p10), %vm829_vm0, %v1216_v10 }
  0x52   : > { %743 = vmatprep.subr.bf16.mxu0 %v1129_v25  ;;  %786 = vmatprep.subr.bf16.mxu1 %v1131_v26  ;;  %832 = vst.msk [vmem:[%s1569_s4] sm:$0xff] (!%p1060_p10), %vm829_vm0, %v1216_v10  ;;  %833 = vst.msk [vmem:[%s1569_s4 + $0x8] sm:$0xff] (!%p1060_p10), %vm829_vm0, %v1216_v10 }
  0x55   : > { %744 = vmatpush1.bf16.msra.mxu0 %v1133_v27  ;;  %787 = vmatpush1.bf16.msra.mxu1 %v1134_v28 }
  0x56   : > { %745 = vmatprep.subr.bf16.mxu0 %v1135_v29  ;;  %788 = vmatprep.subr.bf16.mxu1 %v1137_v30 }
  0x59   : > { %746 = vmatpush1.bf16.msra.mxu0 %v1139_v31  ;;  %789 = vmatpush1.bf16.msra.mxu1 %v1140_v32 }
  0x5a   : > { %747 = vmatprep.subr.bf16.mxu0 %v1141_v33  ;;  %790 = vmatprep.subr.bf16.mxu1 %v1143_v34 }
  0x5d   : > { %748 = vmatpush1.bf16.msra.mxu0 %v1145_v35  ;;  %791 = vmatpush1.bf16.msra.mxu1 %v1146_v36 }
  0x5e   : > { %749 = vmatprep.subr.bf16.mxu0 %v1147_v37  ;;  %792 = vmatprep.subr.bf16.mxu1 %v1149_v38 }
  0x61   : > { %750 = vmatpush1.bf16.msra.mxu0 %v1151_v39  ;;  %793 = vmatpush1.bf16.msra.mxu1 %v1152_v40 }
  0x62   : > { %751 = vmatprep.subr.bf16.mxu0 %v1153_v41  ;;  %794 = vmatprep.subr.bf16.mxu1 %v1155_v42 }
  0x65   : > { %752 = vmatpush1.bf16.msra.mxu0 %v1157_v43  ;;  %795 = vmatpush1.bf16.msra.mxu1 %v1158_v44 }
  0x66   : > { %753 = vmatprep.subr.bf16.mxu0 %v1159_v45  ;;  %796 = vmatprep.subr.bf16.mxu1 %v1161_v46 }
  0x69   : > { %754 = vmatpush1.bf16.msra.mxu0 %v1163_v47  ;;  %797 = vmatpush1.bf16.msra.mxu1 %v1164_v48 }
  0x6a   : > { %755 = vmatprep.subr.bf16.mxu0 %v1165_v49  ;;  %798 = vmatprep.subr.bf16.mxu1 %v1167_v50 }
  0x6d   : > { %756 = vmatpush1.bf16.msra.mxu0 %v1169_v51  ;;  %799 = vmatpush1.bf16.msra.mxu1 %v1170_v52 }
  0x6e   : > { %757 = vmatprep.subr.bf16.mxu0 %v1171_v53  ;;  %800 = vmatprep.subr.bf16.mxu1 %v1173_v54 }
  0x71   : > { %758 = vmatpush1.bf16.msra.mxu0 %v1175_v55  ;;  %801 = vmatpush1.bf16.msra.mxu1 %v1176_v56 }
  0x72   : > { %759 = vmatprep.subr.bf16.mxu0 %v1177_v57  ;;  %802 = vmatprep.subr.bf16.mxu1 %v1179_v58 }
  0x75   : > { %760 = vmatpush1.bf16.msra.mxu0 %v1181_v59  ;;  %803 = vmatpush1.bf16.msra.mxu1 %v1182_v60 }
  0x76   : > { %761 = vmatprep.subr.bf16.mxu0 %v1183_v61  ;;  %804 = vmatprep.subr.bf16.mxu1 %v1185_v62 }
  0x79   : > { %762 = vmatpush1.bf16.msra.mxu0 %v1187_v63  ;;  %805 = vmatpush1.bf16.msra.mxu1 %v1188_v0 }
  0x7c   : > { %764 = vmatmul.mubr.bf16.vlgmr.msra.gmra.mrb[0].mxu0 %v1189_v1  ;;  %807 = vmatmul.mubr.bf16.vlgmr.msra.gmra.mrb[0].mxu1 %v1189_v1 }
 0x14d   : > { %828 = sbr.rel (%p1060_p10) target bundleno = 340 (0x154), region = 55 }
 0x14f   : > { %v765_v2 = vpop.f32.mrb[0].mxu0  ;;  %v808_v3 = vpop.f32.mrb[0].mxu1 }
 0x150   : > { %817 = vst [vmem:[%s1494_s13] sm:$0xff] %v765_v2  ;;  %819 = vst [vmem:[%s1494_s13 + $0x10] sm:$0xff] %v808_v3  ;;  %v767_v4 = vpop.f32.mrb[1].mxu0  ;;  %v810_v5 = vpop.f32.mrb[1].mxu1 }
 0x151   : > { %818 = vst [vmem:[%s1494_s13 + $0x8] sm:$0xff] %v767_v4  ;;  %820 = vst [vmem:[%s1494_s13 + $0x18] sm:$0xff] %v810_v5  ;;  %v769_v6 = vpop.f32.mrb[2].mxu0  ;;  %v812_v7 = vpop.f32.mrb[2].mxu1 }
 0x152   : > { %821 = vst [vmem:[%s1494_s13 + $0x20] sm:$0xff] %v769_v6  ;;  %823 = vst [vmem:[%s1494_s13 + $0x30] sm:$0xff] %v812_v7  ;;  %v771_v8 = vpop.f32.mrb[3].mxu0  ;;  %v814_v9 = vpop.f32.mrb[3].mxu1 }
 0x153   : > { %822 = vst [vmem:[%s1494_s13 + $0x28] sm:$0xff] %v771_v8  ;;  %824 = vst [vmem:[%s1494_s13 + $0x38] sm:$0xff] %v814_v9 }
 0x154 PF: > { %v853_v11 = vmul.f32 %v765_v2, %v765_v2  ;;  %v854_v12 = vmul.f32 %v767_v4, %v767_v4  ;;  %v855_v13 = vmul.f32 %v808_v3, %v808_v3  ;;  %v836_v14 = vadd.f32 %v767_v4, %v765_v2  ;;  %v834_v31 = vld [vmem:[%s1568_s3] sm:$0xff]  ;;  %v835_v37 = vld [vmem:[%s1568_s3 + $0x8] sm:$0xff]  ;;  %s1067_s21 = sshll.u32 (%p1273_p5), %s1258_s18, 5 }
 0x155   : > { %v857_v15 = vmul.f32 %v769_v6, %v769_v6  ;;  %v858_v16 = vmul.f32 %v771_v8, %v771_v8  ;;  %v859_v17 = vmul.f32 %v812_v7, %v812_v7  ;;  %v856_v18 = vmul.f32 %v810_v5, %v810_v5  ;;  %v851_v32 = vld [vmem:[%s1569_s4] sm:$0xff]  ;;  %v852_v38 = vld [vmem:[%s1569_s4 + $0x8] sm:$0xff]  ;;  %s884_s26 = scalar_lea.vmem (%p1273_p5), %s1567_s2, %s1067_s21 }
 0x156   : > { %v861_v19 = vadd.f32 %v854_v12, %v853_v11  ;;  %v841_v20 = vadd.f32 %v771_v8, %v769_v6  ;;  %v837_v21 = vadd.f32 %v836_v14, %v808_v3  ;;  %v860_v24 = vmul.f32 %v814_v9, %v814_v9 }
 0x157   : > { %v866_v22 = vadd.f32 %v858_v16, %v857_v15  ;;  %vm848_vm1 = vcmask 7168   ;;  %v897_v43 = vld [vmem:[%s1494_s13] sm:$0xff] (%p1273_p5)  ;;  %v901_v45 = vld [vmem:[%s1494_s13 + $0x10] sm:$0xff] (%p1273_p5) }
 0x158   : > { %v862_v23 = vadd.f32 %v861_v19, %v855_v13  ;;  %v842_v25 = vadd.f32 %v841_v20, %v812_v7  ;;  %v838_v26 = vadd.f32 %v837_v21, %v810_v5  ;;  %v899_v44 = vld [vmem:[%s1494_s13 + $0x8] sm:$0xff] (%p1273_p5)  ;;  %v903_v46 = vld [vmem:[%s1494_s13 + $0x18] sm:$0xff] (%p1273_p5)  ;;  %898 = vst [vmem:[%s884_s26] sm:$0xff] (%p1273_p5), %v897_v43  ;;  %902 = vst [vmem:[%s884_s26 + $0x10] sm:$0xff] (%p1273_p5), %v901_v45 }
 0x159   : > { %v867_v27 = vadd.f32 %v866_v22, %v859_v17  ;;  %v905_v47 = vld [vmem:[%s1494_s13 + $0x20] sm:$0xff] (%p1273_p5)  ;;  %900 = vst [vmem:[%s884_s26 + $0x8] sm:$0xff] (%p1273_p5), %v899_v44  ;;  %904 = vst [vmem:[%s884_s26 + $0x18] sm:$0xff] (%p1273_p5), %v903_v46  ;;  %v909_v49 = vld [vmem:[%s1494_s13 + $0x30] sm:$0xff] (%p1273_p5) }
 0x15a   : > { %v863_v28 = vadd.f32 %v862_v23, %v856_v18  ;;  %839 = vadd.xlane.f32.xlu0 %v838_v26  ;;  %v843_v29 = vadd.f32 %v842_v25, %v814_v9  ;;  %v907_v48 = vld [vmem:[%s1494_s13 + $0x28] sm:$0xff] (%p1273_p5)  ;;  %906 = vst [vmem:[%s884_s26 + $0x80] sm:$0xff] (%p1273_p5), %v905_v47  ;;  %v911_v50 = vld [vmem:[%s1494_s13 + $0x38] sm:$0xff] (%p1273_p5)  ;;  %910 = vst [vmem:[%s884_s26 + $0x90] sm:$0xff] (%p1273_p5), %v909_v49 }
 0x15b   : > { %v868_v30 = vadd.f32 %v867_v27, %v860_v24  ;;  %908 = vst [vmem:[%s884_s26 + $0x88] sm:$0xff] (%p1273_p5), %v907_v48  ;;  %912 = vst [vmem:[%s884_s26 + $0x98] sm:$0xff] (%p1273_p5), %v911_v50 }
 0x15c   : > { %864 = vadd.xlane.f32.xlu1 %v863_v28 }
 0x15e   : > { %844 = vadd.xlane.f32.xlu0 %v843_v29 }
 0x160   : > { %869 = vadd.xlane.f32.xlu1 %v868_v30 }
 0x1e7   : > { %v840_v33 = vpop.xlane.xlu0 %839 }
 0x1e8   : > { %v846_v35 = vadd.f32 %v840_v33, %v834_v31 }
 0x1e9   : > { %v865_v34 = vpop.xlane.xlu1 %864 }
 0x1ea   : > { %v871_v36 = vadd.f32 %v865_v34, %v851_v32  ;;  %849 = vst.msk [vmem:[%s1568_s3] sm:$0xff] %vm848_vm1, %v846_v35  ;;  %881 = sbr.rel (!%p1273_p5) target bundleno = 497 (0x1f1), region = 59 }
 0x1eb   : > { %v845_v39 = vpop.xlane.xlu0 %844 }
 0x1ec   : > { %873 = vst.msk [vmem:[%s1569_s4] sm:$0xff] %vm848_vm1, %v871_v36  ;;  %v847_v41 = vadd.f32 %v845_v39, %v835_v37 }
 0x1ed   : > { %v870_v40 = vpop.xlane.xlu1 %869 }
 0x1ee   : > { %v872_v42 = vadd.f32 %v870_v40, %v852_v38  ;;  %850 = vst.msk [vmem:[%s1568_s3 + $0x8] sm:$0xff] %vm848_vm1, %v847_v41 }
 0x1f0   : > { %874 = vst.msk [vmem:[%s1569_s4 + $0x8] sm:$0xff] %vm848_vm1, %v872_v42 }
 0x1f1 PF: > { %p12_p11 = scmp.ge.s32.totalorder %s1261_s19, 6   ;;  %s1571_s15 = smov %s1210_s16 }
 0x1f2   : > { %s1572_s16 = smov %s1271_s22  ;;  %s1573_s17 = smov %s1261_s19 }
 0x1f3   :  { %14 = sbr.rel (!%p12_p11) target bundleno = 2 (0x2), region = 129 }

// kernel: critic_forward.10
= control target key start
LH: loop header
LB: loop body
LE: loop exit
PB: predicated region body
PF: predicated region fallthrough
CT: control target
= control target key end

     0   :  { %s1354_s0 = inlined_call_operand.vmem [shape: bf16[256,512], index: 0, kind: input, shape index: {}]   ;;  %s1355_s1 = inlined_call_operand.vmem [shape: bf16[32,256], index: 1, kind: input, shape index: {}]   ;;  %s1356_s2 = inlined_call_operand.vmem [shape: f32[32,1], index: 2, kind: input, shape index: {}]   ;;  %s1357_s3 = inlined_call_operand.vmem [shape: f32[32,1], index: 3, kind: input, shape index: {}]   ;;  %s1358_s4 = inlined_call_operand.vmem [shape: f32[32,512], index: 4, kind: output, shape index: {}]  }
   0x1   :  { %v846_v0 = vld [vmem:[%s1354_s0 + $0x4] ss:$16 sps:$4 sm:$0xff]   ;;  %v848_v1 = vld [vmem:[%s1354_s0 + $0xc] ss:$16 sps:$4 sm:$0xff]   ;;  %v850_v2 = vld [vmem:[%s1354_s0] ss:$16 sps:$4 sm:$0xff]  }
   0x2   :  { %425 = vmatprep.subr.bf16.mxu0 %v846_v0  ;;  %v851_v3 = vld [vmem:[%s1354_s0 + $0x8] ss:$16 sps:$4 sm:$0xff]   ;;  %478 = vmatprep.subr.bf16.mxu1 %v848_v1  ;;  %v852_v4 = vld [vmem:[%s1354_s0 + $0x24] ss:$16 sps:$4 sm:$0xff]   ;;  %v854_v5 = vld [vmem:[%s1354_s0 + $0x2c] ss:$16 sps:$4 sm:$0xff]  }
   0x3   :  { %426 = vmatpush1.bf16.msra.mxu0 %v850_v2  ;;  %479 = vmatpush1.bf16.msra.mxu1 %v851_v3  ;;  %v856_v6 = vld [vmem:[%s1354_s0 + $0x20] ss:$16 sps:$4 sm:$0xff]   ;;  %v857_v7 = vld [vmem:[%s1354_s0 + $0x28] ss:$16 sps:$4 sm:$0xff]   ;;  %v858_v8 = vld [vmem:[%s1354_s0 + $0x44] ss:$16 sps:$4 sm:$0xff]  }
   0x4   :  { %427 = vmatprep.subr.bf16.mxu0 %v852_v4  ;;  %480 = vmatprep.subr.bf16.mxu1 %v854_v5  ;;  %v860_v9 = vld [vmem:[%s1354_s0 + $0x4c] ss:$16 sps:$4 sm:$0xff]   ;;  %v862_v10 = vld [vmem:[%s1354_s0 + $0x40] ss:$16 sps:$4 sm:$0xff]   ;;  %v863_v11 = vld [vmem:[%s1354_s0 + $0x48] ss:$16 sps:$4 sm:$0xff]  }
   0x5   :  { %v864_v12 = vld [vmem:[%s1354_s0 + $0x64] ss:$16 sps:$4 sm:$0xff]   ;;  %v866_v13 = vld [vmem:[%s1354_s0 + $0x6c] ss:$16 sps:$4 sm:$0xff]   ;;  %v868_v14 = vld [vmem:[%s1354_s0 + $0x60] ss:$16 sps:$4 sm:$0xff]  }
   0x6   :  { %v869_v15 = vld [vmem:[%s1354_s0 + $0x68] ss:$16 sps:$4 sm:$0xff]   ;;  %v870_v16 = vld [vmem:[%s1354_s0 + $0x84] ss:$16 sps:$4 sm:$0xff]   ;;  %v872_v17 = vld [vmem:[%s1354_s0 + $0x8c] ss:$16 sps:$4 sm:$0xff]  }
   0x7   :  { %428 = vmatpush1.bf16.msra.mxu0 %v856_v6  ;;  %481 = vmatpush1.bf16.msra.mxu1 %v857_v7  ;;  %v874_v18 = vld [vmem:[%s1354_s0 + $0x80] ss:$16 sps:$4 sm:$0xff]   ;;  %v875_v19 = vld [vmem:[%s1354_s0 + $0x88] ss:$16 sps:$4 sm:$0xff]   ;;  %v876_v20 = vld [vmem:[%s1354_s0 + $0xa4] ss:$16 sps:$4 sm:$0xff]  }
   0x8   :  { %429 = vmatprep.subr.bf16.mxu0 %v858_v8  ;;  %482 = vmatprep.subr.bf16.mxu1 %v860_v9  ;;  %v878_v21 = vld [vmem:[%s1354_s0 + $0xac] ss:$16 sps:$4 sm:$0xff]   ;;  %v880_v22 = vld [vmem:[%s1354_s0 + $0xa0] ss:$16 sps:$4 sm:$0xff]   ;;  %v881_v23 = vld [vmem:[%s1354_s0 + $0xa8] ss:$16 sps:$4 sm:$0xff]  }
   0x9   :  { %v882_v24 = vld [vmem:[%s1354_s0 + $0xc4] ss:$16 sps:$4 sm:$0xff]   ;;  %v884_v25 = vld [vmem:[%s1354_s0 + $0xcc] ss:$16 sps:$4 sm:$0xff]   ;;  %v886_v26 = vld [vmem:[%s1354_s0 + $0xc0] ss:$16 sps:$4 sm:$0xff]  }
   0xa   :  { %v887_v27 = vld [vmem:[%s1354_s0 + $0xc8] ss:$16 sps:$4 sm:$0xff]   ;;  %v888_v28 = vld [vmem:[%s1354_s0 + $0xe4] ss:$16 sps:$4 sm:$0xff]   ;;  %v890_v29 = vld [vmem:[%s1354_s0 + $0xec] ss:$16 sps:$4 sm:$0xff]  }
   0xb   :  { %430 = vmatpush1.bf16.msra.mxu0 %v862_v10  ;;  %483 = vmatpush1.bf16.msra.mxu1 %v863_v11  ;;  %v892_v30 = vld [vmem:[%s1354_s0 + $0xe0] ss:$16 sps:$4 sm:$0xff]   ;;  %v893_v31 = vld [vmem:[%s1354_s0 + $0xe8] ss:$16 sps:$4 sm:$0xff]   ;;  %v894_v32 = vld [vmem:[%s1354_s0 + $0x104] ss:$16 sps:$4 sm:$0xff]  }
   0xc   :  { %431 = vmatprep.subr.bf16.mxu0 %v864_v12  ;;  %484 = vmatprep.subr.bf16.mxu1 %v866_v13  ;;  %v896_v33 = vld [vmem:[%s1354_s0 + $0x10c] ss:$16 sps:$4 sm:$0xff]   ;;  %v898_v34 = vld [vmem:[%s1354_s0 + $0x100] ss:$16 sps:$4 sm:$0xff]   ;;  %v899_v35 = vld [vmem:[%s1354_s0 + $0x108] ss:$16 sps:$4 sm:$0xff]  }
   0xd   :  { %v900_v36 = vld [vmem:[%s1354_s0 + $0x124] ss:$16 sps:$4 sm:$0xff]   ;;  %v902_v37 = vld [vmem:[%s1354_s0 + $0x12c] ss:$16 sps:$4 sm:$0xff]   ;;  %v904_v38 = vld [vmem:[%s1354_s0 + $0x120] ss:$16 sps:$4 sm:$0xff]  }
   0xe   :  { %v905_v39 = vld [vmem:[%s1354_s0 + $0x128] ss:$16 sps:$4 sm:$0xff]   ;;  %v906_v40 = vld [vmem:[%s1354_s0 + $0x144] ss:$16 sps:$4 sm:$0xff]   ;;  %v908_v41 = vld [vmem:[%s1354_s0 + $0x14c] ss:$16 sps:$4 sm:$0xff]  }
   0xf   :  { %432 = vmatpush1.bf16.msra.mxu0 %v868_v14  ;;  %485 = vmatpush1.bf16.msra.mxu1 %v869_v15  ;;  %v910_v42 = vld [vmem:[%s1354_s0 + $0x140] ss:$16 sps:$4 sm:$0xff]   ;;  %v911_v43 = vld [vmem:[%s1354_s0 + $0x148] ss:$16 sps:$4 sm:$0xff]   ;;  %v912_v44 = vld [vmem:[%s1354_s0 + $0x164] ss:$16 sps:$4 sm:$0xff]  }
  0x10   :  { %433 = vmatprep.subr.bf16.mxu0 %v870_v16  ;;  %486 = vmatprep.subr.bf16.mxu1 %v872_v17  ;;  %v914_v45 = vld [vmem:[%s1354_s0 + $0x16c] ss:$16 sps:$4 sm:$0xff]   ;;  %v916_v46 = vld [vmem:[%s1354_s0 + $0x160] ss:$16 sps:$4 sm:$0xff]   ;;  %v917_v48 = vld [vmem:[%s1354_s0 + $0x168] ss:$16 sps:$4 sm:$0xff]  }
  0x11   :  { %v944_v47 = vld [vmem:[%s1355_s1 + $0x4] ss:$8 sps:$4 sm:$0xff]   ;;  %v922_v51 = vld [vmem:[%s1354_s0 + $0x180] ss:$16 sps:$4 sm:$0xff]   ;;  %v923_v52 = vld [vmem:[%s1354_s0 + $0x188] ss:$16 sps:$4 sm:$0xff]  }
  0x12   :  { %v918_v49 = vld [vmem:[%s1354_s0 + $0x184] ss:$16 sps:$4 sm:$0xff]   ;;  %v920_v50 = vld [vmem:[%s1354_s0 + $0x18c] ss:$16 sps:$4 sm:$0xff]   ;;  %457 = vmatprep.mubr.bf16.mxu0 %v944_v47  ;;  %510 = vmatprep.mubr.bf16.mxu1 %v944_v47  ;;  %v928_v55 = vld [vmem:[%s1354_s0 + $0x1a0] ss:$16 sps:$4 sm:$0xff]  }
  0x13   :  { %434 = vmatpush1.bf16.msra.mxu0 %v874_v18  ;;  %487 = vmatpush1.bf16.msra.mxu1 %v875_v19  ;;  %v924_v53 = vld [vmem:[%s1354_s0 + $0x1a4] ss:$16 sps:$4 sm:$0xff]   ;;  %v926_v54 = vld [vmem:[%s1354_s0 + $0x1ac] ss:$16 sps:$4 sm:$0xff]   ;;  %v929_v56 = vld [vmem:[%s1354_s0 + $0x1a8] ss:$16 sps:$4 sm:$0xff]  }
  0x14   :  { %435 = vmatprep.subr.bf16.mxu0 %v876_v20  ;;  %488 = vmatprep.subr.bf16.mxu1 %v878_v21  ;;  %v930_v57 = vld [vmem:[%s1354_s0 + $0x1c4] ss:$16 sps:$4 sm:$0xff]   ;;  %v932_v58 = vld [vmem:[%s1354_s0 + $0x1cc] ss:$16 sps:$4 sm:$0xff]   ;;  %v934_v59 = vld [vmem:[%s1354_s0 + $0x1c0] ss:$16 sps:$4 sm:$0xff]  }
  0x15   :  { %v935_v60 = vld [vmem:[%s1354_s0 + $0x1c8] ss:$16 sps:$4 sm:$0xff]   ;;  %v936_v61 = vld [vmem:[%s1354_s0 + $0x1e4] ss:$16 sps:$4 sm:$0xff]   ;;  %v938_v62 = vld [vmem:[%s1354_s0 + $0x1ec] ss:$16 sps:$4 sm:$0xff]  }
  0x16   :  { %v940_v63 = vld [vmem:[%s1354_s0 + $0x1e0] ss:$16 sps:$4 sm:$0xff]   ;;  %v941_v0 = vld [vmem:[%s1354_s0 + $0x1e8] ss:$16 sps:$4 sm:$0xff]   ;;  %v945_v2 = vld [vmem:[%s1355_s1 + $0x14] ss:$8 sps:$4 sm:$0xff]  }
  0x17   :  { %436 = vmatpush1.bf16.msra.mxu0 %v880_v22  ;;  %489 = vmatpush1.bf16.msra.mxu1 %v881_v23  ;;  %v942_v1 = vld [vmem:[%s1355_s1] ss:$8 sps:$4 sm:$0xff]   ;;  %v947_v3 = vld [vmem:[%s1355_s1 + $0x10] ss:$8 sps:$4 sm:$0xff]  }
  0x18   :  { %437 = vmatprep.subr.bf16.mxu0 %v882_v24  ;;  %490 = vmatprep.subr.bf16.mxu1 %v884_v25 }
  0x1b   :  { %438 = vmatpush1.bf16.msra.mxu0 %v886_v26  ;;  %491 = vmatpush1.bf16.msra.mxu1 %v887_v27 }
  0x1c   :  { %439 = vmatprep.subr.bf16.mxu0 %v888_v28  ;;  %492 = vmatprep.subr.bf16.mxu1 %v890_v29 }
  0x1f   :  { %440 = vmatpush1.bf16.msra.mxu0 %v892_v30  ;;  %493 = vmatpush1.bf16.msra.mxu1 %v893_v31 }
  0x20   :  { %441 = vmatprep.subr.bf16.mxu0 %v894_v32  ;;  %494 = vmatprep.subr.bf16.mxu1 %v896_v33 }
  0x23   :  { %442 = vmatpush1.bf16.msra.mxu0 %v898_v34  ;;  %495 = vmatpush1.bf16.msra.mxu1 %v899_v35 }
  0x24   :  { %443 = vmatprep.subr.bf16.mxu0 %v900_v36  ;;  %496 = vmatprep.subr.bf16.mxu1 %v902_v37 }
  0x27   :  { %444 = vmatpush1.bf16.msra.mxu0 %v904_v38  ;;  %497 = vmatpush1.bf16.msra.mxu1 %v905_v39 }
  0x28   :  { %445 = vmatprep.subr.bf16.mxu0 %v906_v40  ;;  %498 = vmatprep.subr.bf16.mxu1 %v908_v41 }
  0x2b   :  { %446 = vmatpush1.bf16.msra.mxu0 %v910_v42  ;;  %499 = vmatpush1.bf16.msra.mxu1 %v911_v43 }
  0x2c   :  { %447 = vmatprep.subr.bf16.mxu0 %v912_v44  ;;  %500 = vmatprep.subr.bf16.mxu1 %v914_v45 }
  0x2f   :  { %448 = vmatpush1.bf16.msra.mxu0 %v916_v46  ;;  %501 = vmatpush1.bf16.msra.mxu1 %v917_v48 }
  0x30   :  { %449 = vmatprep.subr.bf16.mxu0 %v918_v49  ;;  %502 = vmatprep.subr.bf16.mxu1 %v920_v50 }
  0x33   :  { %450 = vmatpush1.bf16.msra.mxu0 %v922_v51  ;;  %503 = vmatpush1.bf16.msra.mxu1 %v923_v52 }
  0x34   :  { %451 = vmatprep.subr.bf16.mxu0 %v924_v53  ;;  %504 = vmatprep.subr.bf16.mxu1 %v926_v54 }
  0x37   :  { %452 = vmatpush1.bf16.msra.mxu0 %v928_v55  ;;  %505 = vmatpush1.bf16.msra.mxu1 %v929_v56 }
  0x38   :  { %453 = vmatprep.subr.bf16.mxu0 %v930_v57  ;;  %506 = vmatprep.subr.bf16.mxu1 %v932_v58 }
  0x3b   :  { %454 = vmatpush1.bf16.msra.mxu0 %v934_v59  ;;  %507 = vmatpush1.bf16.msra.mxu1 %v935_v60  ;;  %v956_v60 = vmov 0  }
  0x3c   :  { %455 = vmatprep.subr.bf16.mxu0 %v936_v61  ;;  %508 = vmatprep.subr.bf16.mxu1 %v938_v62 }
  0x3d   :  { %845 = vset.pattern.permute.xlu1 %v956_v60  ;;  %844 = vset.pattern.permute.xlu0 %v956_v60 }
  0x3f   :  { %456 = vmatpush1.bf16.msra.mxu0 %v940_v63  ;;  %509 = vmatpush1.bf16.msra.mxu1 %v941_v0 }
  0x42   :  { %458 = vmatmul.mubr.bf16.vlgmr.msra.gmra.mrb[0].mxu0 %v942_v1  ;;  %511 = vmatmul.mubr.bf16.vlgmr.msra.gmra.mrb[0].mxu1 %v942_v1 }
  0x43   :  { %467 = vmatprep.mubr.bf16.mxu0 %v945_v2  ;;  %520 = vmatprep.mubr.bf16.mxu1 %v945_v2 }
  0x4a   :  { %468 = vmatmul.mubr.bf16.gmra.mrb[4].mxu0 %v947_v3  ;;  %521 = vmatmul.mubr.bf16.gmra.mrb[4].mxu1 %v947_v3 }
 0x115   :  { %v1186_v4 = vpop.f32.mrb[0].mxu0  ;;  %v1188_v5 = vpop.f32.mrb[0].mxu1 }
 0x116   :  { %v555_v6 = vmul.f32 %v1186_v4, %v1186_v4  ;;  %v1192_v7 = vpop.f32.mrb[1].mxu0  ;;  %v1194_v8 = vpop.f32.mrb[1].mxu1  ;;  %v557_v13 = vmul.f32 %v1188_v5, %v1188_v5 }
 0x117   :  { %v531_v9 = vadd.f32 %v1192_v7, %v1186_v4  ;;  %v556_v10 = vmul.f32 %v1192_v7, %v1192_v7  ;;  %v1200_v11 = vpop.f32.mrb[2].mxu0  ;;  %v1202_v12 = vpop.f32.mrb[2].mxu1  ;;  %v558_v25 = vmul.f32 %v1194_v8, %v1194_v8 }
 0x118   :  { %v559_v14 = vmul.f32 %v1200_v11, %v1200_v11  ;;  %v1208_v15 = vpop.f32.mrb[3].mxu0  ;;  %v1210_v16 = vpop.f32.mrb[3].mxu1  ;;  %v561_v21 = vmul.f32 %v1202_v12, %v1202_v12 }
 0x119   :  { %v536_v17 = vadd.f32 %v1208_v15, %v1200_v11  ;;  %v560_v18 = vmul.f32 %v1208_v15, %v1208_v15  ;;  %v532_v19 = vadd.f32 %v531_v9, %v1188_v5  ;;  %v571_v20 = vadd.f32 %v556_v10, %v555_v6 }
 0x11a   :  { %v562_v29 = vmul.f32 %v1210_v16, %v1210_v16 }
 0x11b   :  { %v533_v22 = vadd.f32 %v532_v19, %v1194_v8  ;;  %v576_v23 = vadd.f32 %v560_v18, %v559_v14  ;;  %v537_v24 = vadd.f32 %v536_v17, %v1202_v12  ;;  %v572_v26 = vadd.f32 %v571_v20, %v557_v13 }
 0x11d   :  { %534 = vadd.xlane.f32.xlu0 %v533_v22  ;;  %v1223_v27 = vpop.f32.mrb[4].mxu0  ;;  %v1225_v28 = vpop.f32.mrb[4].mxu1  ;;  %v577_v30 = vadd.f32 %v576_v23, %v561_v21  ;;  %v538_v31 = vadd.f32 %v537_v24, %v1210_v16  ;;  %v573_v35 = vadd.f32 %v572_v26, %v558_v25 }
 0x11e   :  { %v563_v32 = vmul.f32 %v1223_v27, %v1223_v27  ;;  %v1232_v33 = vpop.f32.mrb[5].mxu0  ;;  %v1234_v34 = vpop.f32.mrb[5].mxu1  ;;  %v565_v41 = vmul.f32 %v1225_v28, %v1225_v28 }
 0x11f   :  { %v541_v36 = vadd.f32 %v1232_v33, %v1223_v27  ;;  %v564_v37 = vmul.f32 %v1232_v33, %v1232_v33  ;;  %v578_v38 = vadd.f32 %v577_v30, %v562_v29  ;;  %v1240_v39 = vpop.f32.mrb[6].mxu0  ;;  %v1242_v40 = vpop.f32.mrb[6].mxu1  ;;  %v566_v49 = vmul.f32 %v1234_v34, %v1234_v34 }
 0x120   :  { %v567_v42 = vmul.f32 %v1240_v39, %v1240_v39  ;;  %v1248_v43 = vpop.f32.mrb[7].mxu0  ;;  %v569_v44 = vmul.f32 %v1242_v40, %v1242_v40  ;;  %v1252_v45 = vpop.f32.mrb[7].mxu1 }
 0x121   :  { %579 = vadd.xlane.f32.xlu1 %v578_v38  ;;  %539 = vadd.xlane.f32.xlu0 %v538_v31  ;;  %v546_v46 = vadd.f32 %v1248_v43, %v1240_v39  ;;  %v568_v47 = vmul.f32 %v1248_v43, %v1248_v43  ;;  %v542_v48 = vadd.f32 %v541_v36, %v1225_v28  ;;  %v608_v38 = vld [vmem:[%s1356_s2 + $0x8] sm:$0xff] }
 0x122   :  { %v581_v50 = vadd.f32 %v564_v37, %v563_v32  ;;  %v570_v53 = vmul.f32 %v1252_v45, %v1252_v45 }
 0x123   :  { %v586_v51 = vadd.f32 %v568_v47, %v567_v42  ;;  %v543_v52 = vadd.f32 %v542_v48, %v1234_v34  ;;  %v547_v54 = vadd.f32 %v546_v46, %v1242_v40  ;;  %v607_v46 = vld [vmem:[%s1356_s2] sm:$0xff] }
 0x124   :  { %v582_v55 = vadd.f32 %v581_v50, %v565_v41 }
 0x125   :  { %574 = vadd.xlane.f32.xlu0 %v573_v35  ;;  %544 = vadd.xlane.f32.xlu1 %v543_v52  ;;  %v548_v56 = vadd.f32 %v547_v54, %v1252_v45  ;;  %v587_v57 = vadd.f32 %v586_v51, %v569_v44  ;;  %v623_v51 = vld [vmem:[%s1357_s3] sm:$0xff] }
 0x126   :  { %v583_v58 = vadd.f32 %v582_v55, %v566_v49  ;;  %v624_v55 = vld [vmem:[%s1357_s3 + $0x8] sm:$0xff] }
 0x127   :  { %v588_v59 = vadd.f32 %v587_v57, %v570_v53 }
 0x129   :  { %584 = vadd.xlane.f32.xlu0 %v583_v58  ;;  %549 = vadd.xlane.f32.xlu1 %v548_v56  ;;  %v609_v58 = vld [vmem:[%s1356_s2 + $0x10] sm:$0xff] }
 0x12d   :  { %589 = vadd.xlane.f32.xlu1 %v588_v59 }
 0x1aa   :  { %v535_v61 = vpop.xlane.xlu0 %534 }
 0x1ab   :  { %v551_v0 = vmul.f32 0.001953125, %v535_v61  ;;  %v610_v61 = vld [vmem:[%s1356_s2 + $0x18] sm:$0xff] }
 0x1ad   :  { %v595_v10 = vmul.f32 %v551_v0, %v551_v0 }
 0x1ae   :  { %v580_v62 = vpop.xlane.xlu1 %579  ;;  %v540_v63 = vpop.xlane.xlu0 %539 }
 0x1af   :  { %v552_v1 = vmul.f32 0.001953125, %v540_v63  ;;  %v592_v2 = vmul.f32 0.001953125, %v580_v62 }
 0x1b1   :  { %v596_v3 = vmul.f32 %v552_v1, %v552_v1 }
 0x1b2   :  { %v575_v6 = vpop.xlane.xlu0 %574  ;;  %v545_v9 = vpop.xlane.xlu1 %544 }
 0x1b3   :  { %v600_v13 = vsub.f32 %v592_v2, %v596_v3  ;;  %v591_v14 = vmul.f32 0.001953125, %v575_v6  ;;  %v553_v17 = vmul.f32 0.001953125, %v545_v9  ;;  %v626_v3 = vld [vmem:[%s1357_s3 + $0x18] sm:$0xff] }
 0x1b5   :  { %v604_v18 = vmax.f32 %v600_v13, 0.0  ;;  %v599_v19 = vsub.f32 %v591_v14, %v595_v10  ;;  %v597_v20 = vmul.f32 %v553_v17, %v553_v17 }
 0x1b6   :  { %v585_v21 = vpop.xlane.xlu0 %584  ;;  %v550_v22 = vpop.xlane.xlu1 %549 }
 0x1b7   :  { %v612_v23 = vadd.f32 1e-05, %v604_v18  ;;  %v603_v24 = vmax.f32 %v599_v19, 0.0  ;;  %v593_v25 = vmul.f32 0.001953125, %v585_v21  ;;  %v554_v26 = vmul.f32 0.001953125, %v550_v22 }
 0x1b9   :  { %948 = vrsqrt.f32 %v612_v23  ;;  %v611_v29 = vadd.f32 1e-05, %v603_v24  ;;  %v601_v30 = vsub.f32 %v593_v25, %v597_v20  ;;  %v598_v31 = vmul.f32 %v554_v26, %v554_v26 }
 0x1ba   :  { %v590_v32 = vpop.xlane.xlu1 %589 }
 0x1bb   :  { %950 = vrsqrt.f32 %v611_v29  ;;  %v594_v35 = vmul.f32 0.001953125, %v590_v32  ;;  %v605_v36 = vmax.f32 %v601_v30, 0.0 }
 0x1bd   :  { %v602_v37 = vsub.f32 %v594_v35, %v598_v31  ;;  %v613_v41 = vadd.f32 1e-05, %v605_v36 }
 0x1bf   :  { %v606_v42 = vmax.f32 %v602_v37, 0.0  ;;  %952 = vrsqrt.f32 %v613_v41 }
 0x1c1   :  { %v614_v49 = vadd.f32 1e-05, %v606_v42 }
 0x1c3   :  { %v949_v44 = vpop.eup %948  ;;  %954 = vrsqrt.f32 %v614_v49 }
 0x1c4   :  { %v620_v47 = vmul.f32 %v949_v44, %v608_v38 }
 0x1c5   :  { %v951_v48 = vpop.eup %950 }
 0x1c6   :  { %642 = vperm.xlu1 %845, %v620_v47   ;;  %v619_v50 = vmul.f32 %v951_v48, %v607_v46  ;;  %v628_v53 = vmul.f32 %v620_v47, %v552_v1 }
 0x1c8   :  { %637 = vperm.xlu0 %844, %v619_v50   ;;  %v627_v52 = vmul.f32 %v619_v50, %v551_v0  ;;  %v632_v56 = vsub.f32 %v624_v55, %v628_v53  ;;  %v625_v0 = vld [vmem:[%s1357_s3 + $0x10] sm:$0xff] }
 0x1c9   :  { %v953_v57 = vpop.eup %952 }
 0x1ca   :  { %v631_v54 = vsub.f32 %v623_v51, %v627_v52  ;;  %v621_v59 = vmul.f32 %v953_v57, %v609_v58 }
 0x1cc   :  { %673 = vperm.xlu1 %845, %v631_v54   ;;  %v629_v63 = vmul.f32 %v621_v59, %v553_v17 }
 0x1cd   :  { %v955_v60 = vpop.eup %954 }
 0x1ce   :  { %v622_v62 = vmul.f32 %v955_v60, %v610_v61  ;;  %v633_v1 = vsub.f32 %v625_v0, %v629_v63 }
 0x1d0   :  { %678 = vperm.xlu1 %845, %v632_v56   ;;  %v630_v2 = vmul.f32 %v622_v62, %v554_v26 }
 0x1d2   :  { %v634_v6 = vsub.f32 %v626_v3, %v630_v2 }
 0x1d4   :  { %647 = vperm.xlu1 %845, %v621_v59  }
 0x1d8   :  { %652 = vperm.xlu1 %845, %v622_v62  }
 0x1dc   :  { %683 = vperm.xlu1 %845, %v633_v1  }
 0x1e0   :  { %688 = vperm.xlu1 %845, %v634_v6  }
 0x245   :  { %v643_v9 = vpop.permute.xlu1 %642 }
 0x246   :  { %v659_v24 = vmul.f32 %v643_v9, %v1200_v11  ;;  %v660_v25 = vmul.f32 %v643_v9, %v1208_v15  ;;  %v661_v26 = vmul.f32 %v643_v9, %v1202_v12 }
 0x247   :  { %v638_v10 = vpop.permute.xlu0 %637 }
 0x248   :  { %v655_v13 = vmul.f32 %v638_v10, %v1186_v4  ;;  %v656_v14 = vmul.f32 %v638_v10, %v1192_v7  ;;  %v657_v17 = vmul.f32 %v638_v10, %v1188_v5  ;;  %v658_v18 = vmul.f32 %v638_v10, %v1194_v8 }
 0x249   :  { %v662_v4 = vmul.f32 %v643_v9, %v1210_v16 }
 0x24b   :  { %v674_v19 = vpop.permute.xlu1 %673 }
 0x24c   :  { %v691_v20 = vadd.f32 %v674_v19, %v655_v13  ;;  %v692_v21 = vadd.f32 %v674_v19, %v656_v14  ;;  %v693_v22 = vadd.f32 %v674_v19, %v657_v17  ;;  %v694_v23 = vadd.f32 %v674_v19, %v658_v18 }
 0x24e   :  { %vm707_vm0 = vcmp.ge.f32.partialorder %v691_v20, 0.0  ;;  %vm708_vm1 = vcmp.ge.f32.partialorder %v692_v21, 0.0  ;;  %vm709_vm2 = vcmp.ge.f32.partialorder %v693_v22, 0.0  ;;  %vm710_vm3 = vcmp.ge.f32.partialorder %v694_v23, 0.0 }
 0x24f   :  { %v723_v5 = vmul.f32 0.2, %v691_v20  ;;  %v724_v7 = vmul.f32 0.2, %v692_v21  ;;  %v725_v8 = vmul.f32 0.2, %v693_v22  ;;  %v679_v29 = vpop.permute.xlu1 %678 }
 0x250   :  { %v726_v30 = vmul.f32 0.2, %v694_v23  ;;  %v695_v31 = vadd.f32 %v679_v29, %v659_v24  ;;  %v696_v32 = vadd.f32 %v679_v29, %v660_v25  ;;  %v697_v35 = vadd.f32 %v679_v29, %v661_v26 }
 0x251   :  { %v739_v36 = vsel %vm707_vm0, %v691_v20, %v723_v5  ;;  %v740_v11 = vsel %vm708_vm1, %v692_v21, %v724_v7  ;;  %v741_v37 = vsel %vm709_vm2, %v693_v22, %v725_v8  ;;  %v698_v15 = vadd.f32 %v679_v29, %v662_v4 }
 0x252   :  { %v742_v38 = vsel %vm710_vm3, %v694_v23, %v726_v30  ;;  %755 = vst [vmem:[%s1358_s4] sm:$0xff] %v739_v36  ;;  %756 = vst [vmem:[%s1358_s4 + $0x8] sm:$0xff] %v740_v11  ;;  %vm711_vm4 = vcmp.ge.f32.partialorder %v695_v31, 0.0  ;;  %vm712_vm5 = vcmp.ge.f32.partialorder %v696_v32, 0.0  ;;  %vm713_vm6 = vcmp.ge.f32.partialorder %v697_v35, 0.0 }
 0x253   :  { %757 = vst [vmem:[%s1358_s4 + $0x10] sm:$0xff] %v741_v37  ;;  %758 = vst [vmem:[%s1358_s4 + $0x18] sm:$0xff] %v742_v38  ;;  %vm714_vm7 = vcmp.ge.f32.partialorder %v698_v15, 0.0  ;;  %v727_v12 = vmul.f32 0.2, %v695_v31  ;;  %v648_v41 = vpop.permute.xlu1 %647 }
 0x254   :  { %v728_v16 = vmul.f32 0.2, %v696_v32  ;;  %v729_v42 = vmul.f32 0.2, %v697_v35  ;;  %v730_v44 = vmul.f32 0.2, %v698_v15  ;;  %v663_v51 = vmul.f32 %v648_v41, %v1223_v27 }
 0x255   :  { %v743_v46 = vsel %vm711_vm4, %v695_v31, %v727_v12  ;;  %v664_v52 = vmul.f32 %v648_v41, %v1232_v33  ;;  %v665_v53 = vmul.f32 %v648_v41, %v1225_v28  ;;  %v666_v54 = vmul.f32 %v648_v41, %v1234_v34 }
 0x256   :  { %v744_v47 = vsel %vm712_vm5, %v696_v32, %v728_v16  ;;  %v745_v48 = vsel %vm713_vm6, %v697_v35, %v729_v42  ;;  %v746_v49 = vsel %vm714_vm7, %v698_v15, %v730_v44  ;;  %759 = vst [vmem:[%s1358_s4 + $0x20] sm:$0xff] %v743_v46 }
 0x257   :  { %760 = vst [vmem:[%s1358_s4 + $0x28] sm:$0xff] %v744_v47  ;;  %761 = vst [vmem:[%s1358_s4 + $0x30] sm:$0xff] %v745_v48  ;;  %v653_v50 = vpop.permute.xlu1 %652 }
 0x258   :  { %762 = vst [vmem:[%s1358_s4 + $0x38] sm:$0xff] %v746_v49  ;;  %v667_v60 = vmul.f32 %v653_v50, %v1240_v39  ;;  %v668_v61 = vmul.f32 %v653_v50, %v1248_v43  ;;  %v669_v62 = vmul.f32 %v653_v50, %v1242_v40  ;;  %v670_v34 = vmul.f32 %v653_v50, %v1252_v45 }
 0x25b   :  { %v684_v55 = vpop.permute.xlu1 %683 }
 0x25c   :  { %v699_v56 = vadd.f32 %v684_v55, %v663_v51  ;;  %v700_v57 = vadd.f32 %v684_v55, %v664_v52  ;;  %v701_v58 = vadd.f32 %v684_v55, %v665_v53  ;;  %v702_v59 = vadd.f32 %v684_v55, %v666_v54 }
 0x25e   :  { %vm715_vm8 = vcmp.ge.f32.partialorder %v699_v56, 0.0  ;;  %vm716_vm9 = vcmp.ge.f32.partialorder %v700_v57, 0.0  ;;  %vm717_vm10 = vcmp.ge.f32.partialorder %v701_v58, 0.0  ;;  %vm718_vm11 = vcmp.ge.f32.partialorder %v702_v59, 0.0 }
 0x25f   :  { %v731_v27 = vmul.f32 0.2, %v699_v56  ;;  %v732_v33 = vmul.f32 0.2, %v700_v57  ;;  %v733_v28 = vmul.f32 0.2, %v701_v58  ;;  %v689_v63 = vpop.permute.xlu1 %688 }
 0x260   :  { %v734_v0 = vmul.f32 0.2, %v702_v59  ;;  %v703_v1 = vadd.f32 %v689_v63, %v667_v60  ;;  %v704_v2 = vadd.f32 %v689_v63, %v668_v61  ;;  %v705_v3 = vadd.f32 %v689_v63, %v669_v62 }
 0x261   :  { %v747_v6 = vsel %vm715_vm8, %v699_v56, %v731_v27  ;;  %v748_v39 = vsel %vm716_vm9, %v700_v57, %v732_v33  ;;  %v749_v9 = vsel %vm717_vm10, %v701_v58, %v733_v28  ;;  %v706_v43 = vadd.f32 %v689_v63, %v670_v34 }
 0x262   :  { %v750_v10 = vsel %vm718_vm11, %v702_v59, %v734_v0  ;;  %763 = vst [vmem:[%s1358_s4 + $0x40] sm:$0xff] %v747_v6  ;;  %764 = vst [vmem:[%s1358_s4 + $0x48] sm:$0xff] %v748_v39  ;;  %vm719_vm12 = vcmp.ge.f32.partialorder %v703_v1, 0.0  ;;  %vm720_vm13 = vcmp.ge.f32.partialorder %v704_v2, 0.0  ;;  %vm721_vm14 = vcmp.ge.f32.partialorder %v705_v3, 0.0 }
 0x263   :  { %765 = vst [vmem:[%s1358_s4 + $0x50] sm:$0xff] %v749_v9  ;;  %766 = vst [vmem:[%s1358_s4 + $0x58] sm:$0xff] %v750_v10  ;;  %vm722_vm15 = vcmp.ge.f32.partialorder %v706_v43, 0.0  ;;  %v735_v40 = vmul.f32 0.2, %v703_v1 }
 0x264   :  { %v736_v45 = vmul.f32 0.2, %v704_v2  ;;  %v737_v13 = vmul.f32 0.2, %v705_v3  ;;  %v738_v14 = vmul.f32 0.2, %v706_v43 }
 0x265   :  { %v751_v17 = vsel %vm719_vm12, %v703_v1, %v735_v40 }
 0x266   :  { %v752_v18 = vsel %vm720_vm13, %v704_v2, %v736_v45  ;;  %v753_v19 = vsel %vm721_vm14, %v705_v3, %v737_v13  ;;  %v754_v20 = vsel %vm722_vm15, %v706_v43, %v738_v14  ;;  %767 = vst [vmem:[%s1358_s4 + $0x60] sm:$0xff] %v751_v17 }
 0x267   :  { %768 = vst [vmem:[%s1358_s4 + $0x68] sm:$0xff] %v752_v18  ;;  %769 = vst [vmem:[%s1358_s4 + $0x70] sm:$0xff] %v753_v19 }
 0x268   :  { %770 = vst [vmem:[%s1358_s4 + $0x78] sm:$0xff] %v754_v20 }

// kernel: critic_forward.11
= control target key start
LH: loop header
LB: loop body
LE: loop exit
PB: predicated region body
PF: predicated region fallthrough
CT: control target
= control target key end

     0   :  { %s1291_s0 = inlined_call_operand.vmem [shape: bf16[512,128], index: 0, kind: input, shape index: {}]   ;;  %s1292_s1 = inlined_call_operand.vmem [shape: bf16[64,512], index: 1, kind: input, shape index: {}]   ;;  %s1293_s2 = inlined_call_operand.vmem [shape: f32[64,1], index: 2, kind: input, shape index: {}]   ;;  %s1294_s3 = inlined_call_operand.vmem [shape: f32[64,1], index: 3, kind: input, shape index: {}]   ;;  %s1295_s4 = inlined_call_operand.vmem [shape: f32[64,128], index: 4, kind: output, shape index: {}]  }
   0x1   :  { %v899_v0 = vld [vmem:[%s1291_s0 + $0x40] sm:$0xff]   ;;  %v903_v4 = vld [vmem:[%s1291_s0 + $0x48] sm:$0xff]   ;;  %v907_v8 = vld [vmem:[%s1291_s0 + $0x50] sm:$0xff]  }
   0x2   :  { %v900_v1 = vld [vmem:[%s1291_s0 + $0xc0] sm:$0xff]   ;;  %816 = vmatprep.subr.bf16.mxu0 %v899_v0  ;;  %v904_v5 = vld [vmem:[%s1291_s0 + $0xc8] sm:$0xff]   ;;  %v908_v9 = vld [vmem:[%s1291_s0 + $0xd0] sm:$0xff]  }
   0x3   :  { %v901_v2 = vld [vmem:[%s1291_s0] sm:$0xff]   ;;  %856 = vmatprep.subr.bf16.mxu1 %v900_v1  ;;  %v905_v6 = vld [vmem:[%s1291_s0 + $0x8] sm:$0xff]   ;;  %v909_v10 = vld [vmem:[%s1291_s0 + $0x10] sm:$0xff]  }
   0x4   :  { %v902_v3 = vld [vmem:[%s1291_s0 + $0x80] sm:$0xff]   ;;  %817 = vmatpush3.bf16.msra.mxu0 %v901_v2  ;;  %v906_v7 = vld [vmem:[%s1291_s0 + $0x88] sm:$0xff]   ;;  %v910_v11 = vld [vmem:[%s1291_s0 + $0x90] sm:$0xff]  }
   0x5   :  { %857 = vmatpush3.bf16.msra.mxu1 %v902_v3  ;;  %818 = vmatprep.subr.bf16.mxu0 %v903_v4  ;;  %v911_v12 = vld [vmem:[%s1291_s0 + $0x58] sm:$0xff]   ;;  %v915_v16 = vld [vmem:[%s1291_s0 + $0x60] sm:$0xff]   ;;  %v919_v20 = vld [vmem:[%s1291_s0 + $0x68] sm:$0xff]  }
   0x6   :  { %858 = vmatprep.subr.bf16.mxu1 %v904_v5  ;;  %v912_v13 = vld [vmem:[%s1291_s0 + $0xd8] sm:$0xff]   ;;  %v916_v17 = vld [vmem:[%s1291_s0 + $0xe0] sm:$0xff]   ;;  %v920_v21 = vld [vmem:[%s1291_s0 + $0xe8] sm:$0xff]  }
   0x7   :  { %v913_v14 = vld [vmem:[%s1291_s0 + $0x18] sm:$0xff]   ;;  %v917_v18 = vld [vmem:[%s1291_s0 + $0x20] sm:$0xff]   ;;  %v921_v22 = vld [vmem:[%s1291_s0 + $0x28] sm:$0xff]  }
   0x8   :  { %819 = vmatpush3.bf16.msra.mxu0 %v905_v6  ;;  %v914_v15 = vld [vmem:[%s1291_s0 + $0x98] sm:$0xff]   ;;  %v918_v19 = vld [vmem:[%s1291_s0 + $0xa0] sm:$0xff]   ;;  %v922_v23 = vld [vmem:[%s1291_s0 + $0xa8] sm:$0xff]  }
   0x9   :  { %859 = vmatpush3.bf16.msra.mxu1 %v906_v7  ;;  %820 = vmatprep.subr.bf16.mxu0 %v907_v8  ;;  %v923_v24 = vld [vmem:[%s1291_s0 + $0x70] sm:$0xff]   ;;  %v927_v28 = vld [vmem:[%s1291_s0 + $0x78] sm:$0xff]  }
   0xa   :  { %860 = vmatprep.subr.bf16.mxu1 %v908_v9  ;;  %v924_v25 = vld [vmem:[%s1291_s0 + $0xf0] sm:$0xff]   ;;  %v928_v29 = vld [vmem:[%s1291_s0 + $0xf8] sm:$0xff]  }
   0xb   :  { %v925_v26 = vld [vmem:[%s1291_s0 + $0x30] sm:$0xff]   ;;  %v929_v30 = vld [vmem:[%s1291_s0 + $0x38] sm:$0xff]  }
   0xc   :  { %821 = vmatpush3.bf16.msra.mxu0 %v909_v10  ;;  %v926_v27 = vld [vmem:[%s1291_s0 + $0xb0] sm:$0xff]   ;;  %v930_v31 = vld [vmem:[%s1291_s0 + $0xb8] sm:$0xff]  }
   0xd   :  { %861 = vmatpush3.bf16.msra.mxu1 %v910_v11  ;;  %822 = vmatprep.subr.bf16.mxu0 %v911_v12  ;;  %v931_v32 = vld [vmem:[%s1292_s1] ss:$16 sps:$4 sm:$0xff]   ;;  %v933_v33 = vld [vmem:[%s1292_s1 + $0x4] ss:$16 sps:$4 sm:$0xff]   ;;  %v934_v34 = vld [vmem:[%s1292_s1 + $0x8] ss:$16 sps:$4 sm:$0xff]  }
   0xe   :  { %862 = vmatprep.subr.bf16.mxu1 %v912_v13  ;;  %v936_v35 = vld [vmem:[%s1292_s1 + $0xc] ss:$16 sps:$4 sm:$0xff]   ;;  %402 = vmatprep.mubr.bf16.mxu0 %v933_v33  ;;  %v937_v36 = vld [vmem:[%s1292_s1 + $0x24] ss:$16 sps:$4 sm:$0xff]   ;;  %v941_v38 = vld [vmem:[%s1292_s1 + $0x20] ss:$16 sps:$4 sm:$0xff]  }
   0xf   :  { %467 = vmatprep.mubr.bf16.mxu1 %v936_v35  ;;  %v939_v37 = vld [vmem:[%s1292_s1 + $0x2c] ss:$16 sps:$4 sm:$0xff]   ;;  %v942_v39 = vld [vmem:[%s1292_s1 + $0x28] ss:$16 sps:$4 sm:$0xff]   ;;  %v943_v40 = vld [vmem:[%s1292_s1 + $0x44] ss:$16 sps:$4 sm:$0xff]  }
  0x10   :  { %823 = vmatpush3.bf16.msra.mxu0 %v913_v14  ;;  %v945_v41 = vld [vmem:[%s1292_s1 + $0x4c] ss:$16 sps:$4 sm:$0xff]   ;;  %v947_v42 = vld [vmem:[%s1292_s1 + $0x40] ss:$16 sps:$4 sm:$0xff]   ;;  %v948_v43 = vld [vmem:[%s1292_s1 + $0x48] ss:$16 sps:$4 sm:$0xff]  }
  0x11   :  { %863 = vmatpush3.bf16.msra.mxu1 %v914_v15  ;;  %824 = vmatprep.subr.bf16.mxu0 %v915_v16  ;;  %v949_v44 = vld [vmem:[%s1292_s1 + $0x64] ss:$16 sps:$4 sm:$0xff]   ;;  %v951_v45 = vld [vmem:[%s1292_s1 + $0x6c] ss:$16 sps:$4 sm:$0xff]   ;;  %v953_v46 = vld [vmem:[%s1292_s1 + $0x60] ss:$16 sps:$4 sm:$0xff]  }
  0x12   :  { %864 = vmatprep.subr.bf16.mxu1 %v916_v17  ;;  %v954_v47 = vld [vmem:[%s1292_s1 + $0x68] ss:$16 sps:$4 sm:$0xff]  }
  0x14   :  { %825 = vmatpush3.bf16.msra.mxu0 %v917_v18 }
  0x15   :  { %865 = vmatpush3.bf16.msra.mxu1 %v918_v19  ;;  %826 = vmatprep.subr.bf16.mxu0 %v919_v20 }
  0x16   :  { %866 = vmatprep.subr.bf16.mxu1 %v920_v21 }
  0x18   :  { %827 = vmatpush3.bf16.msra.mxu0 %v921_v22 }
  0x19   :  { %867 = vmatpush3.bf16.msra.mxu1 %v922_v23  ;;  %828 = vmatprep.subr.bf16.mxu0 %v923_v24 }
  0x1a   :  { %868 = vmatprep.subr.bf16.mxu1 %v924_v25 }
  0x1c   :  { %829 = vmatpush3.bf16.msra.mxu0 %v925_v26 }
  0x1d   :  { %869 = vmatpush3.bf16.msra.mxu1 %v926_v27  ;;  %830 = vmatprep.subr.bf16.mxu0 %v927_v28 }
  0x1e   :  { %870 = vmatprep.subr.bf16.mxu1 %v928_v29 }
  0x20   :  { %831 = vmatpush3.bf16.msra.mxu0 %v929_v30 }
  0x21   :  { %871 = vmatpush3.bf16.msra.mxu1 %v930_v31 }
  0x23   :  { %403 = vmatmul.mubr.bf16.vlgmr.msra.gmra.mrb[0].mxu0 %v931_v32 }
  0x24   :  { %468 = vmatmul.mubr.bf16.vlgmr.msra.gmra.mrb[0].mxu1 %v934_v34  ;;  %410 = vmatprep.mubr.bf16.mxu0 %v937_v36 }
  0x25   :  { %475 = vmatprep.mubr.bf16.mxu1 %v939_v37 }
  0x2b   :  { %411 = vmatmul.mubr.bf16.gmra.mrb[4].mxu0 %v941_v38 }
  0x2c   :  { %476 = vmatmul.mubr.bf16.gmra.mrb[4].mxu1 %v942_v39  ;;  %418 = vmatprep.mubr.bf16.mxu0 %v943_v40 }
  0x2d   :  { %483 = vmatprep.mubr.bf16.mxu1 %v945_v41 }
  0x33   :  { %419 = vmatmul.mubr.bf16.gmra.mrb[8].mxu0 %v947_v42 }
  0x34   :  { %484 = vmatmul.mubr.bf16.gmra.mrb[8].mxu1 %v948_v43  ;;  %426 = vmatprep.mubr.bf16.mxu0 %v949_v44 }
  0x35   :  { %491 = vmatprep.mubr.bf16.mxu1 %v951_v45 }
  0x3b   :  { %427 = vmatmul.mubr.bf16.gmra.mrb[12].mxu0 %v953_v46 }
  0x3c   :  { %492 = vmatmul.mubr.bf16.gmra.mrb[12].mxu1 %v954_v47 }
  0xf6   :  { %v832_v48 = vpop.f32.mrb[0].mxu0 }
  0xf7   :  { %v872_v49 = vpop.f32.mrb[0].mxu1  ;;  %v833_v50 = vpop.f32.mrb[1].mxu0 }
  0xf8   :  { %v834_v51 = vadd.f32 %v833_v50, %v832_v48  ;;  %v873_v52 = vpop.f32.mrb[1].mxu1  ;;  %v835_v53 = vpop.f32.mrb[2].mxu0  ;;  %v971_v48 = vmov 0  }
  0xf9   :  { %v874_v54 = vadd.f32 %v873_v52, %v872_v49  ;;  %v875_v55 = vpop.f32.mrb[2].mxu1  ;;  %v836_v56 = vpop.f32.mrb[3].mxu0  ;;  %898 = vset.pattern.permute.xlu1 %v971_v48  ;;  %897 = vset.pattern.permute.xlu0 %v971_v48 }
  0xfa   :  { %v837_v57 = vadd.f32 %v836_v56, %v835_v53  ;;  %v876_v58 = vpop.f32.mrb[3].mxu1 }
  0xfb   :  { %v1141_v59 = vadd.f32 %v874_v54, %v834_v51  ;;  %v877_v60 = vadd.f32 %v876_v58, %v875_v55 }
  0xfd   :  { %v1143_v61 = vadd.f32 %v877_v60, %v837_v57  ;;  %500 = vadd.xlane.f32.xlu0 %v1141_v59  ;;  %v524_v12 = vmul.f32 %v1141_v59, %v1141_v59 }
  0xfe   :  { %v838_v62 = vpop.f32.mrb[4].mxu0 }
  0xff   :  { %v878_v63 = vpop.f32.mrb[4].mxu1  ;;  %v839_v0 = vpop.f32.mrb[5].mxu0  ;;  %v525_v1 = vmul.f32 %v1143_v61, %v1143_v61 }
 0x100   :  { %v840_v2 = vadd.f32 %v839_v0, %v838_v62  ;;  %v879_v3 = vpop.f32.mrb[5].mxu1  ;;  %v841_v4 = vpop.f32.mrb[6].mxu0 }
 0x101   :  { %v880_v5 = vadd.f32 %v879_v3, %v878_v63  ;;  %534 = vadd.xlane.f32.xlu1 %v525_v1  ;;  %502 = vadd.xlane.f32.xlu0 %v1143_v61  ;;  %v881_v6 = vpop.f32.mrb[6].mxu1  ;;  %v842_v7 = vpop.f32.mrb[7].mxu0 }
 0x102   :  { %v843_v8 = vadd.f32 %v842_v7, %v841_v4  ;;  %v882_v9 = vpop.f32.mrb[7].mxu1 }
 0x103   :  { %v1149_v10 = vadd.f32 %v880_v5, %v840_v2  ;;  %v883_v11 = vadd.f32 %v882_v9, %v881_v6 }
 0x105   :  { %v1153_v13 = vadd.f32 %v883_v11, %v843_v8  ;;  %504 = vadd.xlane.f32.xlu1 %v1149_v10  ;;  %532 = vadd.xlane.f32.xlu0 %v524_v12  ;;  %v526_v14 = vmul.f32 %v1149_v10, %v1149_v10 }
 0x106   :  { %v844_v15 = vpop.f32.mrb[8].mxu0 }
 0x107   :  { %v884_v16 = vpop.f32.mrb[8].mxu1  ;;  %v845_v17 = vpop.f32.mrb[9].mxu0  ;;  %v527_v28 = vmul.f32 %v1153_v13, %v1153_v13 }
 0x108   :  { %v846_v18 = vadd.f32 %v845_v17, %v844_v15  ;;  %v885_v19 = vpop.f32.mrb[9].mxu1  ;;  %v847_v20 = vpop.f32.mrb[10].mxu0 }
 0x109   :  { %v886_v21 = vadd.f32 %v885_v19, %v884_v16  ;;  %506 = vadd.xlane.f32.xlu1 %v1153_v13  ;;  %536 = vadd.xlane.f32.xlu0 %v526_v14  ;;  %v887_v22 = vpop.f32.mrb[10].mxu1  ;;  %v848_v23 = vpop.f32.mrb[11].mxu0 }
 0x10a   :  { %v849_v24 = vadd.f32 %v848_v23, %v847_v20  ;;  %v888_v25 = vpop.f32.mrb[11].mxu1 }
 0x10b   :  { %v1159_v26 = vadd.f32 %v886_v21, %v846_v18  ;;  %v889_v27 = vadd.f32 %v888_v25, %v887_v22 }
 0x10d   :  { %v1163_v29 = vadd.f32 %v889_v27, %v849_v24  ;;  %538 = vadd.xlane.f32.xlu1 %v527_v28  ;;  %508 = vadd.xlane.f32.xlu0 %v1159_v26  ;;  %v528_v30 = vmul.f32 %v1159_v26, %v1159_v26  ;;  %v581_v28 = vld [vmem:[%s1293_s2 + $0x8] sm:$0xff] }
 0x10e   :  { %v850_v31 = vpop.f32.mrb[12].mxu0 }
 0x10f   :  { %v890_v32 = vpop.f32.mrb[12].mxu1  ;;  %v851_v33 = vpop.f32.mrb[13].mxu0  ;;  %v529_v40 = vmul.f32 %v1163_v29, %v1163_v29 }
 0x110   :  { %v852_v34 = vadd.f32 %v851_v33, %v850_v31  ;;  %v891_v35 = vpop.f32.mrb[13].mxu1  ;;  %v853_v36 = vpop.f32.mrb[14].mxu0 }
 0x111   :  { %v892_v37 = vadd.f32 %v891_v35, %v890_v32  ;;  %510 = vadd.xlane.f32.xlu1 %v1163_v29  ;;  %540 = vadd.xlane.f32.xlu0 %v528_v30  ;;  %v893_v38 = vpop.f32.mrb[14].mxu1  ;;  %v854_v39 = vpop.f32.mrb[15].mxu0 }
 0x112   :  { %v855_v41 = vadd.f32 %v854_v39, %v853_v36  ;;  %v894_v42 = vpop.f32.mrb[15].mxu1 }
 0x113   :  { %v1171_v43 = vadd.f32 %v892_v37, %v852_v34  ;;  %v895_v44 = vadd.f32 %v894_v42, %v893_v38  ;;  %v580_v37 = vld [vmem:[%s1293_s2] sm:$0xff] }
 0x115   :  { %v1173_v45 = vadd.f32 %v895_v44, %v855_v41  ;;  %542 = vadd.xlane.f32.xlu1 %v529_v40  ;;  %512 = vadd.xlane.f32.xlu0 %v1171_v43  ;;  %v530_v46 = vmul.f32 %v1171_v43, %v1171_v43 }
 0x117   :  { %v531_v47 = vmul.f32 %v1173_v45, %v1173_v45 }
 0x119   :  { %514 = vadd.xlane.f32.xlu1 %v1173_v45  ;;  %544 = vadd.xlane.f32.xlu0 %v530_v46 }
 0x11d   :  { %546 = vadd.xlane.f32.xlu1 %v531_v47 }
 0x18a   :  { %v501_v49 = vpop.xlane.xlu0 %500 }
 0x18b   :  { %v1181_v52 = vmul.f32 0.0078125, %v501_v49 }
 0x18d   :  { %v556_v58 = vmul.f32 %v1181_v52, %v1181_v52 }
 0x18e   :  { %v535_v50 = vpop.xlane.xlu1 %534  ;;  %v503_v51 = vpop.xlane.xlu0 %502 }
 0x18f   :  { %v517_v53 = vmul.f32 0.0078125, %v503_v51  ;;  %v549_v54 = vmul.f32 0.0078125, %v535_v50  ;;  %v613_v51 = vld [vmem:[%s1294_s3 + $0x8] sm:$0xff] }
 0x191   :  { %v557_v55 = vmul.f32 %v517_v53, %v517_v53 }
 0x192   :  { %v505_v56 = vpop.xlane.xlu1 %504  ;;  %v533_v57 = vpop.xlane.xlu0 %532 }
 0x193   :  { %v565_v60 = vsub.f32 %v549_v54, %v557_v55  ;;  %v1185_v62 = vmul.f32 0.0078125, %v505_v56  ;;  %v548_v63 = vmul.f32 0.0078125, %v533_v57  ;;  %v612_v54 = vld [vmem:[%s1294_s3] sm:$0xff] }
 0x195   :  { %v573_v0 = vmax.f32 %v565_v60, 0.0  ;;  %v558_v1 = vmul.f32 %v1185_v62, %v1185_v62  ;;  %v564_v2 = vsub.f32 %v548_v63, %v556_v58 }
 0x196   :  { %v507_v3 = vpop.xlane.xlu1 %506  ;;  %v537_v4 = vpop.xlane.xlu0 %536 }
 0x197   :  { %v589_v5 = vadd.f32 1e-05, %v573_v0  ;;  %v572_v6 = vmax.f32 %v564_v2, 0.0  ;;  %v1189_v7 = vmul.f32 0.0078125, %v507_v3  ;;  %v550_v8 = vmul.f32 0.0078125, %v537_v4  ;;  %v582_v4 = vld [vmem:[%s1293_s2 + $0x10] sm:$0xff] }
 0x199   :  { %955 = vrsqrt.f32 %v589_v5  ;;  %v588_v9 = vadd.f32 1e-05, %v572_v6  ;;  %v566_v11 = vsub.f32 %v550_v8, %v558_v1  ;;  %v559_v12 = vmul.f32 %v1189_v7, %v1189_v7 }
 0x19a   :  { %v539_v14 = vpop.xlane.xlu1 %538  ;;  %v509_v15 = vpop.xlane.xlu0 %508 }
 0x19b   :  { %957 = vrsqrt.f32 %v588_v9  ;;  %v574_v16 = vmax.f32 %v566_v11, 0.0  ;;  %v551_v17 = vmul.f32 0.0078125, %v539_v14  ;;  %v1193_v18 = vmul.f32 0.0078125, %v509_v15  ;;  %v615_v14 = vld [vmem:[%s1294_s3 + $0x18] sm:$0xff] }
 0x19d   :  { %v590_v19 = vadd.f32 1e-05, %v574_v16  ;;  %v567_v20 = vsub.f32 %v551_v17, %v559_v12  ;;  %v560_v21 = vmul.f32 %v1193_v18, %v1193_v18 }
 0x19e   :  { %v511_v22 = vpop.xlane.xlu1 %510  ;;  %v541_v23 = vpop.xlane.xlu0 %540 }
 0x19f   :  { %v575_v24 = vmax.f32 %v567_v20, 0.0  ;;  %v1197_v25 = vmul.f32 0.0078125, %v511_v22  ;;  %v552_v27 = vmul.f32 0.0078125, %v541_v23  ;;  %959 = vrsqrt.f32 %v590_v19  ;;  %v585_v22 = vld [vmem:[%s1293_s2 + $0x28] sm:$0xff] }
 0x1a1   :  { %v591_v30 = vadd.f32 1e-05, %v575_v24  ;;  %v561_v31 = vmul.f32 %v1197_v25, %v1197_v25  ;;  %v568_v32 = vsub.f32 %v552_v27, %v560_v21  ;;  %v614_v21 = vld [vmem:[%s1294_s3 + $0x10] sm:$0xff] }
 0x1a2   :  { %v543_v33 = vpop.xlane.xlu1 %542  ;;  %v513_v34 = vpop.xlane.xlu0 %512 }
 0x1a3   :  { %v956_v35 = vpop.eup %955  ;;  %961 = vrsqrt.f32 %v591_v30  ;;  %v553_v36 = vmul.f32 0.0078125, %v543_v33  ;;  %v576_v39 = vmax.f32 %v568_v32, 0.0  ;;  %v1207_v42 = vmul.f32 0.0078125, %v513_v34  ;;  %v584_v30 = vld [vmem:[%s1293_s2 + $0x20] sm:$0xff]  ;;  %v587_v34 = vld [vmem:[%s1293_s2 + $0x38] sm:$0xff] }
 0x1a4   :  { %v605_v38 = vmul.f32 %v956_v35, %v581_v28 }
 0x1a5   :  { %v958_v40 = vpop.eup %957  ;;  %v569_v41 = vsub.f32 %v553_v36, %v561_v31  ;;  %v592_v55 = vadd.f32 1e-05, %v576_v39 }
 0x1a6   :  { %v621_v44 = vmul.f32 %v605_v38, %v517_v53  ;;  %v515_v46 = vpop.xlane.xlu1 %514  ;;  %643 = vperm.xlu1 %898, %v605_v38   ;;  %v545_v47 = vpop.xlane.xlu0 %544  ;;  %v604_v48 = vmul.f32 %v958_v40, %v580_v37  ;;  %v562_v53 = vmul.f32 %v1207_v42, %v1207_v42  ;;  %v619_v38 = vld [vmem:[%s1294_s3 + $0x38] sm:$0xff] }
 0x1a7   :  { %v577_v49 = vmax.f32 %v569_v41, 0.0  ;;  %v523_v50 = vmul.f32 0.0078125, %v515_v46  ;;  %v554_v60 = vmul.f32 0.0078125, %v545_v47  ;;  %v586_v46 = vld [vmem:[%s1293_s2 + $0x30] sm:$0xff] }
 0x1a8   :  { %638 = vperm.xlu0 %897, %v604_v48   ;;  %v620_v56 = vmul.f32 %v604_v48, %v1181_v52  ;;  %v629_v0 = vsub.f32 %v613_v51, %v621_v44  ;;  %v583_v52 = vld [vmem:[%s1293_s2 + $0x18] sm:$0xff]  ;;  %v618_v48 = vld [vmem:[%s1294_s3 + $0x30] sm:$0xff] }
 0x1a9   :  { %v593_v57 = vadd.f32 1e-05, %v577_v49  ;;  %v563_v58 = vmul.f32 %v523_v50, %v523_v50  ;;  %v960_v2 = vpop.eup %959  ;;  %v570_v6 = vsub.f32 %v554_v60, %v562_v53 }
 0x1aa   :  { %v547_v63 = vpop.xlane.xlu1 %546  ;;  %v628_v1 = vsub.f32 %v612_v54, %v620_v56  ;;  %v606_v9 = vmul.f32 %v960_v2, %v582_v4 }
 0x1ab   :  { %963 = vrsqrt.f32 %v593_v57  ;;  %v555_v3 = vmul.f32 0.0078125, %v547_v63  ;;  %v578_v16 = vmax.f32 %v570_v6, 0.0 }
 0x1ac   :  { %691 = vperm.xlu0 %897, %v629_v0   ;;  %686 = vperm.xlu1 %898, %v628_v1   ;;  %965 = vrsqrt.f32 %v592_v55  ;;  %v622_v20 = vmul.f32 %v606_v9, %v1185_v62  ;;  %v617_v62 = vld [vmem:[%s1294_s3 + $0x28] sm:$0xff] }
 0x1ad   :  { %v962_v5 = vpop.eup %961  ;;  %v571_v8 = vsub.f32 %v555_v3, %v563_v58  ;;  %v594_v24 = vadd.f32 1e-05, %v578_v16 }
 0x1ae   :  { %v607_v11 = vmul.f32 %v962_v5, %v583_v52  ;;  %v630_v27 = vsub.f32 %v614_v21, %v622_v20 }
 0x1af   :  { %v579_v12 = vmax.f32 %v571_v8, 0.0 }
 0x1b0   :  { %648 = vperm.xlu1 %898, %v606_v9   ;;  %v623_v15 = vmul.f32 %v607_v11, %v1189_v7 }
 0x1b1   :  { %v595_v17 = vadd.f32 1e-05, %v579_v12 }
 0x1b2   :  { %v631_v19 = vsub.f32 %v615_v14, %v623_v15 }
 0x1b3   :  { %967 = vrsqrt.f32 %v595_v17 }
 0x1b4   :  { %701 = vperm.xlu0 %897, %v631_v19   ;;  %653 = vperm.xlu1 %898, %v607_v11   ;;  %969 = vrsqrt.f32 %v594_v24 }
 0x1b5   :  { %v964_v23 = vpop.eup %963 }
 0x1b6   :  { %v609_v7 = vmul.f32 %v964_v23, %v585_v22  ;;  %v966_v28 = vpop.eup %965 }
 0x1b7   :  { %v608_v33 = vmul.f32 %v966_v28, %v584_v30 }
 0x1b8   :  { %696 = vperm.xlu1 %898, %v630_v27   ;;  %v625_v31 = vmul.f32 %v609_v7, %v1197_v25  ;;  %v616_v25 = vld [vmem:[%s1294_s3 + $0x20] sm:$0xff] }
 0x1b9   :  { %v624_v37 = vmul.f32 %v608_v33, %v1193_v18 }
 0x1ba   :  { %v633_v32 = vsub.f32 %v617_v62, %v625_v31 }
 0x1bb   :  { %v632_v41 = vsub.f32 %v616_v25, %v624_v37 }
 0x1bc   :  { %711 = vperm.xlu0 %897, %v633_v32   ;;  %658 = vperm.xlu1 %898, %v608_v33  }
 0x1bd   :  { %v968_v35 = vpop.eup %967 }
 0x1be   :  { %v611_v36 = vmul.f32 %v968_v35, %v587_v34  ;;  %v970_v44 = vpop.eup %969 }
 0x1bf   :  { %v610_v18 = vmul.f32 %v970_v44, %v586_v46 }
 0x1c0   :  { %663 = vperm.xlu1 %898, %v609_v7   ;;  %v627_v39 = vmul.f32 %v611_v36, %v523_v50 }
 0x1c1   :  { %v626_v47 = vmul.f32 %v610_v18, %v1207_v42 }
 0x1c2   :  { %v635_v40 = vsub.f32 %v619_v38, %v627_v39 }
 0x1c3   :  { %v634_v49 = vsub.f32 %v618_v48, %v626_v47 }
 0x1c4   :  { %721 = vperm.xlu0 %897, %v635_v40   ;;  %706 = vperm.xlu1 %898, %v632_v41  }
 0x1c8   :  { %668 = vperm.xlu1 %898, %v610_v18  }
 0x1cc   :  { %673 = vperm.xlu1 %898, %v611_v36  }
 0x1d0   :  { %716 = vperm.xlu1 %898, %v634_v49  }
 0x225   :  { %v644_v50 = vpop.permute.xlu1 %643 }
 0x226   :  { %v677_v54 = vmul.f32 %v644_v50, %v1143_v61 }
 0x227   :  { %v639_v51 = vpop.permute.xlu0 %638 }
 0x228   :  { %v676_v55 = vmul.f32 %v639_v51, %v1141_v59 }
 0x22b   :  { %v687_v56 = vpop.permute.xlu1 %686  ;;  %v692_v57 = vpop.permute.xlu0 %691 }
 0x22c   :  { %v724_v53 = vadd.f32 %v687_v56, %v676_v55  ;;  %v725_v58 = vadd.f32 %v692_v57, %v677_v54 }
 0x22e   :  { %vm732_vm0 = vcmp.ge.f32.partialorder %v724_v53, 0.0  ;;  %v740_v60 = vmul.f32 0.2, %v724_v53  ;;  %vm733_vm1 = vcmp.ge.f32.partialorder %v725_v58, 0.0  ;;  %v741_v42 = vmul.f32 0.2, %v725_v58 }
 0x22f   :  { %v649_v63 = vpop.permute.xlu1 %648 }
 0x230   :  { %v748_v0 = vsel %vm732_vm0, %v724_v53, %v740_v60  ;;  %v749_v1 = vsel %vm733_vm1, %v725_v58, %v741_v42  ;;  %v678_v3 = vmul.f32 %v649_v63, %v1149_v10 }
 0x231   :  { %756 = vst [vmem:[%s1295_s4] sm:$0xff] %v748_v0  ;;  %757 = vst [vmem:[%s1295_s4 + $0x8] sm:$0xff] %v749_v1 }
 0x233   :  { %v654_v59 = vpop.permute.xlu1 %653  ;;  %v702_v2 = vpop.permute.xlu0 %701 }
 0x234   :  { %v679_v61 = vmul.f32 %v654_v59, %v1153_v13 }
 0x236   :  { %v727_v4 = vadd.f32 %v702_v2, %v679_v61 }
 0x237   :  { %v697_v52 = vpop.permute.xlu1 %696 }
 0x238   :  { %vm735_vm2 = vcmp.ge.f32.partialorder %v727_v4, 0.0  ;;  %v743_v5 = vmul.f32 0.2, %v727_v4  ;;  %v726_v6 = vadd.f32 %v697_v52, %v678_v3 }
 0x23a   :  { %v751_v8 = vsel %vm735_vm2, %v727_v4, %v743_v5  ;;  %vm734_vm3 = vcmp.ge.f32.partialorder %v726_v6, 0.0  ;;  %v742_v9 = vmul.f32 0.2, %v726_v6 }
 0x23b   :  { %759 = vst [vmem:[%s1295_s4 + $0x18] sm:$0xff] %v751_v8  ;;  %v659_v11 = vpop.permute.xlu1 %658  ;;  %v712_v14 = vpop.permute.xlu0 %711 }
 0x23c   :  { %v750_v12 = vsel %vm734_vm3, %v726_v6, %v742_v9  ;;  %v680_v15 = vmul.f32 %v659_v11, %v1159_v26 }
 0x23d   :  { %758 = vst [vmem:[%s1295_s4 + $0x10] sm:$0xff] %v750_v12 }
 0x23f   :  { %v664_v13 = vpop.permute.xlu1 %663 }
 0x240   :  { %v681_v10 = vmul.f32 %v664_v13, %v1163_v29 }
 0x242   :  { %v729_v16 = vadd.f32 %v712_v14, %v681_v10 }
 0x243   :  { %v707_v17 = vpop.permute.xlu1 %706  ;;  %v722_v27 = vpop.permute.xlu0 %721 }
 0x244   :  { %vm737_vm4 = vcmp.ge.f32.partialorder %v729_v16, 0.0  ;;  %v745_v19 = vmul.f32 0.2, %v729_v16  ;;  %v728_v20 = vadd.f32 %v707_v17, %v680_v15 }
 0x246   :  { %v753_v21 = vsel %vm737_vm4, %v729_v16, %v745_v19  ;;  %vm736_vm5 = vcmp.ge.f32.partialorder %v728_v20, 0.0  ;;  %v744_v22 = vmul.f32 0.2, %v728_v20 }
 0x247   :  { %761 = vst [vmem:[%s1295_s4 + $0x28] sm:$0xff] %v753_v21  ;;  %v669_v23 = vpop.permute.xlu1 %668 }
 0x248   :  { %v752_v24 = vsel %vm736_vm5, %v728_v20, %v744_v22  ;;  %v682_v7 = vmul.f32 %v669_v23, %v1171_v43 }
 0x249   :  { %760 = vst [vmem:[%s1295_s4 + $0x20] sm:$0xff] %v752_v24 }
 0x24b   :  { %v674_v29 = vpop.permute.xlu1 %673 }
 0x24c   :  { %v683_v26 = vmul.f32 %v674_v29, %v1173_v45 }
 0x24e   :  { %v731_v28 = vadd.f32 %v722_v27, %v683_v26 }
 0x24f   :  { %v717_v62 = vpop.permute.xlu1 %716 }
 0x250   :  { %vm739_vm6 = vcmp.ge.f32.partialorder %v731_v28, 0.0  ;;  %v747_v30 = vmul.f32 0.2, %v731_v28  ;;  %v730_v31 = vadd.f32 %v717_v62, %v682_v7 }
 0x252   :  { %v755_v32 = vsel %vm739_vm6, %v731_v28, %v747_v30  ;;  %vm738_vm7 = vcmp.ge.f32.partialorder %v730_v31, 0.0  ;;  %v746_v33 = vmul.f32 0.2, %v730_v31 }
 0x253   :  { %763 = vst [vmem:[%s1295_s4 + $0x38] sm:$0xff] %v755_v32 }
 0x254   :  { %v754_v34 = vsel %vm738_vm7, %v730_v31, %v746_v33 }
 0x255   :  { %762 = vst [vmem:[%s1295_s4 + $0x30] sm:$0xff] %v754_v34 }

// kernel: critic_forward.12
= control target key start
LH: loop header
LB: loop body
LE: loop exit
PB: predicated region body
PF: predicated region fallthrough
CT: control target
= control target key end

     0   :  { %s2065_s0 = inlined_call_operand.vmem [shape: bf16[1024,128], index: 0, kind: input, shape index: {}]   ;;  %s2066_s1 = inlined_call_operand.vmem [shape: bf16[64,1024], index: 1, kind: input, shape index: {}]   ;;  %s2067_s2 = inlined_call_operand.vmem [shape: f32[64,1], index: 2, kind: input, shape index: {}]   ;;  %s2068_s3 = inlined_call_operand.vmem [shape: f32[64,1], index: 3, kind: input, shape index: {}]   ;;  %s2069_s4 = inlined_call_operand.vmem [shape: f32[64,128], index: 4, kind: output, shape index: {}]  }
   0x1   :  { %v1509_v0 = vld [vmem:[%s2065_s0 + $0x40] sm:$0xff]   ;;  %v1513_v4 = vld [vmem:[%s2065_s0 + $0x48] sm:$0xff]   ;;  %v1517_v8 = vld [vmem:[%s2065_s0 + $0x50] sm:$0xff]  }
   0x2   :  { %v1510_v1 = vld [vmem:[%s2065_s0 + $0xc0] sm:$0xff]   ;;  %1346 = vmatprep.subr.bf16.mxu0 %v1509_v0  ;;  %v1514_v5 = vld [vmem:[%s2065_s0 + $0xc8] sm:$0xff]   ;;  %v1518_v9 = vld [vmem:[%s2065_s0 + $0xd0] sm:$0xff]  }
   0x3   :  { %v1511_v2 = vld [vmem:[%s2065_s0] sm:$0xff]   ;;  %1386 = vmatprep.subr.bf16.mxu1 %v1510_v1  ;;  %v1515_v6 = vld [vmem:[%s2065_s0 + $0x8] sm:$0xff]   ;;  %v1519_v10 = vld [vmem:[%s2065_s0 + $0x10] sm:$0xff]  }
   0x4   :  { %v1512_v3 = vld [vmem:[%s2065_s0 + $0x80] sm:$0xff]   ;;  %1347 = vmatpush3.bf16.msra.mxu0 %v1511_v2  ;;  %v1516_v7 = vld [vmem:[%s2065_s0 + $0x88] sm:$0xff]   ;;  %v1520_v11 = vld [vmem:[%s2065_s0 + $0x90] sm:$0xff]  }
   0x5   :  { %1387 = vmatpush3.bf16.msra.mxu1 %v1512_v3  ;;  %1348 = vmatprep.subr.bf16.mxu0 %v1513_v4  ;;  %v1521_v12 = vld [vmem:[%s2065_s0 + $0x58] sm:$0xff]   ;;  %v1525_v16 = vld [vmem:[%s2065_s0 + $0x60] sm:$0xff]   ;;  %v1529_v20 = vld [vmem:[%s2065_s0 + $0x68] sm:$0xff]  }
   0x6   :  { %1388 = vmatprep.subr.bf16.mxu1 %v1514_v5  ;;  %v1522_v13 = vld [vmem:[%s2065_s0 + $0xd8] sm:$0xff]   ;;  %v1526_v17 = vld [vmem:[%s2065_s0 + $0xe0] sm:$0xff]   ;;  %v1530_v21 = vld [vmem:[%s2065_s0 + $0xe8] sm:$0xff]  }
   0x7   :  { %v1523_v14 = vld [vmem:[%s2065_s0 + $0x18] sm:$0xff]   ;;  %v1527_v18 = vld [vmem:[%s2065_s0 + $0x20] sm:$0xff]   ;;  %v1531_v22 = vld [vmem:[%s2065_s0 + $0x28] sm:$0xff]  }
   0x8   :  { %1349 = vmatpush3.bf16.msra.mxu0 %v1515_v6  ;;  %v1524_v15 = vld [vmem:[%s2065_s0 + $0x98] sm:$0xff]   ;;  %v1528_v19 = vld [vmem:[%s2065_s0 + $0xa0] sm:$0xff]   ;;  %v1532_v23 = vld [vmem:[%s2065_s0 + $0xa8] sm:$0xff]  }
   0x9   :  { %1389 = vmatpush3.bf16.msra.mxu1 %v1516_v7  ;;  %1350 = vmatprep.subr.bf16.mxu0 %v1517_v8  ;;  %v1533_v24 = vld [vmem:[%s2065_s0 + $0x70] sm:$0xff]   ;;  %v1537_v28 = vld [vmem:[%s2065_s0 + $0x78] sm:$0xff]   ;;  %v18_v32 = vld [vmem:[%s2066_s1] sm:$0xff] }
   0xa   :  { %1390 = vmatprep.subr.bf16.mxu1 %v1518_v9  ;;  %v1534_v25 = vld [vmem:[%s2065_s0 + $0xf0] sm:$0xff]   ;;  %v1538_v29 = vld [vmem:[%s2065_s0 + $0xf8] sm:$0xff]   ;;  %v22_v33 = vld [vmem:[%s2066_s1 + $0x20] sm:$0xff] }
   0xb   :  { %v1535_v26 = vld [vmem:[%s2065_s0 + $0x30] sm:$0xff]   ;;  %v1539_v30 = vld [vmem:[%s2065_s0 + $0x38] sm:$0xff]   ;;  %v19_v34 = vld [vmem:[%s2066_s1 + $0x8] sm:$0xff]  ;;  %v1250_v35 = vcombine.low %v18_v32, %v22_v33  ;;  %v1251_v36 = vcombine.high %v18_v32, %v22_v33 }
   0xc   :  { %1351 = vmatpush3.bf16.msra.mxu0 %v1519_v10  ;;  %v1536_v27 = vld [vmem:[%s2065_s0 + $0xb0] sm:$0xff]   ;;  %v1540_v31 = vld [vmem:[%s2065_s0 + $0xb8] sm:$0xff]   ;;  %v23_v37 = vld [vmem:[%s2066_s1 + $0x28] sm:$0xff] }
   0xd   :  { %1391 = vmatpush3.bf16.msra.mxu1 %v1520_v11  ;;  %1352 = vmatprep.subr.bf16.mxu0 %v1521_v12  ;;  %v1252_v38 = vcombine.low %v19_v34, %v23_v37  ;;  %v1253_v39 = vcombine.high %v19_v34, %v23_v37  ;;  %v1541_v40 = vld [vmem:[%s2065_s0 + $0x140] sm:$0xff]   ;;  %v1545_v44 = vld [vmem:[%s2065_s0 + $0x148] sm:$0xff]   ;;  %v1549_v56 = vld [vmem:[%s2065_s0 + $0x150] sm:$0xff]  }
   0xe   :  { %1392 = vmatprep.subr.bf16.mxu1 %v1522_v13  ;;  %754 = vmatprep.mubr.bf16.mxu0 %v1251_v36  ;;  %v1542_v41 = vld [vmem:[%s2065_s0 + $0x1c0] sm:$0xff]   ;;  %v1546_v45 = vld [vmem:[%s2065_s0 + $0x1c8] sm:$0xff]   ;;  %v1550_v57 = vld [vmem:[%s2065_s0 + $0x1d0] sm:$0xff]  }
   0xf   :  { %819 = vmatprep.mubr.bf16.mxu1 %v1253_v39  ;;  %v1543_v42 = vld [vmem:[%s2065_s0 + $0x100] sm:$0xff]   ;;  %v1547_v46 = vld [vmem:[%s2065_s0 + $0x108] sm:$0xff]   ;;  %v1551_v58 = vld [vmem:[%s2065_s0 + $0x110] sm:$0xff]  }
  0x10   :  { %1353 = vmatpush3.bf16.msra.mxu0 %v1523_v14  ;;  %v1544_v43 = vld [vmem:[%s2065_s0 + $0x180] sm:$0xff]   ;;  %v1548_v47 = vld [vmem:[%s2065_s0 + $0x188] sm:$0xff]   ;;  %v1552_v59 = vld [vmem:[%s2065_s0 + $0x190] sm:$0xff]  }
  0x11   :  { %1393 = vmatpush3.bf16.msra.mxu1 %v1524_v15  ;;  %1354 = vmatprep.subr.bf16.mxu0 %v1525_v16  ;;  %v26_v48 = vld [vmem:[%s2066_s1 + $0x40] sm:$0xff]  ;;  %v27_v51 = vld [vmem:[%s2066_s1 + $0x48] sm:$0xff]  ;;  %v1553_v60 = vld [vmem:[%s2065_s0 + $0x158] sm:$0xff]  }
  0x12   :  { %1394 = vmatprep.subr.bf16.mxu1 %v1526_v17  ;;  %v30_v49 = vld [vmem:[%s2066_s1 + $0x60] sm:$0xff]  ;;  %v31_v52 = vld [vmem:[%s2066_s1 + $0x68] sm:$0xff]  ;;  %v1554_v61 = vld [vmem:[%s2065_s0 + $0x1d8] sm:$0xff]  }
  0x13   :  { %v1259_v50 = vcombine.high %v26_v48, %v30_v49  ;;  %v1258_v53 = vcombine.low %v26_v48, %v30_v49  ;;  %v1261_v54 = vcombine.high %v27_v51, %v31_v52  ;;  %v1260_v55 = vcombine.low %v27_v51, %v31_v52  ;;  %v1555_v62 = vld [vmem:[%s2065_s0 + $0x118] sm:$0xff]   ;;  %v34_v0 = vld [vmem:[%s2066_s1 + $0x80] sm:$0xff]  ;;  %v35_v2 = vld [vmem:[%s2066_s1 + $0x88] sm:$0xff] }
  0x14   :  { %1355 = vmatpush3.bf16.msra.mxu0 %v1527_v18  ;;  %v1556_v63 = vld [vmem:[%s2065_s0 + $0x198] sm:$0xff]   ;;  %v38_v1 = vld [vmem:[%s2066_s1 + $0xa0] sm:$0xff]  ;;  %v39_v3 = vld [vmem:[%s2066_s1 + $0xa8] sm:$0xff] }
  0x15   :  { %1395 = vmatpush3.bf16.msra.mxu1 %v1528_v19  ;;  %1356 = vmatprep.subr.bf16.mxu0 %v1529_v20  ;;  %v1267_v4 = vcombine.high %v34_v0, %v38_v1  ;;  %v1269_v5 = vcombine.high %v35_v2, %v39_v3  ;;  %v1266_v6 = vcombine.low %v34_v0, %v38_v1  ;;  %v1557_v8 = vld [vmem:[%s2065_s0 + $0x160] sm:$0xff]   ;;  %v1561_v12 = vld [vmem:[%s2065_s0 + $0x168] sm:$0xff]   ;;  %v20_v32 = vld [vmem:[%s2066_s1 + $0x10] sm:$0xff] }
  0x16   :  { %1396 = vmatprep.subr.bf16.mxu1 %v1530_v21  ;;  %v1268_v7 = vcombine.low %v35_v2, %v39_v3  ;;  %v1558_v9 = vld [vmem:[%s2065_s0 + $0x1e0] sm:$0xff]   ;;  %v1562_v13 = vld [vmem:[%s2065_s0 + $0x1e8] sm:$0xff]   ;;  %v24_v33 = vld [vmem:[%s2066_s1 + $0x30] sm:$0xff] }
  0x17   :  { %v1559_v10 = vld [vmem:[%s2065_s0 + $0x120] sm:$0xff]   ;;  %v1563_v14 = vld [vmem:[%s2065_s0 + $0x128] sm:$0xff]   ;;  %v1254_v34 = vcombine.low %v20_v32, %v24_v33  ;;  %v21_v36 = vld [vmem:[%s2066_s1 + $0x18] sm:$0xff] }
  0x18   :  { %1357 = vmatpush3.bf16.msra.mxu0 %v1531_v22  ;;  %v1560_v11 = vld [vmem:[%s2065_s0 + $0x1a0] sm:$0xff]   ;;  %v1564_v15 = vld [vmem:[%s2065_s0 + $0x1a8] sm:$0xff]   ;;  %v25_v37 = vld [vmem:[%s2066_s1 + $0x38] sm:$0xff] }
  0x19   :  { %1397 = vmatpush3.bf16.msra.mxu1 %v1532_v23  ;;  %1358 = vmatprep.subr.bf16.mxu0 %v1533_v24  ;;  %v42_v16 = vld [vmem:[%s2066_s1 + $0xc0] sm:$0xff]  ;;  %v43_v18 = vld [vmem:[%s2066_s1 + $0xc8] sm:$0xff]  ;;  %v1565_v24 = vld [vmem:[%s2065_s0 + $0x170] sm:$0xff]   ;;  %v1256_v39 = vcombine.low %v21_v36, %v25_v37 }
  0x1a   :  { %1398 = vmatprep.subr.bf16.mxu1 %v1534_v25  ;;  %v46_v17 = vld [vmem:[%s2066_s1 + $0xe0] sm:$0xff]  ;;  %v47_v20 = vld [vmem:[%s2066_s1 + $0xe8] sm:$0xff]  ;;  %v1566_v25 = vld [vmem:[%s2065_s0 + $0x1f0] sm:$0xff]  }
  0x1b   :  { %v1275_v19 = vcombine.high %v42_v16, %v46_v17  ;;  %v1274_v21 = vcombine.low %v42_v16, %v46_v17  ;;  %v1277_v22 = vcombine.high %v43_v18, %v47_v20  ;;  %v1276_v23 = vcombine.low %v43_v18, %v47_v20  ;;  %v37_v48 = vld [vmem:[%s2066_s1 + $0x98] sm:$0xff] }
  0x1c   :  { %1359 = vmatpush3.bf16.msra.mxu0 %v1535_v26  ;;  %v1567_v26 = vld [vmem:[%s2065_s0 + $0x130] sm:$0xff]   ;;  %v41_v49 = vld [vmem:[%s2066_s1 + $0xb8] sm:$0xff] }
  0x1d   :  { %1399 = vmatpush3.bf16.msra.mxu1 %v1536_v27  ;;  %1360 = vmatprep.subr.bf16.mxu0 %v1537_v28  ;;  %v1568_v27 = vld [vmem:[%s2065_s0 + $0x1b0] sm:$0xff]   ;;  %v1569_v28 = vld [vmem:[%s2065_s0 + $0x178] sm:$0xff]  }
  0x1e   :  { %1400 = vmatprep.subr.bf16.mxu1 %v1538_v29  ;;  %v1570_v29 = vld [vmem:[%s2065_s0 + $0x1f8] sm:$0xff]  }
  0x20   :  { %1361 = vmatpush3.bf16.msra.mxu0 %v1539_v30  ;;  %v1571_v30 = vld [vmem:[%s2065_s0 + $0x138] sm:$0xff]  }
  0x21   :  { %1401 = vmatpush3.bf16.msra.mxu1 %v1540_v31  ;;  %1426 = vmatprep.subr.bf16.mxu0 %v1541_v40  ;;  %v1572_v31 = vld [vmem:[%s2065_s0 + $0x1b8] sm:$0xff]   ;;  %v1257_v40 = vcombine.high %v21_v36, %v25_v37 }
  0x22   :  { %1466 = vmatprep.subr.bf16.mxu1 %v1542_v41  ;;  %v32_v41 = vld [vmem:[%s2066_s1 + $0x70] sm:$0xff] }
  0x23   :  { %755 = vmatmul.mubr.bf16.vlgmr.msra.gmra.mrb[0].mxu0 %v1250_v35  ;;  %v1255_v35 = vcombine.high %v20_v32, %v24_v33 }
  0x24   :  { %820 = vmatmul.mubr.bf16.vlgmr.msra.gmra.mrb[0].mxu1 %v1252_v38  ;;  %1427 = vmatpush3.bf16.msra.mxu0 %v1543_v42  ;;  %v28_v38 = vld [vmem:[%s2066_s1 + $0x50] sm:$0xff]  ;;  %v29_v42 = vld [vmem:[%s2066_s1 + $0x58] sm:$0xff] }
  0x25   :  { %1467 = vmatpush3.bf16.msra.mxu1 %v1544_v43  ;;  %1428 = vmatprep.subr.bf16.mxu0 %v1545_v44  ;;  %v33_v43 = vld [vmem:[%s2066_s1 + $0x78] sm:$0xff]  ;;  %v1263_v44 = vcombine.high %v28_v38, %v32_v41 }
  0x26   :  { %1468 = vmatprep.subr.bf16.mxu1 %v1546_v45  ;;  %762 = vmatprep.mubr.bf16.mxu0 %v1259_v50  ;;  %v1265_v45 = vcombine.high %v29_v42, %v33_v43  ;;  %v1262_v50 = vcombine.low %v28_v38, %v32_v41  ;;  %v1264_v51 = vcombine.low %v29_v42, %v33_v43 }
  0x27   :  { %827 = vmatprep.mubr.bf16.mxu1 %v1261_v54  ;;  %v44_v54 = vld [vmem:[%s2066_s1 + $0xd0] sm:$0xff] }
  0x28   :  { %1429 = vmatpush3.bf16.msra.mxu0 %v1547_v46  ;;  %v36_v46 = vld [vmem:[%s2066_s1 + $0x90] sm:$0xff] }
  0x29   :  { %1469 = vmatpush3.bf16.msra.mxu1 %v1548_v47  ;;  %1430 = vmatprep.subr.bf16.mxu0 %v1549_v56  ;;  %v40_v47 = vld [vmem:[%s2066_s1 + $0xb0] sm:$0xff]  ;;  %v45_v56 = vld [vmem:[%s2066_s1 + $0xd8] sm:$0xff] }
  0x2a   :  { %1470 = vmatprep.subr.bf16.mxu1 %v1550_v57  ;;  %v1271_v52 = vcombine.high %v36_v46, %v40_v47  ;;  %v49_v57 = vld [vmem:[%s2066_s1 + $0xf8] sm:$0xff] }
  0x2b   :  { %763 = vmatmul.mubr.bf16.gmra.mrb[4].mxu0 %v1258_v53  ;;  %v1273_v53 = vcombine.high %v37_v48, %v41_v49 }
  0x2c   :  { %828 = vmatmul.mubr.bf16.gmra.mrb[4].mxu1 %v1260_v55  ;;  %1431 = vmatpush3.bf16.msra.mxu0 %v1551_v58  ;;  %v48_v55 = vld [vmem:[%s2066_s1 + $0xf0] sm:$0xff]  ;;  %v1270_v58 = vcombine.low %v36_v46, %v40_v47 }
  0x2d   :  { %1471 = vmatpush3.bf16.msra.mxu1 %v1552_v59  ;;  %1432 = vmatprep.subr.bf16.mxu0 %v1553_v60  ;;  %v1272_v59 = vcombine.low %v37_v48, %v41_v49  ;;  %v1279_v60 = vcombine.high %v44_v54, %v48_v55 }
  0x2e   :  { %1472 = vmatprep.subr.bf16.mxu1 %v1554_v61  ;;  %770 = vmatprep.mubr.bf16.mxu0 %v1267_v4  ;;  %v1281_v61 = vcombine.high %v45_v56, %v49_v57 }
  0x2f   :  { %835 = vmatprep.mubr.bf16.mxu1 %v1269_v5 }
  0x30   :  { %1433 = vmatpush3.bf16.msra.mxu0 %v1555_v62  ;;  %v1278_v62 = vcombine.low %v44_v54, %v48_v55 }
  0x31   :  { %1473 = vmatpush3.bf16.msra.mxu1 %v1556_v63  ;;  %1434 = vmatprep.subr.bf16.mxu0 %v1557_v8  ;;  %v1280_v63 = vcombine.low %v45_v56, %v49_v57 }
  0x32   :  { %1474 = vmatprep.subr.bf16.mxu1 %v1558_v9 }
  0x33   :  { %771 = vmatmul.mubr.bf16.gmra.mrb[8].mxu0 %v1266_v6 }
  0x34   :  { %836 = vmatmul.mubr.bf16.gmra.mrb[8].mxu1 %v1268_v7  ;;  %1435 = vmatpush3.bf16.msra.mxu0 %v1559_v10 }
  0x35   :  { %1475 = vmatpush3.bf16.msra.mxu1 %v1560_v11  ;;  %1436 = vmatprep.subr.bf16.mxu0 %v1561_v12 }
  0x36   :  { %1476 = vmatprep.subr.bf16.mxu1 %v1562_v13  ;;  %778 = vmatprep.mubr.bf16.mxu0 %v1275_v19 }
  0x37   :  { %843 = vmatprep.mubr.bf16.mxu1 %v1277_v22 }
  0x38   :  { %1437 = vmatpush3.bf16.msra.mxu0 %v1563_v14 }
  0x39   :  { %1477 = vmatpush3.bf16.msra.mxu1 %v1564_v15  ;;  %1438 = vmatprep.subr.bf16.mxu0 %v1565_v24 }
  0x3a   :  { %1478 = vmatprep.subr.bf16.mxu1 %v1566_v25 }
  0x3b   :  { %779 = vmatmul.mubr.bf16.gmra.mrb[12].mxu0 %v1274_v21 }
  0x3c   :  { %844 = vmatmul.mubr.bf16.gmra.mrb[12].mxu1 %v1276_v23  ;;  %1439 = vmatpush3.bf16.msra.mxu0 %v1567_v26 }
  0x3d   :  { %1479 = vmatpush3.bf16.msra.mxu1 %v1568_v27  ;;  %1440 = vmatprep.subr.bf16.mxu0 %v1569_v28 }
  0x3e   :  { %1480 = vmatprep.subr.bf16.mxu1 %v1570_v29  ;;  %884 = vmatprep.mubr.bf16.mxu0 %v1255_v35 }
  0x3f   :  { %949 = vmatprep.mubr.bf16.mxu1 %v1257_v40 }
  0x40   :  { %1441 = vmatpush3.bf16.msra.mxu0 %v1571_v30 }
  0x41   :  { %1481 = vmatpush3.bf16.msra.mxu1 %v1572_v31 }
  0x43   :  { %885 = vmatmul.mubr.bf16.vlgmr.msra.gmra.mrb[16].mxu0 %v1254_v34 }
  0x44   :  { %950 = vmatmul.mubr.bf16.vlgmr.msra.gmra.mrb[16].mxu1 %v1256_v39  ;;  %892 = vmatprep.mubr.bf16.mxu0 %v1263_v44 }
  0x45   :  { %957 = vmatprep.mubr.bf16.mxu1 %v1265_v45 }
  0x4b   :  { %893 = vmatmul.mubr.bf16.gmra.mrb[20].mxu0 %v1262_v50 }
  0x4c   :  { %958 = vmatmul.mubr.bf16.gmra.mrb[20].mxu1 %v1264_v51  ;;  %900 = vmatprep.mubr.bf16.mxu0 %v1271_v52 }
  0x4d   :  { %965 = vmatprep.mubr.bf16.mxu1 %v1273_v53 }
  0x53   :  { %901 = vmatmul.mubr.bf16.gmra.mrb[24].mxu0 %v1270_v58 }
  0x54   :  { %966 = vmatmul.mubr.bf16.gmra.mrb[24].mxu1 %v1272_v59  ;;  %908 = vmatprep.mubr.bf16.mxu0 %v1279_v60 }
  0x55   :  { %973 = vmatprep.mubr.bf16.mxu1 %v1281_v61 }
  0x5b   :  { %909 = vmatmul.mubr.bf16.gmra.mrb[28].mxu0 %v1278_v62 }
  0x5c   :  { %974 = vmatmul.mubr.bf16.gmra.mrb[28].mxu1 %v1280_v63 }
  0xf6   :  { %v1362_v0 = vpop.f32.mrb[0].mxu0 }
  0xf7   :  { %v1402_v1 = vpop.f32.mrb[0].mxu1  ;;  %v1363_v2 = vpop.f32.mrb[1].mxu0 }
  0xf8   :  { %v1364_v3 = vadd.f32 %v1363_v2, %v1362_v0  ;;  %v1403_v4 = vpop.f32.mrb[1].mxu1  ;;  %v1365_v5 = vpop.f32.mrb[2].mxu0 }
  0xf9   :  { %v1404_v6 = vadd.f32 %v1403_v4, %v1402_v1  ;;  %v1405_v7 = vpop.f32.mrb[2].mxu1  ;;  %v1366_v8 = vpop.f32.mrb[3].mxu0 }
  0xfa   :  { %v1367_v9 = vadd.f32 %v1366_v8, %v1365_v5  ;;  %v1406_v10 = vpop.f32.mrb[3].mxu1 }
  0xfb   :  { %v822_v11 = vadd.f32 %v1404_v6, %v1364_v3  ;;  %v1407_v12 = vadd.f32 %v1406_v10, %v1405_v7 }
  0xfd   :  { %v825_v13 = vadd.f32 %v1407_v12, %v1367_v9 }
  0xfe   :  { %v1368_v14 = vpop.f32.mrb[4].mxu0 }
  0xff   :  { %v1408_v15 = vpop.f32.mrb[4].mxu1  ;;  %v1369_v16 = vpop.f32.mrb[5].mxu0 }
 0x100   :  { %v1370_v17 = vadd.f32 %v1369_v16, %v1368_v14  ;;  %v1409_v18 = vpop.f32.mrb[5].mxu1  ;;  %v1371_v19 = vpop.f32.mrb[6].mxu0 }
 0x101   :  { %v1410_v20 = vadd.f32 %v1409_v18, %v1408_v15  ;;  %v1411_v21 = vpop.f32.mrb[6].mxu1  ;;  %v1372_v22 = vpop.f32.mrb[7].mxu0 }
 0x102   :  { %v1373_v23 = vadd.f32 %v1372_v22, %v1371_v19  ;;  %v1412_v24 = vpop.f32.mrb[7].mxu1 }
 0x103   :  { %v830_v25 = vadd.f32 %v1410_v20, %v1370_v17  ;;  %v1413_v26 = vadd.f32 %v1412_v24, %v1411_v21 }
 0x105   :  { %v833_v27 = vadd.f32 %v1413_v26, %v1373_v23 }
 0x106   :  { %v1374_v28 = vpop.f32.mrb[8].mxu0 }
 0x107   :  { %v1414_v29 = vpop.f32.mrb[8].mxu1  ;;  %v1375_v30 = vpop.f32.mrb[9].mxu0 }
 0x108   :  { %v1415_v31 = vpop.f32.mrb[9].mxu1  ;;  %v1376_v32 = vadd.f32 %v1375_v30, %v1374_v28  ;;  %v1377_v34 = vpop.f32.mrb[10].mxu0 }
 0x109   :  { %v1416_v33 = vadd.f32 %v1415_v31, %v1414_v29  ;;  %v1417_v35 = vpop.f32.mrb[10].mxu1  ;;  %v1378_v36 = vpop.f32.mrb[11].mxu0 }
 0x10a   :  { %v1418_v37 = vpop.f32.mrb[11].mxu1  ;;  %v1379_v39 = vadd.f32 %v1378_v36, %v1377_v34 }
 0x10b   :  { %v1903_v38 = vadd.f32 %v1416_v33, %v1376_v32  ;;  %v1419_v40 = vadd.f32 %v1418_v37, %v1417_v35 }
 0x10d   :  { %v1905_v41 = vadd.f32 %v1419_v40, %v1379_v39 }
 0x10e   :  { %v1380_v42 = vpop.f32.mrb[12].mxu0 }
 0x10f   :  { %v1420_v43 = vpop.f32.mrb[12].mxu1  ;;  %v1381_v44 = vpop.f32.mrb[13].mxu0 }
 0x110   :  { %v1382_v45 = vadd.f32 %v1381_v44, %v1380_v42  ;;  %v1421_v46 = vpop.f32.mrb[13].mxu1  ;;  %v1383_v47 = vpop.f32.mrb[14].mxu0 }
 0x111   :  { %v1422_v48 = vadd.f32 %v1421_v46, %v1420_v43  ;;  %v1423_v49 = vpop.f32.mrb[14].mxu1  ;;  %v1384_v50 = vpop.f32.mrb[15].mxu0 }
 0x112   :  { %v1385_v51 = vadd.f32 %v1384_v50, %v1383_v47  ;;  %v1424_v52 = vpop.f32.mrb[15].mxu1 }
 0x113   :  { %v1907_v53 = vadd.f32 %v1422_v48, %v1382_v45  ;;  %v1425_v54 = vadd.f32 %v1424_v52, %v1423_v49 }
 0x115   :  { %v1909_v55 = vadd.f32 %v1425_v54, %v1385_v51 }
 0x116   :  { %v1442_v56 = vpop.f32.mrb[16].mxu0 }
 0x117   :  { %v1482_v57 = vpop.f32.mrb[16].mxu1  ;;  %v1443_v58 = vpop.f32.mrb[17].mxu0 }
 0x118   :  { %v1444_v59 = vadd.f32 %v1443_v58, %v1442_v56  ;;  %v1483_v60 = vpop.f32.mrb[17].mxu1  ;;  %v1445_v61 = vpop.f32.mrb[18].mxu0 }
 0x119   :  { %v1484_v62 = vadd.f32 %v1483_v60, %v1482_v57  ;;  %v1485_v63 = vpop.f32.mrb[18].mxu1  ;;  %v1446_v0 = vpop.f32.mrb[19].mxu0 }
 0x11a   :  { %v887_v1 = vadd.f32 %v1444_v59, %v822_v11  ;;  %v1447_v2 = vadd.f32 %v1446_v0, %v1445_v61  ;;  %v1486_v3 = vpop.f32.mrb[19].mxu1 }
 0x11b   :  { %v1487_v4 = vadd.f32 %v1486_v3, %v1485_v63 }
 0x11c   :  { %v1911_v5 = vadd.f32 %v1484_v62, %v887_v1  ;;  %v890_v6 = vadd.f32 %v1447_v2, %v825_v13 }
 0x11e   :  { %v1913_v7 = vadd.f32 %v1487_v4, %v890_v6  ;;  %v1448_v8 = vpop.f32.mrb[20].mxu0  ;;  %982 = vadd.xlane.f32.xlu0 %v1911_v5  ;;  %v1006_v24 = vmul.f32 %v1911_v5, %v1911_v5 }
 0x11f   :  { %v1449_v9 = vpop.f32.mrb[21].mxu0  ;;  %v1488_v10 = vpop.f32.mrb[20].mxu1 }
 0x120   :  { %v1450_v12 = vadd.f32 %v1449_v9, %v1448_v8  ;;  %v1451_v14 = vpop.f32.mrb[22].mxu0  ;;  %v1489_v15 = vpop.f32.mrb[21].mxu1  ;;  %v1007_v16 = vmul.f32 %v1913_v7, %v1913_v7 }
 0x121   :  { %v1452_v11 = vpop.f32.mrb[23].mxu0  ;;  %v1490_v17 = vadd.f32 %v1489_v15, %v1488_v10  ;;  %v1491_v18 = vpop.f32.mrb[22].mxu1 }
 0x122   :  { %v895_v19 = vadd.f32 %v1450_v12, %v830_v25  ;;  %v1453_v20 = vadd.f32 %v1452_v11, %v1451_v14  ;;  %1016 = vadd.xlane.f32.xlu1 %v1007_v16  ;;  %984 = vadd.xlane.f32.xlu0 %v1913_v7  ;;  %v1492_v13 = vpop.f32.mrb[23].mxu1 }
 0x123   :  { %v1493_v21 = vadd.f32 %v1492_v13, %v1491_v18 }
 0x124   :  { %v898_v22 = vadd.f32 %v1453_v20, %v833_v27  ;;  %v1919_v23 = vadd.f32 %v1490_v17, %v895_v19 }
 0x126   :  { %v1923_v26 = vadd.f32 %v1493_v21, %v898_v22  ;;  %v1454_v28 = vpop.f32.mrb[24].mxu0  ;;  %986 = vadd.xlane.f32.xlu1 %v1919_v23  ;;  %1014 = vadd.xlane.f32.xlu0 %v1006_v24  ;;  %v1008_v33 = vmul.f32 %v1919_v23, %v1919_v23 }
 0x127   :  { %v1455_v29 = vpop.f32.mrb[25].mxu0  ;;  %v1494_v25 = vpop.f32.mrb[24].mxu1 }
 0x128   :  { %v1456_v30 = vadd.f32 %v1455_v29, %v1454_v28  ;;  %v1457_v31 = vpop.f32.mrb[26].mxu0  ;;  %v1495_v32 = vpop.f32.mrb[25].mxu1  ;;  %v1009_v44 = vmul.f32 %v1923_v26, %v1923_v26 }
 0x129   :  { %v1458_v27 = vpop.f32.mrb[27].mxu0  ;;  %v1496_v34 = vadd.f32 %v1495_v32, %v1494_v25  ;;  %v1497_v35 = vpop.f32.mrb[26].mxu1 }
 0x12a   :  { %v903_v36 = vadd.f32 %v1456_v30, %v1903_v38  ;;  %v1459_v37 = vadd.f32 %v1458_v27, %v1457_v31  ;;  %988 = vadd.xlane.f32.xlu1 %v1923_v26  ;;  %1018 = vadd.xlane.f32.xlu0 %v1008_v33  ;;  %v1498_v39 = vpop.f32.mrb[27].mxu1 }
 0x12b   :  { %v1499_v40 = vadd.f32 %v1498_v39, %v1497_v35 }
 0x12c   :  { %v906_v42 = vadd.f32 %v1459_v37, %v1905_v41  ;;  %v1931_v43 = vadd.f32 %v1496_v34, %v903_v36 }
 0x12e   :  { %v1935_v45 = vadd.f32 %v1499_v40, %v906_v42  ;;  %v1460_v46 = vpop.f32.mrb[28].mxu0  ;;  %1020 = vadd.xlane.f32.xlu1 %v1009_v44  ;;  %990 = vadd.xlane.f32.xlu0 %v1931_v43  ;;  %v1010_v51 = vmul.f32 %v1931_v43, %v1931_v43 }
 0x12f   :  { %v1461_v38 = vpop.f32.mrb[29].mxu0  ;;  %v1500_v47 = vpop.f32.mrb[28].mxu1 }
 0x130   :  { %v1462_v48 = vadd.f32 %v1461_v38, %v1460_v46  ;;  %v1463_v49 = vpop.f32.mrb[30].mxu0  ;;  %v1501_v50 = vpop.f32.mrb[29].mxu1  ;;  %v1011_v62 = vmul.f32 %v1935_v45, %v1935_v45  ;;  %v1063_v38 = vld [vmem:[%s2067_s2 + $0x8] sm:$0xff] }
 0x131   :  { %v1464_v41 = vpop.f32.mrb[31].mxu0  ;;  %v1502_v52 = vadd.f32 %v1501_v50, %v1500_v47  ;;  %v1503_v54 = vpop.f32.mrb[30].mxu1 }
 0x132   :  { %v911_v56 = vadd.f32 %v1462_v48, %v1907_v53  ;;  %v1465_v57 = vadd.f32 %v1464_v41, %v1463_v49  ;;  %992 = vadd.xlane.f32.xlu1 %v1935_v45  ;;  %1022 = vadd.xlane.f32.xlu0 %v1010_v51  ;;  %v1504_v58 = vpop.f32.mrb[31].mxu1 }
 0x133   :  { %v1505_v59 = vadd.f32 %v1504_v58, %v1503_v54  ;;  %v1062_v54 = vld [vmem:[%s2067_s2] sm:$0xff] }
 0x134   :  { %v914_v60 = vadd.f32 %v1465_v57, %v1909_v55  ;;  %v1943_v61 = vadd.f32 %v1502_v52, %v911_v56  ;;  %v1589_v55 = vmov 0  }
 0x135   :  { %1508 = vset.pattern.permute.xlu1 %v1589_v55  ;;  %1507 = vset.pattern.permute.xlu0 %v1589_v55 }
 0x136   :  { %v1947_v63 = vadd.f32 %v1505_v59, %v914_v60  ;;  %1024 = vadd.xlane.f32.xlu1 %v1011_v62  ;;  %994 = vadd.xlane.f32.xlu0 %v1943_v61  ;;  %v1012_v53 = vmul.f32 %v1943_v61, %v1943_v61 }
 0x138   :  { %v1013_v0 = vmul.f32 %v1947_v63, %v1947_v63 }
 0x13a   :  { %996 = vadd.xlane.f32.xlu1 %v1947_v63  ;;  %1026 = vadd.xlane.f32.xlu0 %v1012_v53 }
 0x13e   :  { %1028 = vadd.xlane.f32.xlu1 %v1013_v0 }
 0x1ab   :  { %v983_v1 = vpop.xlane.xlu0 %982 }
 0x1ac   :  { %v1955_v4 = vmul.f32 0.03125, %v983_v1 }
 0x1ae   :  { %v1038_v14 = vmul.f32 %v1955_v4, %v1955_v4 }
 0x1af   :  { %v1017_v2 = vpop.xlane.xlu1 %1016  ;;  %v985_v3 = vpop.xlane.xlu0 %984 }
 0x1b0   :  { %v999_v6 = vmul.f32 0.03125, %v985_v3  ;;  %v1031_v8 = vmul.f32 0.03125, %v1017_v2  ;;  %v1095_v3 = vld [vmem:[%s2068_s3 + $0x8] sm:$0xff] }
 0x1b2   :  { %v1039_v9 = vmul.f32 %v999_v6, %v999_v6 }
 0x1b3   :  { %v987_v10 = vpop.xlane.xlu1 %986  ;;  %v1015_v12 = vpop.xlane.xlu0 %1014 }
 0x1b4   :  { %v1047_v15 = vsub.f32 %v1031_v8, %v1039_v9  ;;  %v1959_v16 = vmul.f32 0.03125, %v987_v10  ;;  %v1030_v11 = vmul.f32 0.03125, %v1015_v12  ;;  %v1094_v8 = vld [vmem:[%s2068_s3] sm:$0xff] }
 0x1b6   :  { %v1055_v17 = vmax.f32 %v1047_v15, 0.0  ;;  %v1046_v18 = vsub.f32 %v1030_v11, %v1038_v14  ;;  %v1040_v19 = vmul.f32 %v1959_v16, %v1959_v16 }
 0x1b7   :  { %v989_v20 = vpop.xlane.xlu1 %988  ;;  %v1019_v13 = vpop.xlane.xlu0 %1018 }
 0x1b8   :  { %v1071_v21 = vadd.f32 1e-05, %v1055_v17  ;;  %v1054_v22 = vmax.f32 %v1046_v18, 0.0  ;;  %v1963_v24 = vmul.f32 0.03125, %v989_v20  ;;  %v1032_v28 = vmul.f32 0.03125, %v1019_v13  ;;  %v1064_v13 = vld [vmem:[%s2067_s2 + $0x10] sm:$0xff] }
 0x1ba   :  { %1573 = vrsqrt.f32 %v1071_v21  ;;  %v1070_v29 = vadd.f32 1e-05, %v1054_v22  ;;  %v1048_v25 = vsub.f32 %v1032_v28, %v1040_v19  ;;  %v1041_v30 = vmul.f32 %v1963_v24, %v1963_v24 }
 0x1bb   :  { %v1021_v31 = vpop.xlane.xlu1 %1020  ;;  %v991_v32 = vpop.xlane.xlu0 %990 }
 0x1bc   :  { %1575 = vrsqrt.f32 %v1070_v29  ;;  %v1056_v33 = vmax.f32 %v1048_v25, 0.0  ;;  %v1033_v27 = vmul.f32 0.03125, %v1021_v31  ;;  %v1967_v34 = vmul.f32 0.03125, %v991_v32  ;;  %v1097_v31 = vld [vmem:[%s2068_s3 + $0x18] sm:$0xff] }
 0x1be   :  { %v1072_v35 = vadd.f32 1e-05, %v1056_v33  ;;  %v1049_v36 = vsub.f32 %v1033_v27, %v1041_v30  ;;  %v1042_v42 = vmul.f32 %v1967_v34, %v1967_v34 }
 0x1bf   :  { %v993_v37 = vpop.xlane.xlu1 %992  ;;  %v1023_v39 = vpop.xlane.xlu0 %1022 }
 0x1c0   :  { %v1057_v40 = vmax.f32 %v1049_v36, 0.0  ;;  %v1971_v44 = vmul.f32 0.03125, %v993_v37  ;;  %v1034_v46 = vmul.f32 0.03125, %v1023_v39  ;;  %1577 = vrsqrt.f32 %v1072_v35  ;;  %v1096_v37 = vld [vmem:[%s2068_s3 + $0x10] sm:$0xff]  ;;  %v1067_v39 = vld [vmem:[%s2067_s2 + $0x28] sm:$0xff] }
 0x1c2   :  { %v1073_v47 = vadd.f32 1e-05, %v1057_v40  ;;  %v1050_v48 = vsub.f32 %v1034_v46, %v1042_v42  ;;  %v1043_v41 = vmul.f32 %v1971_v44, %v1971_v44 }
 0x1c3   :  { %v1025_v49 = vpop.xlane.xlu1 %1024  ;;  %v995_v50 = vpop.xlane.xlu0 %994 }
 0x1c4   :  { %v1574_v51 = vpop.eup %1573  ;;  %1579 = vrsqrt.f32 %v1073_v47  ;;  %v1035_v52 = vmul.f32 0.03125, %v1025_v49  ;;  %v1058_v58 = vmax.f32 %v1050_v48, 0.0  ;;  %v1981_v1 = vmul.f32 0.03125, %v995_v50  ;;  %v1066_v47 = vld [vmem:[%s2067_s2 + $0x20] sm:$0xff] }
 0x1c5   :  { %v1087_v56 = vmul.f32 %v1574_v51, %v1063_v38  ;;  %v1069_v51 = vld [vmem:[%s2067_s2 + $0x38] sm:$0xff] }
 0x1c6   :  { %v1576_v57 = vpop.eup %1575  ;;  %v1051_v59 = vsub.f32 %v1035_v52, %v1043_v41  ;;  %v1044_v18 = vmul.f32 %v1981_v1, %v1981_v1 }
 0x1c7   :  { %v1103_v60 = vmul.f32 %v1087_v56, %v999_v6  ;;  %v997_v62 = vpop.xlane.xlu1 %996  ;;  %1125 = vperm.xlu1 %1508, %v1087_v56   ;;  %v1027_v53 = vpop.xlane.xlu0 %1026  ;;  %v1086_v0 = vmul.f32 %v1576_v57, %v1062_v54  ;;  %v1074_v6 = vadd.f32 1e-05, %v1058_v58  ;;  %v1101_v56 = vld [vmem:[%s2068_s3 + $0x38] sm:$0xff] }
 0x1c8   :  { %v1059_v55 = vmax.f32 %v1051_v59, 0.0  ;;  %v1005_v2 = vmul.f32 0.03125, %v997_v62  ;;  %v1036_v12 = vmul.f32 0.03125, %v1027_v53  ;;  %v1068_v62 = vld [vmem:[%s2067_s2 + $0x30] sm:$0xff] }
 0x1c9   :  { %1120 = vperm.xlu0 %1507, %v1086_v0   ;;  %v1102_v9 = vmul.f32 %v1086_v0, %v1955_v4  ;;  %v1111_v15 = vsub.f32 %v1095_v3, %v1103_v60  ;;  %v1065_v4 = vld [vmem:[%s2067_s2 + $0x18] sm:$0xff]  ;;  %v1100_v0 = vld [vmem:[%s2068_s3 + $0x30] sm:$0xff] }
 0x1ca   :  { %v1075_v10 = vadd.f32 1e-05, %v1059_v55  ;;  %v1578_v17 = vpop.eup %1577  ;;  %v1045_v19 = vmul.f32 %v1005_v2, %v1005_v2  ;;  %v1052_v22 = vsub.f32 %v1036_v12, %v1044_v18 }
 0x1cb   :  { %v1029_v14 = vpop.xlane.xlu1 %1028  ;;  %v1110_v11 = vsub.f32 %v1094_v8, %v1102_v9  ;;  %v1088_v29 = vmul.f32 %v1578_v17, %v1064_v13 }
 0x1cc   :  { %1581 = vrsqrt.f32 %v1075_v10  ;;  %v1037_v20 = vmul.f32 0.03125, %v1029_v14  ;;  %v1060_v33 = vmax.f32 %v1052_v22, 0.0 }
 0x1cd   :  { %1173 = vperm.xlu0 %1507, %v1111_v15   ;;  %1168 = vperm.xlu1 %1508, %v1110_v11   ;;  %1583 = vrsqrt.f32 %v1074_v6  ;;  %v1104_v36 = vmul.f32 %v1088_v29, %v1959_v16  ;;  %v1099_v16 = vld [vmem:[%s2068_s3 + $0x28] sm:$0xff] }
 0x1ce   :  { %v1580_v21 = vpop.eup %1579  ;;  %v1053_v28 = vsub.f32 %v1037_v20, %v1045_v19  ;;  %v1076_v42 = vadd.f32 1e-05, %v1060_v33 }
 0x1cf   :  { %v1089_v25 = vmul.f32 %v1580_v21, %v1065_v4  ;;  %v1112_v46 = vsub.f32 %v1096_v37, %v1104_v36 }
 0x1d0   :  { %v1061_v30 = vmax.f32 %v1053_v28, 0.0 }
 0x1d1   :  { %1130 = vperm.xlu1 %1508, %v1088_v29   ;;  %v1105_v32 = vmul.f32 %v1089_v25, %v1963_v24 }
 0x1d2   :  { %v1077_v27 = vadd.f32 1e-05, %v1061_v30 }
 0x1d3   :  { %v1113_v35 = vsub.f32 %v1097_v31, %v1105_v32 }
 0x1d4   :  { %1585 = vrsqrt.f32 %v1077_v27 }
 0x1d5   :  { %1183 = vperm.xlu0 %1507, %v1113_v35   ;;  %1135 = vperm.xlu1 %1508, %v1089_v25   ;;  %1587 = vrsqrt.f32 %v1076_v42 }
 0x1d6   :  { %v1582_v40 = vpop.eup %1581 }
 0x1d7   :  { %v1091_v24 = vmul.f32 %v1582_v40, %v1067_v39  ;;  %v1584_v38 = vpop.eup %1583 }
 0x1d8   :  { %v1090_v50 = vmul.f32 %v1584_v38, %v1066_v47 }
 0x1d9   :  { %1178 = vperm.xlu1 %1508, %v1112_v46   ;;  %v1107_v48 = vmul.f32 %v1091_v24, %v1971_v44  ;;  %v1098_v44 = vld [vmem:[%s2068_s3 + $0x20] sm:$0xff] }
 0x1da   :  { %v1106_v54 = vmul.f32 %v1090_v50, %v1967_v34 }
 0x1db   :  { %v1115_v49 = vsub.f32 %v1099_v16, %v1107_v48 }
 0x1dc   :  { %v1114_v59 = vsub.f32 %v1098_v44, %v1106_v54 }
 0x1dd   :  { %1193 = vperm.xlu0 %1507, %v1115_v49   ;;  %1140 = vperm.xlu1 %1508, %v1090_v50  }
 0x1de   :  { %v1586_v41 = vpop.eup %1585 }
 0x1df   :  { %v1093_v52 = vmul.f32 %v1586_v41, %v1069_v51  ;;  %v1588_v60 = vpop.eup %1587 }
 0x1e0   :  { %v1092_v34 = vmul.f32 %v1588_v60, %v1068_v62 }
 0x1e1   :  { %1145 = vperm.xlu1 %1508, %v1091_v24   ;;  %v1109_v57 = vmul.f32 %v1093_v52, %v1005_v2 }
 0x1e2   :  { %v1108_v53 = vmul.f32 %v1092_v34, %v1981_v1 }
 0x1e3   :  { %v1117_v58 = vsub.f32 %v1101_v56, %v1109_v57 }
 0x1e4   :  { %v1116_v55 = vsub.f32 %v1100_v0, %v1108_v53 }
 0x1e5   :  { %1203 = vperm.xlu0 %1507, %v1117_v58   ;;  %1188 = vperm.xlu1 %1508, %v1114_v59  }
 0x1e9   :  { %1150 = vperm.xlu1 %1508, %v1092_v34  }
 0x1ed   :  { %1155 = vperm.xlu1 %1508, %v1093_v52  }
 0x1f1   :  { %1198 = vperm.xlu1 %1508, %v1116_v55  }
 0x246   :  { %v1126_v2 = vpop.permute.xlu1 %1125 }
 0x247   :  { %v1159_v8 = vmul.f32 %v1126_v2, %v1913_v7 }
 0x248   :  { %v1121_v3 = vpop.permute.xlu0 %1120 }
 0x249   :  { %v1158_v9 = vmul.f32 %v1121_v3, %v1911_v5 }
 0x24c   :  { %v1169_v6 = vpop.permute.xlu1 %1168  ;;  %v1174_v10 = vpop.permute.xlu0 %1173 }
 0x24d   :  { %v1206_v12 = vadd.f32 %v1169_v6, %v1158_v9  ;;  %v1207_v14 = vadd.f32 %v1174_v10, %v1159_v8 }
 0x24f   :  { %vm1214_vm0 = vcmp.ge.f32.partialorder %v1206_v12, 0.0  ;;  %v1222_v15 = vmul.f32 0.2, %v1206_v12  ;;  %vm1215_vm1 = vcmp.ge.f32.partialorder %v1207_v14, 0.0  ;;  %v1223_v1 = vmul.f32 0.2, %v1207_v14 }
 0x250   :  { %v1131_v11 = vpop.permute.xlu1 %1130 }
 0x251   :  { %v1230_v17 = vsel %vm1214_vm0, %v1206_v12, %v1222_v15  ;;  %v1231_v18 = vsel %vm1215_vm1, %v1207_v14, %v1223_v1  ;;  %v1160_v20 = vmul.f32 %v1131_v11, %v1919_v23 }
 0x252   :  { %1238 = vst [vmem:[%s2069_s4] sm:$0xff] %v1230_v17  ;;  %1239 = vst [vmem:[%s2069_s4 + $0x8] sm:$0xff] %v1231_v18 }
 0x254   :  { %v1136_v5 = vpop.permute.xlu1 %1135  ;;  %v1184_v19 = vpop.permute.xlu0 %1183 }
 0x255   :  { %v1161_v7 = vmul.f32 %v1136_v5, %v1923_v26 }
 0x257   :  { %v1209_v13 = vadd.f32 %v1184_v19, %v1161_v7 }
 0x258   :  { %v1179_v4 = vpop.permute.xlu1 %1178 }
 0x259   :  { %vm1217_vm2 = vcmp.ge.f32.partialorder %v1209_v13, 0.0  ;;  %v1225_v21 = vmul.f32 0.2, %v1209_v13  ;;  %v1208_v22 = vadd.f32 %v1179_v4, %v1160_v20 }
 0x25b   :  { %v1233_v28 = vsel %vm1217_vm2, %v1209_v13, %v1225_v21  ;;  %vm1216_vm3 = vcmp.ge.f32.partialorder %v1208_v22, 0.0  ;;  %v1224_v29 = vmul.f32 0.2, %v1208_v22 }
 0x25c   :  { %1241 = vst [vmem:[%s2069_s4 + $0x18] sm:$0xff] %v1233_v28  ;;  %v1141_v25 = vpop.permute.xlu1 %1140  ;;  %v1194_v31 = vpop.permute.xlu0 %1193 }
 0x25d   :  { %v1232_v30 = vsel %vm1216_vm3, %v1208_v22, %v1224_v29  ;;  %v1162_v32 = vmul.f32 %v1141_v25, %v1931_v43 }
 0x25e   :  { %1240 = vst [vmem:[%s2069_s4 + $0x10] sm:$0xff] %v1232_v30 }
 0x260   :  { %v1146_v26 = vpop.permute.xlu1 %1145 }
 0x261   :  { %v1163_v23 = vmul.f32 %v1146_v26, %v1935_v45 }
 0x263   :  { %v1211_v33 = vadd.f32 %v1194_v31, %v1163_v23 }
 0x264   :  { %v1189_v27 = vpop.permute.xlu1 %1188  ;;  %v1204_v46 = vpop.permute.xlu0 %1203 }
 0x265   :  { %vm1219_vm4 = vcmp.ge.f32.partialorder %v1211_v33, 0.0  ;;  %v1227_v35 = vmul.f32 0.2, %v1211_v33  ;;  %v1210_v36 = vadd.f32 %v1189_v27, %v1162_v32 }
 0x267   :  { %v1235_v37 = vsel %vm1219_vm4, %v1211_v33, %v1227_v35  ;;  %vm1218_vm5 = vcmp.ge.f32.partialorder %v1210_v36, 0.0  ;;  %v1226_v39 = vmul.f32 0.2, %v1210_v36 }
 0x268   :  { %1243 = vst [vmem:[%s2069_s4 + $0x28] sm:$0xff] %v1235_v37  ;;  %v1151_v40 = vpop.permute.xlu1 %1150 }
 0x269   :  { %v1234_v42 = vsel %vm1218_vm5, %v1210_v36, %v1226_v39  ;;  %v1164_v24 = vmul.f32 %v1151_v40, %v1943_v61 }
 0x26a   :  { %1242 = vst [vmem:[%s2069_s4 + $0x20] sm:$0xff] %v1234_v42 }
 0x26c   :  { %v1156_v45 = vpop.permute.xlu1 %1155 }
 0x26d   :  { %v1165_v43 = vmul.f32 %v1156_v45, %v1947_v63 }
 0x26f   :  { %v1213_v38 = vadd.f32 %v1204_v46, %v1165_v43 }
 0x270   :  { %v1199_v16 = vpop.permute.xlu1 %1198 }
 0x271   :  { %vm1221_vm6 = vcmp.ge.f32.partialorder %v1213_v38, 0.0  ;;  %v1229_v47 = vmul.f32 0.2, %v1213_v38  ;;  %v1212_v48 = vadd.f32 %v1199_v16, %v1164_v24 }
 0x273   :  { %v1237_v49 = vsel %vm1221_vm6, %v1213_v38, %v1229_v47  ;;  %vm1220_vm7 = vcmp.ge.f32.partialorder %v1212_v48, 0.0  ;;  %v1228_v50 = vmul.f32 0.2, %v1212_v48 }
 0x274   :  { %1245 = vst [vmem:[%s2069_s4 + $0x38] sm:$0xff] %v1237_v49 }
 0x275   :  { %v1236_v51 = vsel %vm1220_vm7, %v1212_v48, %v1228_v50 }
 0x276   :  { %1244 = vst [vmem:[%s2069_s4 + $0x30] sm:$0xff] %v1236_v51 }

// kernel: critic_forward.13
= control target key start
LH: loop header
LB: loop body
LE: loop exit
PB: predicated region body
PF: predicated region fallthrough
CT: control target
= control target key end

     0   :  { %s1574_s0 = inlined_call_operand.vmem [shape: bf16[640,128], index: 0, kind: input, shape index: {}]   ;;  %s1575_s1 = inlined_call_operand.vmem [shape: bf16[64,640], index: 1, kind: input, shape index: {}]   ;;  %s1576_s2 = inlined_call_operand.vmem [shape: f32[64,1], index: 2, kind: input, shape index: {}]   ;;  %s1577_s3 = inlined_call_operand.vmem [shape: f32[64,1], index: 3, kind: input, shape index: {}]   ;;  %s1578_s4 = inlined_call_operand.vmem [shape: f32[64,128], index: 4, kind: output, shape index: {}]  }
   0x1   :  { %v1124_v0 = vld [vmem:[%s1574_s0 + $0x40] sm:$0xff]   ;;  %v1128_v4 = vld [vmem:[%s1574_s0 + $0x48] sm:$0xff]   ;;  %v1132_v8 = vld [vmem:[%s1574_s0 + $0x50] sm:$0xff]  }
   0x2   :  { %v1125_v1 = vld [vmem:[%s1574_s0 + $0xc0] sm:$0xff]   ;;  %989 = vmatprep.subr.bf16.mxu0 %v1124_v0  ;;  %v1129_v5 = vld [vmem:[%s1574_s0 + $0xc8] sm:$0xff]   ;;  %v1133_v9 = vld [vmem:[%s1574_s0 + $0xd0] sm:$0xff]  }
   0x3   :  { %v1126_v2 = vld [vmem:[%s1574_s0] sm:$0xff]   ;;  %1029 = vmatprep.subr.bf16.mxu1 %v1125_v1  ;;  %v1130_v6 = vld [vmem:[%s1574_s0 + $0x8] sm:$0xff]   ;;  %v1134_v10 = vld [vmem:[%s1574_s0 + $0x10] sm:$0xff]  }
   0x4   :  { %v1127_v3 = vld [vmem:[%s1574_s0 + $0x80] sm:$0xff]   ;;  %990 = vmatpush3.bf16.msra.mxu0 %v1126_v2  ;;  %v1131_v7 = vld [vmem:[%s1574_s0 + $0x88] sm:$0xff]   ;;  %v1135_v11 = vld [vmem:[%s1574_s0 + $0x90] sm:$0xff]  }
   0x5   :  { %1030 = vmatpush3.bf16.msra.mxu1 %v1127_v3  ;;  %991 = vmatprep.subr.bf16.mxu0 %v1128_v4  ;;  %v1136_v12 = vld [vmem:[%s1574_s0 + $0x58] sm:$0xff]   ;;  %v1140_v16 = vld [vmem:[%s1574_s0 + $0x60] sm:$0xff]   ;;  %v1144_v20 = vld [vmem:[%s1574_s0 + $0x68] sm:$0xff]  }
   0x6   :  { %1031 = vmatprep.subr.bf16.mxu1 %v1129_v5  ;;  %v1137_v13 = vld [vmem:[%s1574_s0 + $0xd8] sm:$0xff]   ;;  %v1141_v17 = vld [vmem:[%s1574_s0 + $0xe0] sm:$0xff]   ;;  %v1145_v21 = vld [vmem:[%s1574_s0 + $0xe8] sm:$0xff]  }
   0x7   :  { %v1138_v14 = vld [vmem:[%s1574_s0 + $0x18] sm:$0xff]   ;;  %v1142_v18 = vld [vmem:[%s1574_s0 + $0x20] sm:$0xff]   ;;  %v1146_v22 = vld [vmem:[%s1574_s0 + $0x28] sm:$0xff]  }
   0x8   :  { %992 = vmatpush3.bf16.msra.mxu0 %v1130_v6  ;;  %v1139_v15 = vld [vmem:[%s1574_s0 + $0x98] sm:$0xff]   ;;  %v1143_v19 = vld [vmem:[%s1574_s0 + $0xa0] sm:$0xff]   ;;  %v1147_v23 = vld [vmem:[%s1574_s0 + $0xa8] sm:$0xff]  }
   0x9   :  { %1032 = vmatpush3.bf16.msra.mxu1 %v1131_v7  ;;  %993 = vmatprep.subr.bf16.mxu0 %v1132_v8  ;;  %v1148_v24 = vld [vmem:[%s1574_s0 + $0x70] sm:$0xff]   ;;  %v1152_v28 = vld [vmem:[%s1574_s0 + $0x78] sm:$0xff]   ;;  %v1161_v35 = vld [vmem:[%s1575_s1 + $0xc] ss:$20 sps:$4 sm:$0xff]  }
   0xa   :  { %1033 = vmatprep.subr.bf16.mxu1 %v1133_v9  ;;  %v1149_v25 = vld [vmem:[%s1574_s0 + $0xf0] sm:$0xff]   ;;  %v1153_v29 = vld [vmem:[%s1574_s0 + $0xf8] sm:$0xff]   ;;  %v1162_v36 = vld [vmem:[%s1574_s0 + $0x100] sm:$0xff]   ;;  %563 = vmatprep.mubr.bf16.mxu1 %v1161_v35 }
   0xb   :  { %v1150_v26 = vld [vmem:[%s1574_s0 + $0x30] sm:$0xff]   ;;  %v1154_v30 = vld [vmem:[%s1574_s0 + $0x38] sm:$0xff]   ;;  %v1163_v37 = vld [vmem:[%s1574_s0 + $0x108] sm:$0xff]  }
   0xc   :  { %994 = vmatpush3.bf16.msra.mxu0 %v1134_v10  ;;  %v1151_v27 = vld [vmem:[%s1574_s0 + $0xb0] sm:$0xff]   ;;  %v1155_v31 = vld [vmem:[%s1574_s0 + $0xb8] sm:$0xff]   ;;  %v1164_v38 = vld [vmem:[%s1575_s1 + $0x2c] ss:$20 sps:$4 sm:$0xff]  }
   0xd   :  { %1034 = vmatpush3.bf16.msra.mxu1 %v1135_v11  ;;  %995 = vmatprep.subr.bf16.mxu0 %v1136_v12  ;;  %v1156_v32 = vld [vmem:[%s1575_s1] ss:$20 sps:$4 sm:$0xff]   ;;  %v1158_v33 = vld [vmem:[%s1575_s1 + $0x4] ss:$20 sps:$4 sm:$0xff]   ;;  %v1159_v34 = vld [vmem:[%s1575_s1 + $0x8] ss:$20 sps:$4 sm:$0xff]  }
   0xe   :  { %1035 = vmatprep.subr.bf16.mxu1 %v1137_v13  ;;  %498 = vmatprep.mubr.bf16.mxu0 %v1158_v33  ;;  %v1166_v39 = vld [vmem:[%s1575_s1 + $0x34] ss:$20 sps:$4 sm:$0xff]   ;;  %v1169_v42 = vld [vmem:[%s1575_s1 + $0x30] ss:$20 sps:$4 sm:$0xff]   ;;  %v1171_v44 = vld [vmem:[%s1574_s0 + $0x118] sm:$0xff]  }
   0xf   :  { %v1168_v40 = vld [vmem:[%s1575_s1 + $0x28] ss:$20 sps:$4 sm:$0xff]   ;;  %v1170_v41 = vld [vmem:[%s1574_s0 + $0x110] sm:$0xff]   ;;  %v1178_v46 = vld [vmem:[%s1574_s0 + $0x120] sm:$0xff]  }
  0x10   :  { %996 = vmatpush3.bf16.msra.mxu0 %v1138_v14  ;;  %v1172_v43 = vld [vmem:[%s1575_s1 + $0x54] ss:$20 sps:$4 sm:$0xff]   ;;  %v1174_v45 = vld [vmem:[%s1575_s1 + $0x5c] ss:$20 sps:$4 sm:$0xff]   ;;  %v1177_v48 = vld [vmem:[%s1575_s1 + $0x58] ss:$20 sps:$4 sm:$0xff]  }
  0x11   :  { %1036 = vmatpush3.bf16.msra.mxu1 %v1139_v15  ;;  %997 = vmatprep.subr.bf16.mxu0 %v1140_v16  ;;  %v1176_v47 = vld [vmem:[%s1575_s1 + $0x50] ss:$20 sps:$4 sm:$0xff]   ;;  %v1179_v51 = vld [vmem:[%s1574_s0 + $0x128] sm:$0xff]   ;;  %v1185_v54 = vld [vmem:[%s1575_s1 + $0x80] ss:$20 sps:$4 sm:$0xff]  }
  0x12   :  { %1037 = vmatprep.subr.bf16.mxu1 %v1141_v17  ;;  %v1180_v49 = vld [vmem:[%s1575_s1 + $0x7c] ss:$20 sps:$4 sm:$0xff]   ;;  %v1182_v50 = vld [vmem:[%s1575_s1 + $0x84] ss:$20 sps:$4 sm:$0xff]   ;;  %v1189_v56 = vld [vmem:[%s1575_s1 + $0x60] ss:$20 sps:$4 sm:$0xff]  }
  0x13   :  { %v1186_v52 = vld [vmem:[%s1574_s0 + $0x130] sm:$0xff]   ;;  %v1184_v53 = vld [vmem:[%s1575_s1 + $0x78] ss:$20 sps:$4 sm:$0xff]   ;;  %v1191_v59 = vld [vmem:[%s1575_s1 + $0x88] ss:$20 sps:$4 sm:$0xff]  }
  0x14   :  { %998 = vmatpush3.bf16.msra.mxu0 %v1142_v18  ;;  %v1188_v55 = vld [vmem:[%s1575_s1 + $0x10] ss:$20 sps:$4 sm:$0xff]   ;;  %v1187_v57 = vld [vmem:[%s1574_s0 + $0x138] sm:$0xff]  }
  0x15   :  { %1038 = vmatpush3.bf16.msra.mxu1 %v1143_v19  ;;  %999 = vmatprep.subr.bf16.mxu0 %v1144_v20  ;;  %v1190_v58 = vld [vmem:[%s1575_s1 + $0x38] ss:$20 sps:$4 sm:$0xff]  }
  0x16   :  { %1039 = vmatprep.subr.bf16.mxu1 %v1145_v21 }
  0x18   :  { %1000 = vmatpush3.bf16.msra.mxu0 %v1146_v22 }
  0x19   :  { %1040 = vmatpush3.bf16.msra.mxu1 %v1147_v23  ;;  %1001 = vmatprep.subr.bf16.mxu0 %v1148_v24 }
  0x1a   :  { %1041 = vmatprep.subr.bf16.mxu1 %v1149_v25 }
  0x1c   :  { %1002 = vmatpush3.bf16.msra.mxu0 %v1150_v26 }
  0x1d   :  { %1042 = vmatpush3.bf16.msra.mxu1 %v1151_v27  ;;  %1003 = vmatprep.subr.bf16.mxu0 %v1152_v28 }
  0x1e   :  { %1043 = vmatprep.subr.bf16.mxu1 %v1153_v29 }
  0x20   :  { %1004 = vmatpush3.bf16.msra.mxu0 %v1154_v30 }
  0x21   :  { %1044 = vmatpush3.bf16.msra.mxu1 %v1155_v31  ;;  %1081 = vmatprep.subr.bf16.mxu0 %v1162_v36 }
  0x22   :  { %1105 = vmatprep.subr.bf16.mxu1 %v1162_v36 }
  0x23   :  { %499 = vmatmul.mubr.bf16.vlgmr.msra.gmra.mrb[0].mxu0 %v1156_v32 }
  0x24   :  { %564 = vmatmul.mubr.bf16.vlgmr.msra.gmra.mrb[0].mxu1 %v1159_v34  ;;  %1082 = vmatpush3.bf16.msra.mxu0 %v1162_v36 }
  0x25   :  { %1113 = vmatpush3.bf16.msra.mxu1 %v1162_v36  ;;  %1083 = vmatprep.subr.bf16.mxu0 %v1163_v37 }
  0x26   :  { %1106 = vmatprep.subr.bf16.mxu1 %v1163_v37  ;;  %506 = vmatprep.mubr.bf16.mxu0 %v1164_v38 }
  0x27   :  { %571 = vmatprep.mubr.bf16.mxu1 %v1166_v39 }
  0x28   :  { %1084 = vmatpush3.bf16.msra.mxu0 %v1163_v37 }
  0x29   :  { %1114 = vmatpush3.bf16.msra.mxu1 %v1163_v37  ;;  %1085 = vmatprep.subr.bf16.mxu0 %v1170_v41 }
  0x2a   :  { %1107 = vmatprep.subr.bf16.mxu1 %v1170_v41 }
  0x2b   :  { %507 = vmatmul.mubr.bf16.gmra.mrb[4].mxu0 %v1168_v40 }
  0x2c   :  { %572 = vmatmul.mubr.bf16.gmra.mrb[4].mxu1 %v1169_v42  ;;  %514 = vmatprep.mubr.bf16.mxu0 %v1172_v43 }
  0x2d   :  { %1086 = vmatpush3.bf16.msra.mxu0 %v1170_v41  ;;  %579 = vmatprep.mubr.bf16.mxu1 %v1174_v45 }
  0x2e   :  { %1115 = vmatpush3.bf16.msra.mxu1 %v1170_v41  ;;  %1087 = vmatprep.subr.bf16.mxu0 %v1171_v44 }
  0x2f   :  { %1108 = vmatprep.subr.bf16.mxu1 %v1171_v44 }
  0x31   :  { %1088 = vmatpush3.bf16.msra.mxu0 %v1171_v44 }
  0x32   :  { %1116 = vmatpush3.bf16.msra.mxu1 %v1171_v44  ;;  %1089 = vmatprep.subr.bf16.mxu0 %v1178_v46 }
  0x33   :  { %515 = vmatmul.mubr.bf16.gmra.mrb[8].mxu0 %v1176_v47  ;;  %1109 = vmatprep.subr.bf16.mxu1 %v1178_v46 }
  0x34   :  { %580 = vmatmul.mubr.bf16.gmra.mrb[8].mxu1 %v1177_v48  ;;  %522 = vmatprep.mubr.bf16.mxu0 %v1180_v49 }
  0x35   :  { %1090 = vmatpush3.bf16.msra.mxu0 %v1178_v46  ;;  %587 = vmatprep.mubr.bf16.mxu1 %v1182_v50 }
  0x36   :  { %1117 = vmatpush3.bf16.msra.mxu1 %v1178_v46  ;;  %1091 = vmatprep.subr.bf16.mxu0 %v1179_v51 }
  0x37   :  { %1110 = vmatprep.subr.bf16.mxu1 %v1179_v51 }
  0x39   :  { %1092 = vmatpush3.bf16.msra.mxu0 %v1179_v51 }
  0x3a   :  { %1118 = vmatpush3.bf16.msra.mxu1 %v1179_v51  ;;  %1093 = vmatprep.subr.bf16.mxu0 %v1186_v52 }
  0x3b   :  { %523 = vmatmul.mubr.bf16.gmra.mrb[12].mxu0 %v1184_v53  ;;  %1111 = vmatprep.subr.bf16.mxu1 %v1186_v52 }
  0x3c   :  { %588 = vmatmul.mubr.bf16.gmra.mrb[12].mxu1 %v1185_v54  ;;  %1097 = vmatprep.mubr.bf16.mxu0 %v1188_v55 }
  0x3d   :  { %1094 = vmatpush3.bf16.msra.mxu0 %v1186_v52  ;;  %1101 = vmatprep.mubr.bf16.mxu1 %v1189_v56 }
  0x3e   :  { %1119 = vmatpush3.bf16.msra.mxu1 %v1186_v52  ;;  %1095 = vmatprep.subr.bf16.mxu0 %v1187_v57 }
  0x3f   :  { %1112 = vmatprep.subr.bf16.mxu1 %v1187_v57 }
  0x41   :  { %1096 = vmatpush3.bf16.msra.mxu0 %v1187_v57 }
  0x42   :  { %1120 = vmatpush3.bf16.msra.mxu1 %v1187_v57 }
  0x44   :  { %1098 = vmatmul.mubr.bf16.vlgmr.msra.gmra.mrb[16].mxu0 %v1190_v58 }
  0x45   :  { %1102 = vmatmul.mubr.bf16.vlgmr.msra.gmra.mrb[16].mxu1 %v1191_v59 }
  0xf6   :  { %v1005_v60 = vpop.f32.mrb[0].mxu0 }
  0xf7   :  { %v1045_v61 = vpop.f32.mrb[0].mxu1  ;;  %v1006_v62 = vpop.f32.mrb[1].mxu0 }
  0xf8   :  { %v1007_v63 = vadd.f32 %v1006_v62, %v1005_v60  ;;  %v1046_v0 = vpop.f32.mrb[1].mxu1  ;;  %v1008_v1 = vpop.f32.mrb[2].mxu0 }
  0xf9   :  { %v1047_v2 = vadd.f32 %v1046_v0, %v1045_v61  ;;  %v1048_v3 = vpop.f32.mrb[2].mxu1  ;;  %v1009_v4 = vpop.f32.mrb[3].mxu0 }
  0xfa   :  { %v1010_v5 = vadd.f32 %v1009_v4, %v1008_v1  ;;  %v1049_v6 = vpop.f32.mrb[3].mxu1 }
  0xfb   :  { %v1050_v7 = vadd.f32 %v1049_v6, %v1048_v3  ;;  %v566_v8 = vadd.f32 %v1047_v2, %v1007_v63 }
  0xfd   :  { %v569_v9 = vadd.f32 %v1050_v7, %v1010_v5 }
  0xfe   :  { %v1011_v10 = vpop.f32.mrb[4].mxu0 }
  0xff   :  { %v1051_v11 = vpop.f32.mrb[4].mxu1  ;;  %v1012_v12 = vpop.f32.mrb[5].mxu0 }
 0x100   :  { %v1013_v13 = vadd.f32 %v1012_v12, %v1011_v10  ;;  %v1052_v14 = vpop.f32.mrb[5].mxu1  ;;  %v1014_v15 = vpop.f32.mrb[6].mxu0  ;;  %v1208_v12 = vmov 0  }
 0x101   :  { %v1053_v16 = vadd.f32 %v1052_v14, %v1051_v11  ;;  %v1054_v17 = vpop.f32.mrb[6].mxu1  ;;  %v1015_v18 = vpop.f32.mrb[7].mxu0  ;;  %1122 = vset.pattern.permute.xlu1 %v1208_v12  ;;  %1123 = vset.pattern.permute.xlu0 %v1208_v12  ;;  %v743_v12 = vld [vmem:[%s1576_s2 + $0x10] sm:$0xff] }
 0x102   :  { %v1016_v19 = vadd.f32 %v1015_v18, %v1014_v15  ;;  %v1055_v20 = vpop.f32.mrb[7].mxu1 }
 0x103   :  { %v1056_v21 = vadd.f32 %v1055_v20, %v1054_v17  ;;  %v574_v22 = vadd.f32 %v1053_v16, %v1013_v13 }
 0x105   :  { %v577_v23 = vadd.f32 %v1056_v21, %v1016_v19 }
 0x106   :  { %v1017_v24 = vpop.f32.mrb[8].mxu0 }
 0x107   :  { %v1057_v25 = vpop.f32.mrb[8].mxu1  ;;  %v1018_v26 = vpop.f32.mrb[9].mxu0 }
 0x108   :  { %v1019_v27 = vadd.f32 %v1018_v26, %v1017_v24  ;;  %v1058_v28 = vpop.f32.mrb[9].mxu1  ;;  %v1020_v29 = vpop.f32.mrb[10].mxu0 }
 0x109   :  { %v1059_v30 = vadd.f32 %v1058_v28, %v1057_v25  ;;  %v1060_v31 = vpop.f32.mrb[10].mxu1  ;;  %v1021_v32 = vpop.f32.mrb[11].mxu0 }
 0x10a   :  { %v1022_v33 = vadd.f32 %v1021_v32, %v1020_v29  ;;  %v1061_v34 = vpop.f32.mrb[11].mxu1 }
 0x10b   :  { %v1062_v35 = vadd.f32 %v1061_v34, %v1060_v31  ;;  %v582_v36 = vadd.f32 %v1059_v30, %v1019_v27 }
 0x10d   :  { %v585_v37 = vadd.f32 %v1062_v35, %v1022_v33 }
 0x10e   :  { %v1023_v38 = vpop.f32.mrb[12].mxu0 }
 0x10f   :  { %v1063_v39 = vpop.f32.mrb[12].mxu1  ;;  %v1024_v40 = vpop.f32.mrb[13].mxu0 }
 0x110   :  { %v1025_v41 = vadd.f32 %v1024_v40, %v1023_v38  ;;  %v1064_v42 = vpop.f32.mrb[13].mxu1  ;;  %v1026_v43 = vpop.f32.mrb[14].mxu0 }
 0x111   :  { %v1065_v44 = vadd.f32 %v1064_v42, %v1063_v39  ;;  %v1066_v45 = vpop.f32.mrb[14].mxu1  ;;  %v1027_v46 = vpop.f32.mrb[15].mxu0 }
 0x112   :  { %v1028_v47 = vadd.f32 %v1027_v46, %v1026_v43  ;;  %v1067_v48 = vpop.f32.mrb[15].mxu1 }
 0x113   :  { %v1068_v49 = vadd.f32 %v1067_v48, %v1066_v45  ;;  %v590_v50 = vadd.f32 %v1065_v44, %v1025_v41 }
 0x115   :  { %v593_v51 = vadd.f32 %v1068_v49, %v1028_v47 }
 0x117   :  { %v1099_v52 = vpop.f32.mrb[16].mxu0 }
 0x118   :  { %v1414_v53 = vadd.f32 %v1099_v52, %v574_v22  ;;  %v1103_v54 = vpop.f32.mrb[16].mxu1  ;;  %v630_v55 = vpop.f32.mrb[17].mxu0 }
 0x119   :  { %v1416_v56 = vadd.f32 %v1103_v54, %v590_v50  ;;  %v1418_v57 = vadd.f32 %v630_v55, %v566_v8  ;;  %v646_v58 = vpop.f32.mrb[17].mxu1  ;;  %v1100_v59 = vpop.f32.mrb[18].mxu0 }
 0x11a   :  { %v1420_v60 = vadd.f32 %v646_v58, %v582_v36  ;;  %v1422_v61 = vadd.f32 %v1100_v59, %v577_v23  ;;  %v1104_v62 = vpop.f32.mrb[18].mxu1  ;;  %v633_v63 = vpop.f32.mrb[19].mxu0  ;;  %665 = vadd.xlane.f32.xlu1 %v1414_v53  ;;  %v687_v4 = vmul.f32 %v1414_v53, %v1414_v53 }
 0x11b   :  { %v1425_v0 = vadd.f32 %v1104_v62, %v593_v51  ;;  %v1427_v1 = vadd.f32 %v633_v63, %v569_v9  ;;  %v649_v2 = vpop.f32.mrb[19].mxu1  ;;  %673 = vadd.xlane.f32.xlu0 %v1416_v56  ;;  %v685_v7 = vmul.f32 %v1418_v57, %v1418_v57  ;;  %v691_v11 = vmul.f32 %v1416_v56, %v1416_v56 }
 0x11c   :  { %v1430_v3 = vadd.f32 %v649_v2, %v585_v37  ;;  %v688_v5 = vmul.f32 %v1422_v61, %v1422_v61  ;;  %v689_v9 = vmul.f32 %v1420_v60, %v1420_v60 }
 0x11d   :  { %v686_v6 = vmul.f32 %v1427_v1, %v1427_v1  ;;  %v692_v10 = vmul.f32 %v1425_v0, %v1425_v0 }
 0x11e   :  { %667 = vadd.xlane.f32.xlu1 %v1422_v61  ;;  %v690_v8 = vmul.f32 %v1430_v3, %v1430_v3 }
 0x11f   :  { %661 = vadd.xlane.f32.xlu0 %v1418_v57 }
 0x122   :  { %675 = vadd.xlane.f32.xlu1 %v1425_v0 }
 0x123   :  { %669 = vadd.xlane.f32.xlu0 %v1420_v60 }
 0x126   :  { %671 = vadd.xlane.f32.xlu1 %v1430_v3 }
 0x127   :  { %697 = vadd.xlane.f32.xlu0 %v687_v4 }
 0x12a   :  { %699 = vadd.xlane.f32.xlu1 %v688_v5 }
 0x12b   :  { %663 = vadd.xlane.f32.xlu0 %v1427_v1 }
 0x12e   :  { %695 = vadd.xlane.f32.xlu1 %v686_v6 }
 0x12f   :  { %693 = vadd.xlane.f32.xlu0 %v685_v7 }
 0x132   :  { %703 = vadd.xlane.f32.xlu1 %v690_v8 }
 0x133   :  { %701 = vadd.xlane.f32.xlu0 %v689_v9 }
 0x136   :  { %707 = vadd.xlane.f32.xlu1 %v692_v10 }
 0x137   :  { %705 = vadd.xlane.f32.xlu0 %v691_v11 }
 0x1a7   :  { %v666_v13 = vpop.xlane.xlu1 %665 }
 0x1a8   :  { %v674_v14 = vpop.xlane.xlu0 %673  ;;  %v1454_v19 = vmul.f32 0.125, %v666_v13 }
 0x1a9   :  { %v1478_v54 = vmul.f32 0.125, %v674_v14 }
 0x1aa   :  { %v719_v23 = vmul.f32 %v1454_v19, %v1454_v19 }
 0x1ab   :  { %v668_v15 = vpop.xlane.xlu1 %667  ;;  %v723_v10 = vmul.f32 %v1478_v54, %v1478_v54 }
 0x1ac   :  { %v662_v16 = vpop.xlane.xlu0 %661  ;;  %v1456_v21 = vmul.f32 0.125, %v668_v15 }
 0x1ad   :  { %v1462_v30 = vmul.f32 0.125, %v662_v16 }
 0x1ae   :  { %v720_v27 = vmul.f32 %v1456_v21, %v1456_v21 }
 0x1af   :  { %v676_v17 = vpop.xlane.xlu1 %675  ;;  %v717_v41 = vmul.f32 %v1462_v30, %v1462_v30 }
 0x1b0   :  { %v670_v18 = vpop.xlane.xlu0 %669  ;;  %v1474_v46 = vmul.f32 0.125, %v676_v17 }
 0x1b1   :  { %v1472_v42 = vmul.f32 0.125, %v670_v18 }
 0x1b2   :  { %v724_v6 = vmul.f32 %v1474_v46, %v1474_v46 }
 0x1b3   :  { %v672_v20 = vpop.xlane.xlu1 %671  ;;  %v721_v55 = vmul.f32 %v1472_v42, %v1472_v42 }
 0x1b4   :  { %v698_v22 = vpop.xlane.xlu0 %697  ;;  %v1466_v36 = vmul.f32 0.125, %v672_v20 }
 0x1b5   :  { %v711_v24 = vmul.f32 0.125, %v698_v22 }
 0x1b6   :  { %v722_v49 = vmul.f32 %v1466_v36, %v1466_v36 }
 0x1b7   :  { %v727_v25 = vsub.f32 %v711_v24, %v719_v23  ;;  %v700_v26 = vpop.xlane.xlu1 %699  ;;  %v744_v23 = vld [vmem:[%s1576_s2 + $0x18] sm:$0xff] }
 0x1b8   :  { %v712_v28 = vmul.f32 0.125, %v700_v26  ;;  %v664_v29 = vpop.xlane.xlu0 %663 }
 0x1b9   :  { %v735_v31 = vmax.f32 %v727_v25, 0.0  ;;  %v1464_v32 = vmul.f32 0.125, %v664_v29  ;;  %v741_v29 = vld [vmem:[%s1576_s2] sm:$0xff] }
 0x1ba   :  { %v728_v33 = vsub.f32 %v712_v28, %v720_v27 }
 0x1bb   :  { %v751_v34 = vadd.f32 1e-05, %v735_v31  ;;  %v696_v35 = vpop.xlane.xlu1 %695  ;;  %v718_v38 = vmul.f32 %v1464_v32, %v1464_v32  ;;  %v742_v31 = vld [vmem:[%s1576_s2 + $0x8] sm:$0xff] }
 0x1bc   :  { %v736_v37 = vmax.f32 %v728_v33, 0.0  ;;  %v710_v39 = vmul.f32 0.125, %v696_v35  ;;  %v694_v40 = vpop.xlane.xlu0 %693 }
 0x1bd   :  { %1192 = vrsqrt.f32 %v751_v34  ;;  %v709_v43 = vmul.f32 0.125, %v694_v40  ;;  %v746_v40 = vld [vmem:[%s1576_s2 + $0x28] sm:$0xff] }
 0x1be   :  { %v752_v44 = vadd.f32 1e-05, %v736_v37  ;;  %v726_v45 = vsub.f32 %v710_v39, %v718_v38  ;;  %v776_v39 = vld [vmem:[%s1577_s3 + $0x18] sm:$0xff] }
 0x1bf   :  { %v725_v47 = vsub.f32 %v709_v43, %v717_v41  ;;  %v704_v48 = vpop.xlane.xlu1 %703 }
 0x1c0   :  { %1194 = vrsqrt.f32 %v752_v44  ;;  %v734_v50 = vmax.f32 %v726_v45, 0.0  ;;  %v714_v51 = vmul.f32 0.125, %v704_v48  ;;  %v702_v52 = vpop.xlane.xlu0 %701  ;;  %v748_v48 = vld [vmem:[%s1576_s2 + $0x38] sm:$0xff] }
 0x1c1   :  { %v733_v58 = vmax.f32 %v725_v47, 0.0  ;;  %v713_v59 = vmul.f32 0.125, %v702_v52  ;;  %v774_v47 = vld [vmem:[%s1577_s3 + $0x8] sm:$0xff] }
 0x1c2   :  { %v750_v62 = vadd.f32 1e-05, %v734_v50  ;;  %v730_v63 = vsub.f32 %v714_v51, %v722_v49 }
 0x1c3   :  { %v749_v2 = vadd.f32 1e-05, %v733_v58  ;;  %v729_v4 = vsub.f32 %v713_v59, %v721_v55  ;;  %v708_v5 = vpop.xlane.xlu1 %707  ;;  %v778_v59 = vld [vmem:[%s1577_s3 + $0x28] sm:$0xff] }
 0x1c4   :  { %1196 = vrsqrt.f32 %v750_v62  ;;  %v738_v7 = vmax.f32 %v730_v63, 0.0  ;;  %v716_v8 = vmul.f32 0.125, %v708_v5  ;;  %v706_v9 = vpop.xlane.xlu0 %705  ;;  %v745_v62 = vld [vmem:[%s1576_s2 + $0x20] sm:$0xff] }
 0x1c5   :  { %1198 = vrsqrt.f32 %v749_v2  ;;  %v715_v11 = vmul.f32 0.125, %v706_v9  ;;  %v737_v16 = vmax.f32 %v729_v4, 0.0  ;;  %v773_v9 = vld [vmem:[%s1577_s3] sm:$0xff] }
 0x1c6   :  { %v754_v13 = vadd.f32 1e-05, %v738_v7  ;;  %v732_v14 = vsub.f32 %v716_v8, %v724_v6  ;;  %v775_v7 = vld [vmem:[%s1577_s3 + $0x10] sm:$0xff] }
 0x1c7   :  { %v1193_v15 = vpop.eup %1192  ;;  %v731_v17 = vsub.f32 %v715_v11, %v723_v10  ;;  %v753_v26 = vadd.f32 1e-05, %v737_v16 }
 0x1c8   :  { %1200 = vrsqrt.f32 %v754_v13  ;;  %v740_v18 = vmax.f32 %v732_v14, 0.0  ;;  %v767_v20 = vmul.f32 %v1193_v15, %v743_v12 }
 0x1c9   :  { %v739_v22 = vmax.f32 %v731_v17, 0.0 }
 0x1ca   :  { %v1195_v24 = vpop.eup %1194  ;;  %v756_v25 = vadd.f32 1e-05, %v740_v18  ;;  %809 = vperm.xlu1 %1122, %v767_v20   ;;  %v783_v6 = vmul.f32 %v767_v20, %v1454_v19  ;;  %v777_v19 = vld [vmem:[%s1577_s3 + $0x20] sm:$0xff] }
 0x1cb   :  { %v755_v27 = vadd.f32 1e-05, %v739_v22  ;;  %v768_v28 = vmul.f32 %v1195_v24, %v744_v23 }
 0x1cc   :  { %1202 = vrsqrt.f32 %v756_v25  ;;  %v791_v8 = vsub.f32 %v775_v7, %v783_v6 }
 0x1cd   :  { %1204 = vrsqrt.f32 %v755_v27  ;;  %v784_v37 = vmul.f32 %v768_v28, %v1456_v21  ;;  %v747_v21 = vld [vmem:[%s1576_s2 + $0x30] sm:$0xff] }
 0x1ce   :  { %v1197_v33 = vpop.eup %1196  ;;  %1206 = vrsqrt.f32 %v753_v26 }
 0x1cf   :  { %v1199_v34 = vpop.eup %1198  ;;  %v766_v38 = vmul.f32 %v1197_v33, %v742_v31  ;;  %v792_v43 = vsub.f32 %v776_v39, %v784_v37 }
 0x1d0   :  { %v765_v35 = vmul.f32 %v1199_v34, %v741_v29 }
 0x1d1   :  { %v782_v44 = vmul.f32 %v766_v38, %v1464_v32 }
 0x1d2   :  { %v1201_v41 = vpop.eup %1200  ;;  %799 = vperm.xlu0 %1123, %v765_v35  }
 0x1d3   :  { %v770_v45 = vmul.f32 %v1201_v41, %v746_v40  ;;  %v790_v51 = vsub.f32 %v774_v47, %v782_v44 }
 0x1d5   :  { %v786_v32 = vmul.f32 %v770_v45, %v1466_v36  ;;  %v780_v36 = vld [vmem:[%s1577_s3 + $0x38] sm:$0xff] }
 0x1d6   :  { %v1203_v49 = vpop.eup %1202  ;;  %862 = vperm.xlu0 %1123, %v792_v43  }
 0x1d7   :  { %v1205_v50 = vpop.eup %1204  ;;  %v772_v55 = vmul.f32 %v1203_v49, %v748_v48  ;;  %v794_v63 = vsub.f32 %v778_v59, %v786_v32 }
 0x1d8   :  { %v771_v52 = vmul.f32 %v1205_v50, %v747_v21  ;;  %v1207_v58 = vpop.eup %1206 }
 0x1d9   :  { %v769_v2 = vmul.f32 %v1207_v58, %v745_v62  ;;  %v788_v4 = vmul.f32 %v772_v55, %v1474_v46  ;;  %v781_v46 = vmul.f32 %v765_v35, %v1462_v30  ;;  %v779_v30 = vld [vmem:[%s1577_s3 + $0x30] sm:$0xff] }
 0x1da   :  { %852 = vperm.xlu0 %1123, %v790_v51   ;;  %829 = vperm.xlu1 %1122, %v771_v52   ;;  %v787_v13 = vmul.f32 %v771_v52, %v1478_v54 }
 0x1db   :  { %v796_v5 = vsub.f32 %v780_v36, %v788_v4  ;;  %v789_v10 = vsub.f32 %v773_v9, %v781_v46  ;;  %v785_v11 = vmul.f32 %v769_v2, %v1472_v42 }
 0x1dc   :  { %v795_v14 = vsub.f32 %v779_v30, %v787_v13 }
 0x1dd   :  { %v793_v12 = vsub.f32 %v777_v19, %v785_v11 }
 0x1de   :  { %872 = vperm.xlu0 %1123, %v794_v63   ;;  %819 = vperm.xlu1 %1122, %v769_v2  }
 0x1e2   :  { %882 = vperm.xlu0 %1123, %v796_v5   ;;  %814 = vperm.xlu1 %1122, %v768_v28  }
 0x1e6   :  { %834 = vperm.xlu1 %1122, %v772_v55  }
 0x1ea   :  { %804 = vperm.xlu1 %1122, %v766_v38  }
 0x1ee   :  { %824 = vperm.xlu1 %1122, %v770_v45  }
 0x1f2   :  { %857 = vperm.xlu1 %1122, %v791_v8  }
 0x1f6   :  { %847 = vperm.xlu1 %1122, %v789_v10  }
 0x1fa   :  { %867 = vperm.xlu1 %1122, %v793_v12  }
 0x1fe   :  { %877 = vperm.xlu1 %1122, %v795_v14  }
 0x249   :  { %v810_v16 = vpop.permute.xlu1 %809 }
 0x24a   :  { %v839_v40 = vmul.f32 %v810_v16, %v1414_v53 }
 0x251   :  { %v800_v15 = vpop.permute.xlu0 %799 }
 0x252   :  { %v837_v47 = vmul.f32 %v800_v15, %v1418_v57 }
 0x255   :  { %v863_v17 = vpop.permute.xlu0 %862 }
 0x259   :  { %v830_v18 = vpop.permute.xlu1 %829  ;;  %v853_v42 = vpop.permute.xlu0 %852 }
 0x25a   :  { %v843_v55 = vmul.f32 %v830_v18, %v1416_v56 }
 0x25d   :  { %v820_v20 = vpop.permute.xlu1 %819  ;;  %v873_v22 = vpop.permute.xlu0 %872 }
 0x25e   :  { %v841_v50 = vmul.f32 %v820_v20, %v1420_v60 }
 0x261   :  { %v815_v23 = vpop.permute.xlu1 %814  ;;  %v883_v28 = vpop.permute.xlu0 %882 }
 0x262   :  { %v840_v24 = vmul.f32 %v815_v23, %v1422_v61 }
 0x264   :  { %v888_v25 = vadd.f32 %v863_v17, %v840_v24 }
 0x265   :  { %v835_v26 = vpop.permute.xlu1 %834 }
 0x266   :  { %vm896_vm0 = vcmp.ge.f32.partialorder %v888_v25, 0.0  ;;  %v904_v54 = vmul.f32 0.2, %v888_v25  ;;  %v844_v27 = vmul.f32 %v835_v26, %v1425_v0 }
 0x268   :  { %v912_v29 = vsel %vm896_vm0, %v888_v25, %v904_v54  ;;  %v892_v31 = vadd.f32 %v883_v28, %v844_v27 }
 0x269   :  { %920 = vst [vmem:[%s1578_s4 + $0x18] sm:$0xff] %v912_v29  ;;  %v805_v33 = vpop.permute.xlu1 %804 }
 0x26a   :  { %vm900_vm1 = vcmp.ge.f32.partialorder %v892_v31, 0.0  ;;  %v908_v34 = vmul.f32 0.2, %v892_v31  ;;  %v838_v35 = vmul.f32 %v805_v33, %v1427_v1 }
 0x26c   :  { %v916_v37 = vsel %vm900_vm1, %v892_v31, %v908_v34  ;;  %v886_v61 = vadd.f32 %v853_v42, %v838_v35 }
 0x26d   :  { %924 = vst [vmem:[%s1578_s4 + $0x38] sm:$0xff] %v916_v37  ;;  %v825_v38 = vpop.permute.xlu1 %824 }
 0x26e   :  { %vm894_vm2 = vcmp.ge.f32.partialorder %v886_v61, 0.0  ;;  %v902_v0 = vmul.f32 0.2, %v886_v61  ;;  %v842_v39 = vmul.f32 %v825_v38, %v1430_v3 }
 0x270   :  { %v910_v41 = vsel %vm894_vm2, %v886_v61, %v902_v0  ;;  %v890_v43 = vadd.f32 %v873_v22, %v842_v39 }
 0x271   :  { %918 = vst [vmem:[%s1578_s4 + $0x8] sm:$0xff] %v910_v41  ;;  %v858_v1 = vpop.permute.xlu1 %857 }
 0x272   :  { %vm898_vm3 = vcmp.ge.f32.partialorder %v890_v43, 0.0  ;;  %v906_v44 = vmul.f32 0.2, %v890_v43  ;;  %v887_v45 = vadd.f32 %v858_v1, %v839_v40 }
 0x274   :  { %v914_v21 = vsel %vm898_vm3, %v890_v43, %v906_v44  ;;  %vm895_vm4 = vcmp.ge.f32.partialorder %v887_v45, 0.0  ;;  %v903_v48 = vmul.f32 0.2, %v887_v45 }
 0x275   :  { %922 = vst [vmem:[%s1578_s4 + $0x28] sm:$0xff] %v914_v21  ;;  %v848_v53 = vpop.permute.xlu1 %847 }
 0x276   :  { %v911_v3 = vsel %vm895_vm4, %v887_v45, %v903_v48  ;;  %v885_v49 = vadd.f32 %v848_v53, %v837_v47 }
 0x277   :  { %919 = vst [vmem:[%s1578_s4 + $0x10] sm:$0xff] %v911_v3 }
 0x278   :  { %vm893_vm5 = vcmp.ge.f32.partialorder %v885_v49, 0.0  ;;  %v901_v51 = vmul.f32 0.2, %v885_v49 }
 0x279   :  { %v868_v52 = vpop.permute.xlu1 %867 }
 0x27a   :  { %v909_v57 = vsel %vm893_vm5, %v885_v49, %v901_v51  ;;  %v889_v32 = vadd.f32 %v868_v52, %v841_v50 }
 0x27b   :  { %917 = vst [vmem:[%s1578_s4] sm:$0xff] %v909_v57 }
 0x27c   :  { %vm897_vm6 = vcmp.ge.f32.partialorder %v889_v32, 0.0  ;;  %v905_v58 = vmul.f32 0.2, %v889_v32 }
 0x27d   :  { %v878_v59 = vpop.permute.xlu1 %877 }
 0x27e   :  { %v913_v62 = vsel %vm897_vm6, %v889_v32, %v905_v58  ;;  %v891_v63 = vadd.f32 %v878_v59, %v843_v55 }
 0x27f   :  { %921 = vst [vmem:[%s1578_s4 + $0x20] sm:$0xff] %v913_v62 }
 0x280   :  { %vm899_vm7 = vcmp.ge.f32.partialorder %v891_v63, 0.0  ;;  %v907_v60 = vmul.f32 0.2, %v891_v63 }
 0x282   :  { %v915_v2 = vsel %vm899_vm7, %v891_v63, %v907_v60 }
 0x283   :  { %923 = vst [vmem:[%s1578_s4 + $0x30] sm:$0xff] %v915_v2 }

</bundles_post_ra>
